<compile_context>
chip_gen: v6e
topology: v6e:2x2x1
jax: 0.10.0
libtpu: 0.0.40
codegen_flags: <defaults>
</compile_context>

<pallas_src>
import functools

import jax
import jax.numpy as jnp
from jax.experimental import pallas as pl
from jax.experimental.pallas import tpu as pltpu

# ---- scaled-down Wav2Vec2 config (use_weighted_layer_sum=True, proj=32, 2 labels)
CFG = dict(
    hidden_size=32,
    num_hidden_layers=2,
    num_attention_heads=2,
    intermediate_size=64,
    conv_dim=(32, 32),
    conv_kernel=(10, 3),
    conv_stride=(5, 2),
    pos_conv_kernel=3,
    pos_conv_groups=2,
    classifier_proj_size=32,
    num_labels=2,
    layer_norm_eps=1e-5,
)

_VMEM_LIMIT = 32 * 1024 * 1024  # safe on v5e/v6e/v7x; > v5e's 16 MiB default


# --------------------------------------------------------------------------
# Conv1d (channels-last), taps folded into ONE im2col matmul,
# fused with optional per-channel GroupNorm + GELU
# --------------------------------------------------------------------------
def _reshape_strided(x, stride):
    """[B, T, C] -> [B, ceil(T/stride), stride*C] so each conv tap becomes a
    contiguous (unit-stride) slice inside the kernel (no strided loads)."""
    B, T, C = x.shape
    Tp = -(-T // stride) * stride
    if Tp != T:
        x = jnp.pad(x, ((0, 0), (0, Tp - T), (0, 0)))
    return x.reshape(B, Tp // stride, stride * C)


def _conv1d_kernel(x_ref, w_ref, g_ref, b_ref, o_ref, *, k, stride, cin,
                   norm, activation, eps):
    t_out = o_ref.shape[1]
    x = x_ref[0].astype(jnp.float32)                      # [R, stride*Cin]
    # im2col: one deep-K contraction instead of k shallow dots.
    cols = []
    for j in range(k):                                    # static tap unpack
        r0 = j // stride
        c0 = (j % stride) * cin
        cols.append(x[r0:r0 + t_out, c0:c0 + cin])        # [t_out, Cin]
    xim = jnp.concatenate(cols, axis=1)                   # [t_out, k*Cin]
    y = jnp.dot(xim, w_ref[...].astype(jnp.float32),
                preferred_element_type=jnp.float32)       # [t_out, Cout]
    if norm:  # GroupNorm(num_groups == channels) == per-channel norm over time
        mu = jnp.mean(y, axis=0, keepdims=True)
        var = jnp.mean(jnp.square(y - mu), axis=0, keepdims=True)
        y = (y - mu) * jax.lax.rsqrt(var + eps) * g_ref[...] + b_ref[...]
    if activation == "gelu":
        y = jax.nn.gelu(y)  # TODO(synk): HF uses exact erf GELU; tanh approx here.
    o_ref[0] = y.astype(o_ref.dtype)


def pallas_conv1d_cl(x, w, *, stride, gn=None, activation=None, eps=1e-5):
    """x: [B, T, Cin] channels-last; w: [k, Cin, Cout]; bias-free conv."""
    B, T_in, Cin = x.shape
    k, _, Cout = w.shape
    T_out = (T_in - k) // stride + 1
    xr = _reshape_strided(x, stride)
    R, W = xr.shape[1], xr.shape[2]
    w2 = w.reshape(k * Cin, Cout)                          # rows: (tap, cin)
    if gn is None:
        g = jnp.ones((1, Cout), jnp.float32)
        b = jnp.zeros((1, Cout), jnp.float32)
        norm = False
    else:
        g, b = gn
        norm = True
    kernel = functools.partial(_conv1d_kernel, k=k, stride=stride, cin=Cin,
                               norm=norm, activation=activation, eps=eps)
    return pl.pallas_call(
        kernel,
        out_shape=jax.ShapeDtypeStruct((B, T_out, Cout), jnp.float32),
        grid=(B,),
        in_specs=[
            pl.BlockSpec((1, R, W), lambda i: (i, 0, 0)),
            pl.BlockSpec((k * Cin, Cout), lambda i: (0, 0)),
            pl.BlockSpec((1, Cout), lambda i: (0, 0)),
            pl.BlockSpec((1, Cout), lambda i: (0, 0)),
        ],
        out_specs=pl.BlockSpec((1, T_out, Cout), lambda i: (i, 0, 0)),
        compiler_params=pltpu.CompilerParams(
            dimension_semantics=("parallel",),
            vmem_limit_bytes=_VMEM_LIMIT),
    )(xr, w2, g, b)


# --------------------------------------------------------------------------
# Fused LayerNorm + Linear (feature projection), M-tiled grid
# --------------------------------------------------------------------------
def _ln_linear_kernel(x_ref, g_ref, b_ref, w_ref, bias_ref, o_ref, *, eps):
    x = x_ref[...].astype(jnp.float32)
    mu = jnp.mean(x, axis=-1, keepdims=True)
    var = jnp.mean(jnp.square(x - mu), axis=-1, keepdims=True)
    xn = (x - mu) * jax.lax.rsqrt(var + eps) * g_ref[...] + b_ref[...]
    y = jnp.dot(xn.astype(jnp.bfloat16), w_ref[...],
                preferred_element_type=jnp.float32) + bias_ref[...]
    o_ref[...] = y.astype(o_ref.dtype)


def pallas_ln_linear(x, g, b, w, bias, *, eps, block_m=256):
    M, K = x.shape
    N = w.shape[1]
    tm = min(block_m, M)
    Mp = ((M + tm - 1) // tm) * tm
    xp = jnp.pad(x, ((0, Mp - M), (0, 0))) if Mp != M else x
    out = pl.pallas_call(
        functools.partial(_ln_linear_kernel, eps=eps),
        out_shape=jax.ShapeDtypeStruct((Mp, N), jnp.float32),
        grid=(Mp // tm,),
        in_specs=[
            pl.BlockSpec((tm, K), lambda i: (i, 0)),
            pl.BlockSpec((1, K), lambda i: (0, 0)),
            pl.BlockSpec((1, K), lambda i: (0, 0)),
            pl.BlockSpec((K, N), lambda i: (0, 0)),
            pl.BlockSpec((1, N), lambda i: (0, 0)),
        ],
        out_specs=pl.BlockSpec((tm, N), lambda i: (i, 0)),
        compiler_params=pltpu.CompilerParams(
            dimension_semantics=("parallel",),
            vmem_limit_bytes=_VMEM_LIMIT),
    )(xp, g, b, w, bias)
    return out[:M] if Mp != M else out


# --------------------------------------------------------------------------
# Positional conv (per-group im2col) + GELU + residual + encoder LayerNorm
# --------------------------------------------------------------------------
def _posconv_encln_kernel(xpad_ref, h_ref, w_ref, bias_ref, g_ref, b_ref,
                          hout_ref, *, k, groups, eps):
    h = h_ref[0].astype(jnp.float32)                      # [T, H]
    T, H = h.shape
    cg = H // groups
    xp = xpad_ref[0].astype(jnp.float32)                  # [T + 2*pad, H]
    outs = []
    for g in range(groups):                               # static group loop
        cols = [xp[j:j + T, g * cg:(g + 1) * cg] for j in range(k)]
        xg = jnp.concatenate(cols, axis=1)                # [T, k*cg]
        outs.append(jnp.dot(xg, w_ref[g].astype(jnp.float32),
                            preferred_element_type=jnp.float32))  # [T, cg]
    pos = jnp.concatenate(outs, axis=1) + bias_ref[...]
    pos = jax.nn.gelu(pos)
    y = h + pos
    mu = jnp.mean(y, axis=-1, keepdims=True)
    var = jnp.mean(jnp.square(y - mu), axis=-1, keepdims=True)
    y = (y - mu) * jax.lax.rsqrt(var + eps) * g_ref[...] + b_ref[...]
    hout_ref[0] = y.astype(hout_ref.dtype)


def pallas_posconv_encln(hpad, h, wg, bias, g, b, *, groups, eps):
    B, Tp, H = hpad.shape
    T = h.shape[1]
    kcg = wg.shape[1]
    cg = wg.shape[2]
    k = kcg // cg
    return pl.pallas_call(
        functools.partial(_posconv_encln_kernel, k=k, groups=groups, eps=eps),
        out_shape=jax.ShapeDtypeStruct((B, T, H), jnp.float32),
        grid=(B,),
        in_specs=[
            pl.BlockSpec((1, Tp, H), lambda i: (i, 0, 0)),
            pl.BlockSpec((1, T, H), lambda i: (i, 0, 0)),
            pl.BlockSpec((groups, kcg, cg), lambda i: (0, 0, 0)),
            pl.BlockSpec((1, H), lambda i: (0, 0)),
            pl.BlockSpec((1, H), lambda i: (0, 0)),
            pl.BlockSpec((1, H), lambda i: (0, 0)),
        ],
        out_specs=pl.BlockSpec((1, T, H), lambda i: (i, 0, 0)),
        compiler_params=pltpu.CompilerParams(
            dimension_semantics=("parallel",),
            vmem_limit_bytes=_VMEM_LIMIT),
    )(hpad, h, wg, bias, g, b)


# --------------------------------------------------------------------------
# Whole encoder stack + weighted layer sum + pooled classification head:
# ONE pallas_call, grid=(B, num_layers). h/acc are VMEM-resident scratch
# across the layer axis; layer weights pipeline behind compute.
# --------------------------------------------------------------------------
def _encoder_stack_kernel(lw_ref, x_ref,
                          wqkv_ref, bqkv_ref, wo_ref, bo_ref,
                          ln1g_ref, ln1b_ref, w1_ref, b1_ref,
                          w2_ref, b2_ref, ln2g_ref, ln2b_ref,
                          wp_ref, bp_ref, wc_ref, bc_ref,
                          o_ref, h_sc, acc_sc, *, n_heads, eps):
    l = pl.program_id(1)
    nl = pl.num_programs(1)

    @pl.when(l == 0)
    def _():
        x0 = x_ref[0].astype(jnp.float32)
        h_sc[...] = x0
        acc_sc[...] = lw_ref[0] * x0       # weighted-layer-sum term for hidden 0

    x = h_sc[...]                          # [T, H] previous layer's output
    T, H = x.shape
    D = H // n_heads
    scale = 1.0 / float(D) ** 0.5

    def layer_norm(v, g, b):
        mu = jnp.mean(v, axis=-1, keepdims=True)
        var = jnp.mean(jnp.square(v - mu), axis=-1, keepdims=True)
        return (v - mu) * jax.lax.rsqrt(var + eps) * g + b

    # Fused QKV projection (bf16 MXU inputs, f32 accumulation).
    qkv = jnp.dot(x.astype(jnp.bfloat16), wqkv_ref[0],
                  preferred_element_type=jnp.float32) + bqkv_ref[0]
    q = qkv[:, :H] * scale
    k = qkv[:, H:2 * H]
    v = qkv[:, 2 * H:]

    # Multi-head attention; o-proj hoisted out of the head loop.
    ctxs = []
    for hd in range(n_heads):              # static head loop (small head count)
        sl = slice(hd * D, (hd + 1) * D)
        s = jax.lax.dot_general(q[:, sl].astype(jnp.bfloat16),
                                k[:, sl].astype(jnp.bfloat16),
                                (((1,), (1,)), ((), ())),
                                preferred_element_type=jnp.float32)   # [T, T]
        s = s - jnp.max(s, axis=-1, keepdims=True)
        p = jnp.exp(s)
        p = p / jnp.sum(p, axis=-1, keepdims=True)                    # exact
        ctxs.append(jnp.dot(p.astype(jnp.bfloat16),
                            v[:, sl].astype(jnp.bfloat16),
                            preferred_element_type=jnp.float32))      # [T, D]
    ctx = jnp.concatenate(ctxs, axis=-1)                              # [T, H]
    attn = jnp.dot(ctx.astype(jnp.bfloat16), wo_ref[0],
                   preferred_element_type=jnp.float32) + bo_ref[0]

    # Post-LN residual blocks (wav2vec2-base, do_stable_layer_norm=False).
    h1 = layer_norm(x + attn, ln1g_ref[0], ln1b_ref[0])
    ff = jnp.dot(h1.astype(jnp.bfloat16), w1_ref[0],
                 preferred_element_type=jnp.float32) + b1_ref[0]
    ff = jax.nn.gelu(ff)
    ff = jnp.dot(ff.astype(jnp.bfloat16), w2_ref[0],
                 preferred_element_type=jnp.float32) + b2_ref[0]
    h2 = layer_norm(h1 + ff, ln2g_ref[0], ln2b_ref[0])

    h_sc[...] = h2
    acc_sc[...] = acc_sc[...] + lw_ref[l + 1] * h2

    # Fused head on the last layer: pool BEFORE projecting (projector is affine).
    @pl.when(l == nl - 1)
    def _():
        # TODO(synk): padding-aware mean when attention_mask is provided (HF).
        pooled = jnp.mean(acc_sc[...], axis=0, keepdims=True)         # [1, H]
        proj = jnp.dot(pooled.astype(jnp.bfloat16), wp_ref[...],
                       preferred_element_type=jnp.float32) + bp_ref[...]
        logits = jnp.dot(proj.astype(jnp.bfloat16), wc_ref[...],
                         preferred_element_type=jnp.float32) + bc_ref[...]
        o_ref[0] = logits.astype(o_ref.dtype)


def pallas_encoder_stack(lw, x, enc, head, *, n_heads, eps):
    NL, H, H3 = enc["wqkv"].shape
    B, T, _ = x.shape
    I = enc["w1"].shape[2]
    P = head["proj_w"].shape[1]
    L = head["cls_w"].shape[1]

    def lyr(s):          # per-layer stacked param, prefetched along the l axis
        return pl.BlockSpec((1,) + s, lambda b, l: (l,) + (0,) * len(s))

    def const(s):        # layer-invariant param (head weights)
        return pl.BlockSpec(s, lambda b, l: (0,) * len(s))

    logits = pl.pallas_call(
        functools.partial(_encoder_stack_kernel, n_heads=n_heads, eps=eps),
        out_shape=jax.ShapeDtypeStruct((B, 1, L), jnp.float32),
        grid=(B, NL),
        in_specs=[
            pl.BlockSpec(memory_space=pltpu.MemorySpace.SMEM),        # lw
            pl.BlockSpec((1, T, H), lambda b, l: (b, 0, 0)),          # x (l==0)
            lyr((H, 3 * H)), lyr((1, 3 * H)),                         # qkv
            lyr((H, H)), lyr((1, H)),                                 # o proj
            lyr((1, H)), lyr((1, H)),                                 # ln1
            lyr((H, I)), lyr((1, I)),                                 # ff1
            lyr((I, H)), lyr((1, H)),                                 # ff2
            lyr((1, H)), lyr((1, H)),                                 # ln2
            const((H, P)), const((1, P)),                             # projector
            const((P, L)), const((1, L)),                             # classifier
        ],
        out_specs=pl.BlockSpec((1, 1, L), lambda b, l: (b, 0, 0)),
        scratch_shapes=[pltpu.VMEM((T, H), jnp.float32),              # h
                        pltpu.VMEM((T, H), jnp.float32)],             # acc
        compiler_params=pltpu.CompilerParams(
            dimension_semantics=("parallel", "arbitrary"),
            vmem_limit_bytes=_VMEM_LIMIT),
    )(lw, x, enc["wqkv"], enc["bqkv"], enc["wo"], enc["bo"],
      enc["ln1_g"], enc["ln1_b"], enc["w1"], enc["b1"],
      enc["w2"], enc["b2"], enc["ln2_g"], enc["ln2_b"],
      head["proj_w"], head["proj_b"], head["cls_w"], head["cls_b"])
    return logits[:, 0, :]


# --------------------------------------------------------------------------
# Parameters (deterministic synthetic init — not a checkpoint load)
# --------------------------------------------------------------------------
def _grouped_posconv_w(w_torch, groups):
    """Grouped conv weight [Cout, Cin_g, k] (torch) -> [groups, k*Cin_g, Cg]."""
    Cout, Cin_g, k = w_torch.shape
    cg = Cout // groups
    ws = []
    for g in range(groups):
        blk = w_torch[g * cg:(g + 1) * cg]                 # [cg, Cin_g, k]
        wg = jnp.transpose(blk, (2, 1, 0)).reshape(k * Cin_g, cg)
        ws.append(wg)
    return jnp.stack(ws)


def init_params(key):
    H = CFG["hidden_size"]
    I = CFG["intermediate_size"]
    P = CFG["classifier_proj_size"]
    L = CFG["num_labels"]
    NL = CFG["num_hidden_layers"] + 1
    C0, C1 = CFG["conv_dim"]
    k0, k1 = CFG["conv_kernel"]
    kpos, grp = CFG["pos_conv_kernel"], CFG["pos_conv_groups"]

    keys = iter(jax.random.split(key, 128))
    nrm = lambda shape: jax.random.normal(next(keys), shape, jnp.float32) * 0.02
    zeros = lambda shape: jnp.zeros(shape, jnp.float32)
    ones = lambda shape: jnp.ones(shape, jnp.float32)
    bf = lambda a: a.astype(jnp.bfloat16)

    conv0_t = nrm((C0, 1, k0))            # torch layout [Cout, Cin, k]
    conv1_t = nrm((C1, C0, k1))
    pos_t = nrm((H, H // grp, kpos))
    # TODO(synk): pos-conv weight_norm parameterization and even-kernel
    # SamePadLayer trimming of the full model are not reproduced here.

    p = {
        "conv0_w": jnp.transpose(conv0_t, (2, 1, 0)),     # [k, Cin, Cout] f32
        "gn_g": ones((1, C0)), "gn_b": zeros((1, C0)),
        "conv1_w": jnp.transpose(conv1_t, (2, 1, 0)),
        "fp_ln_g": ones((1, C1)), "fp_ln_b": zeros((1, C1)),
        "fp_w": bf(nrm((C1, H))), "fp_b": zeros((1, H)),
        "pos_conv_w": _grouped_posconv_w(pos_t, grp),     # [grp, k*Cg, Cg] f32
        "pos_conv_b": zeros((1, H)),
        "enc_ln_g": ones((1, H)), "enc_ln_b": zeros((1, H)),
        "layer_weights": ones((NL,)) / NL,                # HF init: ones / num_layers
        "head": {
            "proj_w": bf(nrm((H, P))), "proj_b": zeros((1, P)),
            "cls_w": bf(nrm((P, L))), "cls_b": zeros((1, L)),
        },
    }

    names = ["wqkv", "bqkv", "wo", "bo", "ln1_g", "ln1_b",
             "w1", "b1", "w2", "b2", "ln2_g", "ln2_b"]
    enc = {n: [] for n in names}
    for _ in range(CFG["num_hidden_layers"]):
        qw, kw, vw = nrm((H, H)), nrm((H, H)), nrm((H, H))
        enc["wqkv"].append(bf(jnp.concatenate([qw, kw, vw], axis=1)))  # [H, 3H]
        enc["bqkv"].append(zeros((1, 3 * H)))
        enc["wo"].append(bf(nrm((H, H))))
        enc["bo"].append(zeros((1, H)))
        enc["ln1_g"].append(ones((1, H)))
        enc["ln1_b"].append(zeros((1, H)))
        enc["w1"].append(bf(nrm((H, I))))
        enc["b1"].append(zeros((1, I)))
        enc["w2"].append(bf(nrm((I, H))))
        enc["b2"].append(zeros((1, H)))
        enc["ln2_g"].append(ones((1, H)))
        enc["ln2_b"].append(zeros((1, H)))
    p["enc"] = {n: jnp.stack(v) for n, v in enc.items()}  # leading [num_layers]
    return p


# --------------------------------------------------------------------------
# Forward pass (Classifier.forward -> w2v(...).logits)
# --------------------------------------------------------------------------
def classifier_forward(params, x):
    eps = CFG["layer_norm_eps"]
    H = CFG["hidden_size"]
    nH = CFG["num_attention_heads"]
    B = x.shape[0]

    # ---- feature extractor (channels-last conv stack, fused norm/GELU) ----
    h = x[:, :, None]                                                 # [B, T0, 1]
    h = pallas_conv1d_cl(h, params["conv0_w"], stride=CFG["conv_stride"][0],
                         gn=(params["gn_g"], params["gn_b"]),
                         activation="gelu", eps=eps)
    h = pallas_conv1d_cl(h, params["conv1_w"], stride=CFG["conv_stride"][1],
                         activation="gelu", eps=eps)                  # [B, T, C1]
    _, T, C = h.shape

    # ---- feature projection: fused LayerNorm + Linear ----
    h = pallas_ln_linear(h.reshape(B * T, C), params["fp_ln_g"],
                         params["fp_ln_b"], params["fp_w"], params["fp_b"],
                         eps=eps).reshape(B, T, H)

    # ---- positional conv (per-group im2col) + residual + encoder LN ----
    pad = CFG["pos_conv_kernel"] // 2
    hpad = jnp.pad(h, ((0, 0), (pad, pad), (0, 0)))
    h = pallas_posconv_encln(hpad, h, params["pos_conv_w"],
                             params["pos_conv_b"], params["enc_ln_g"],
                             params["enc_ln_b"],
                             groups=CFG["pos_conv_groups"], eps=eps)

    # ---- encoder stack + weighted layer sum + pooled head: one kernel ----
    lw = jax.nn.softmax(params["layer_weights"]).astype(jnp.float32)
    logits = pallas_encoder_stack(lw, h, params["enc"], params["head"],
                                  n_heads=nH, eps=eps)                # [B, labels]
    return logits


if __name__ == "__main__":
    key = jax.random.PRNGKey(0)
    pkey, xkey = jax.random.split(key)
    params = init_params(pkey)

    B, samples = 2, 170          # conv stack: 170 -> 33 -> 16 frames
    x = jax.random.normal(xkey, (B, samples), jnp.float32)

    fwd = jax.jit(classifier_forward)
    logits = fwd(params, x)
    jax.block_until_ready(logits)
    assert logits.shape == (B, CFG["num_labels"])
    assert bool(jnp.all(jnp.isfinite(logits)))
    print("KERNEL_OK")
</pallas_src>

<mosaic_0001>
module attributes {stable_mosaic.version = 11 : i64} {
  func.func @_conv1d_kernel(%arg0: i32, %arg1: memref<1x34x5xf32, #tpu.memory_space<vmem>>, %arg2: memref<10x32xf32, #tpu.memory_space<vmem>>, %arg3: memref<1x32xf32, #tpu.memory_space<vmem>>, %arg4: memref<1x32xf32, #tpu.memory_space<vmem>>, %arg5: memref<1x33x32xf32, #tpu.memory_space<vmem>>) attributes {dimension_semantics = [#tpu.dimension_semantics<parallel>], iteration_bounds = array<i64: 2>, scalar_prefetch = 0 : i64, scratch_operands = 0 : i64, tpu.core_type = #tpu.core_type<tc>, window_params = [{transform_indices = @transform_0, window_bounds = array<i64: 1, 34, 5>}, {pipeline_mode = #tpu.pipeline_mode<synchronous>, transform_indices = @transform_1, window_bounds = array<i64: 10, 32>}, {pipeline_mode = #tpu.pipeline_mode<synchronous>, transform_indices = @transform_2, window_bounds = array<i64: 1, 32>}, {pipeline_mode = #tpu.pipeline_mode<synchronous>, transform_indices = @transform_3, window_bounds = array<i64: 1, 32>}, {transform_indices = @transform_4, window_bounds = array<i64: 1, 33, 32>}]} {
    %c0 = arith.constant 0 : index
    %c0_0 = arith.constant 0 : index
    %c0_1 = arith.constant 0 : index
    %0 = vector.load %arg1[%c0, %c0_0, %c0_1] : memref<1x34x5xf32, #tpu.memory_space<vmem>>, vector<1x34x5xf32>
    %1 = vector.shape_cast %0 : vector<1x34x5xf32> to vector<34x5xf32>
    %2 = vector.extract_strided_slice %1 {offsets = [0, 0], sizes = [33, 1], strides = [1, 1]} : vector<34x5xf32> to vector<33x1xf32>
    %3 = vector.extract_strided_slice %1 {offsets = [0, 1], sizes = [33, 1], strides = [1, 1]} : vector<34x5xf32> to vector<33x1xf32>
    %4 = vector.extract_strided_slice %1 {offsets = [0, 2], sizes = [33, 1], strides = [1, 1]} : vector<34x5xf32> to vector<33x1xf32>
    %5 = vector.extract_strided_slice %1 {offsets = [0, 3], sizes = [33, 1], strides = [1, 1]} : vector<34x5xf32> to vector<33x1xf32>
    %6 = vector.extract_strided_slice %1 {offsets = [0, 4], sizes = [33, 1], strides = [1, 1]} : vector<34x5xf32> to vector<33x1xf32>
    %7 = vector.extract_strided_slice %1 {offsets = [1, 0], sizes = [33, 1], strides = [1, 1]} : vector<34x5xf32> to vector<33x1xf32>
    %8 = vector.extract_strided_slice %1 {offsets = [1, 1], sizes = [33, 1], strides = [1, 1]} : vector<34x5xf32> to vector<33x1xf32>
    %9 = vector.extract_strided_slice %1 {offsets = [1, 2], sizes = [33, 1], strides = [1, 1]} : vector<34x5xf32> to vector<33x1xf32>
    %10 = vector.extract_strided_slice %1 {offsets = [1, 3], sizes = [33, 1], strides = [1, 1]} : vector<34x5xf32> to vector<33x1xf32>
    %11 = vector.extract_strided_slice %1 {offsets = [1, 4], sizes = [33, 1], strides = [1, 1]} : vector<34x5xf32> to vector<33x1xf32>
    %12 = tpu.concatenate %2, %3, %4, %5, %6, %7, %8, %9, %10, %11 in 1 : vector<33x1xf32>, vector<33x1xf32>, vector<33x1xf32>, vector<33x1xf32>, vector<33x1xf32>, vector<33x1xf32>, vector<33x1xf32>, vector<33x1xf32>, vector<33x1xf32>, vector<33x1xf32> -> vector<33x10xf32>
    %c0_2 = arith.constant 0 : index
    %c0_3 = arith.constant 0 : index
    %13 = vector.load %arg2[%c0_2, %c0_3] : memref<10x32xf32, #tpu.memory_space<vmem>>, vector<10x32xf32>
    %cst = arith.constant dense<0.000000e+00> : vector<33x32xf32>
    %14 = tpu.matmul %12, %13, %cst {dimension_numbers = #tpu.dot_dimension_numbers<[1], [0], [0], [1], [0, 0, 1, 1], [], []>} : vector<33x10xf32>, vector<10x32xf32>, vector<33x32xf32> -> vector<33x32xf32>
    %cst_4 = arith.constant dense<0.000000e+00> : vector<32xf32>
    %15 = vector.multi_reduction <add>, %14, %cst_4 [0] : vector<33x32xf32> to vector<32xf32>
    %16 = vector.shape_cast %15 : vector<32xf32> to vector<1x32xf32>
    %cst_5 = arith.constant 3.300000e+01 : f32
    %17 = vector.broadcast %cst_5 : f32 to vector<1x32xf32>
    %18 = arith.divf %16, %17 : vector<1x32xf32>
    %19 = vector.broadcast %18 : vector<1x32xf32> to vector<33x32xf32>
    %20 = arith.subf %14, %19 : vector<33x32xf32>
    %21 = arith.mulf %20, %20 : vector<33x32xf32>
    %cst_6 = arith.constant dense<0.000000e+00> : vector<32xf32>
    %22 = vector.multi_reduction <add>, %21, %cst_6 [0] : vector<33x32xf32> to vector<32xf32>
    %23 = vector.shape_cast %22 : vector<32xf32> to vector<1x32xf32>
    %cst_7 = arith.constant 3.300000e+01 : f32
    %24 = vector.broadcast %cst_7 : f32 to vector<1x32xf32>
    %25 = arith.divf %23, %24 : vector<1x32xf32>
    %26 = vector.broadcast %18 : vector<1x32xf32> to vector<33x32xf32>
    %27 = arith.subf %14, %26 : vector<33x32xf32>
    %cst_8 = arith.constant 9.99999974E-6 : f32
    %28 = vector.broadcast %cst_8 : f32 to vector<1x32xf32>
    %29 = arith.addf %25, %28 : vector<1x32xf32>
    %30 = math.rsqrt %29 : vector<1x32xf32>
    %31 = vector.broadcast %30 : vector<1x32xf32> to vector<33x32xf32>
    %32 = arith.mulf %27, %31 : vector<33x32xf32>
    %c0_9 = arith.constant 0 : index
    %c0_10 = arith.constant 0 : index
    %33 = vector.load %arg3[%c0_9, %c0_10] : memref<1x32xf32, #tpu.memory_space<vmem>>, vector<1x32xf32>
    %34 = vector.broadcast %33 : vector<1x32xf32> to vector<33x32xf32>
    %35 = arith.mulf %32, %34 : vector<33x32xf32>
    %c0_11 = arith.constant 0 : index
    %c0_12 = arith.constant 0 : index
    %36 = vector.load %arg4[%c0_11, %c0_12] : memref<1x32xf32, #tpu.memory_space<vmem>>, vector<1x32xf32>
    %37 = vector.broadcast %36 : vector<1x32xf32> to vector<33x32xf32>
    %38 = arith.addf %35, %37 : vector<33x32xf32>
    %39 = arith.mulf %38, %38 : vector<33x32xf32>
    %40 = arith.mulf %38, %39 : vector<33x32xf32>
    %cst_13 = arith.constant 4.471500e-02 : f32
    %41 = vector.broadcast %cst_13 : f32 to vector<33x32xf32>
    %42 = arith.mulf %41, %40 : vector<33x32xf32>
    %43 = arith.addf %38, %42 : vector<33x32xf32>
    %cst_14 = arith.constant 0.797884583 : f32
    %44 = vector.broadcast %cst_14 : f32 to vector<33x32xf32>
    %45 = arith.mulf %44, %43 : vector<33x32xf32>
    %46 = math.tanh %45 : vector<33x32xf32>
    %cst_15 = arith.constant 1.000000e+00 : f32
    %47 = vector.broadcast %cst_15 : f32 to vector<33x32xf32>
    %48 = arith.addf %47, %46 : vector<33x32xf32>
    %cst_16 = arith.constant 5.000000e-01 : f32
    %49 = vector.broadcast %cst_16 : f32 to vector<33x32xf32>
    %50 = arith.mulf %49, %48 : vector<33x32xf32>
    %51 = arith.mulf %38, %50 : vector<33x32xf32>
    %c0_17 = arith.constant 0 : index
    %c0_18 = arith.constant 0 : index
    %c0_19 = arith.constant 0 : index
    %52 = vector.load %arg5[%c0_17, %c0_18, %c0_19] : memref<1x33x32xf32, #tpu.memory_space<vmem>>, vector<1x33x32xf32>
    %53 = vector.shape_cast %52 : vector<1x33x32xf32> to vector<33x32xf32>
    %54 = vector.shape_cast %51 : vector<33x32xf32> to vector<1x33x32xf32>
    tpu.vector_store %arg5[%c0_17, %c0_18, %c0_19], %54 {strides = array<i32>} : memref<1x33x32xf32, #tpu.memory_space<vmem>>, vector<1x33x32xf32>,
    return
  }
  func.func @transform_0(%arg0: i32) -> (i32, i32, i32) {
    %c0_i32 = arith.constant 0 : i32
    %c0_i32_0 = arith.constant 0 : i32
    %c0_i32_1 = arith.constant 0 : i32
    return %arg0, %c0_i32, %c0_i32_0 : i32, i32, i32
  }
  func.func @transform_1(%arg0: i32) -> (i32, i32) {
    %c0_i32 = arith.constant 0 : i32
    %c0_i32_0 = arith.constant 0 : i32
    %c0_i32_1 = arith.constant 0 : i32
    return %c0_i32, %c0_i32_0 : i32, i32
  }
  func.func @transform_2(%arg0: i32) -> (i32, i32) {
    %c0_i32 = arith.constant 0 : i32
    %c0_i32_0 = arith.constant 0 : i32
    %c0_i32_1 = arith.constant 0 : i32
    return %c0_i32, %c0_i32_0 : i32, i32
  }
  func.func @transform_3(%arg0: i32) -> (i32, i32) {
    %c0_i32 = arith.constant 0 : i32
    %c0_i32_0 = arith.constant 0 : i32
    %c0_i32_1 = arith.constant 0 : i32
    return %c0_i32, %c0_i32_0 : i32, i32
  }
  func.func @transform_4(%arg0: i32) -> (i32, i32, i32) {
    %c0_i32 = arith.constant 0 : i32
    %c0_i32_0 = arith.constant 0 : i32
    %c0_i32_1 = arith.constant 0 : i32
    return %arg0, %c0_i32, %c0_i32_0 : i32, i32, i32
  }
}

module attributes {stable_mosaic.version = 11 : i64} {
  func.func @_conv1d_kernel(%arg0: i32, %arg1: memref<1x17x64xf32, #tpu.memory_space<vmem>>, %arg2: memref<96x32xf32, #tpu.memory_space<vmem>>, %arg3: memref<1x32xf32, #tpu.memory_space<vmem>>, %arg4: memref<1x32xf32, #tpu.memory_space<vmem>>, %arg5: memref<1x16x32xf32, #tpu.memory_space<vmem>>) attributes {dimension_semantics = [#tpu.dimension_semantics<parallel>], iteration_bounds = array<i64: 2>, scalar_prefetch = 0 : i64, scratch_operands = 0 : i64, tpu.core_type = #tpu.core_type<tc>, window_params = [{transform_indices = @transform_0, window_bounds = array<i64: 1, 17, 64>}, {pipeline_mode = #tpu.pipeline_mode<synchronous>, transform_indices = @transform_1, window_bounds = array<i64: 96, 32>}, {pipeline_mode = #tpu.pipeline_mode<synchronous>, transform_indices = @transform_2, window_bounds = array<i64: 1, 32>}, {pipeline_mode = #tpu.pipeline_mode<synchronous>, transform_indices = @transform_3, window_bounds = array<i64: 1, 32>}, {transform_indices = @transform_4, window_bounds = array<i64: 1, 16, 32>}]} {
    %c0 = arith.constant 0 : index
    %c0_0 = arith.constant 0 : index
    %c0_1 = arith.constant 0 : index
    %0 = vector.load %arg1[%c0, %c0_0, %c0_1] : memref<1x17x64xf32, #tpu.memory_space<vmem>>, vector<1x17x64xf32>
    %1 = vector.shape_cast %0 : vector<1x17x64xf32> to vector<17x64xf32>
    %2 = vector.extract_strided_slice %1 {offsets = [0, 0], sizes = [16, 32], strides = [1, 1]} : vector<17x64xf32> to vector<16x32xf32>
    %3 = vector.extract_strided_slice %1 {offsets = [0, 32], sizes = [16, 32], strides = [1, 1]} : vector<17x64xf32> to vector<16x32xf32>
    %4 = vector.extract_strided_slice %1 {offsets = [1, 0], sizes = [16, 32], strides = [1, 1]} : vector<17x64xf32> to vector<16x32xf32>
    %5 = tpu.concatenate %2, %3, %4 in 1 : vector<16x32xf32>, vector<16x32xf32>, vector<16x32xf32> -> vector<16x96xf32>
    %c0_2 = arith.constant 0 : index
    %c0_3 = arith.constant 0 : index
    %6 = vector.load %arg2[%c0_2, %c0_3] : memref<96x32xf32, #tpu.memory_space<vmem>>, vector<96x32xf32>
    %cst = arith.constant dense<0.000000e+00> : vector<16x32xf32>
    %7 = tpu.matmul %5, %6, %cst {dimension_numbers = #tpu.dot_dimension_numbers<[1], [0], [0], [1], [0, 0, 1, 1], [], []>} : vector<16x96xf32>, vector<96x32xf32>, vector<16x32xf32> -> vector<16x32xf32>
    %8 = arith.mulf %7, %7 : vector<16x32xf32>
    %9 = arith.mulf %7, %8 : vector<16x32xf32>
    %cst_4 = arith.constant 4.471500e-02 : f32
    %10 = vector.broadcast %cst_4 : f32 to vector<16x32xf32>
    %11 = arith.mulf %10, %9 : vector<16x32xf32>
    %12 = arith.addf %7, %11 : vector<16x32xf32>
    %cst_5 = arith.constant 0.797884583 : f32
    %13 = vector.broadcast %cst_5 : f32 to vector<16x32xf32>
    %14 = arith.mulf %13, %12 : vector<16x32xf32>
    %15 = math.tanh %14 : vector<16x32xf32>
    %cst_6 = arith.constant 1.000000e+00 : f32
    %16 = vector.broadcast %cst_6 : f32 to vector<16x32xf32>
    %17 = arith.addf %16, %15 : vector<16x32xf32>
    %cst_7 = arith.constant 5.000000e-01 : f32
    %18 = vector.broadcast %cst_7 : f32 to vector<16x32xf32>
    %19 = arith.mulf %18, %17 : vector<16x32xf32>
    %20 = arith.mulf %7, %19 : vector<16x32xf32>
    %c0_8 = arith.constant 0 : index
    %c0_9 = arith.constant 0 : index
    %c0_10 = arith.constant 0 : index
    %21 = vector.load %arg5[%c0_8, %c0_9, %c0_10] : memref<1x16x32xf32, #tpu.memory_space<vmem>>, vector<1x16x32xf32>
    %22 = vector.shape_cast %21 : vector<1x16x32xf32> to vector<16x32xf32>
    %23 = vector.shape_cast %20 : vector<16x32xf32> to vector<1x16x32xf32>
    tpu.vector_store %arg5[%c0_8, %c0_9, %c0_10], %23 {strides = array<i32>} : memref<1x16x32xf32, #tpu.memory_space<vmem>>, vector<1x16x32xf32>,
    return
  }
  func.func @transform_0(%arg0: i32) -> (i32, i32, i32) {
    %c0_i32 = arith.constant 0 : i32
    %c0_i32_0 = arith.constant 0 : i32
    %c0_i32_1 = arith.constant 0 : i32
    return %arg0, %c0_i32, %c0_i32_0 : i32, i32, i32
  }
  func.func @transform_1(%arg0: i32) -> (i32, i32) {
    %c0_i32 = arith.constant 0 : i32
    %c0_i32_0 = arith.constant 0 : i32
    %c0_i32_1 = arith.constant 0 : i32
    return %c0_i32, %c0_i32_0 : i32, i32
  }
  func.func @transform_2(%arg0: i32) -> (i32, i32) {
    %c0_i32 = arith.constant 0 : i32
    %c0_i32_0 = arith.constant 0 : i32
    %c0_i32_1 = arith.constant 0 : i32
    return %c0_i32, %c0_i32_0 : i32, i32
  }
  func.func @transform_3(%arg0: i32) -> (i32, i32) {
    %c0_i32 = arith.constant 0 : i32
    %c0_i32_0 = arith.constant 0 : i32
    %c0_i32_1 = arith.constant 0 : i32
    return %c0_i32, %c0_i32_0 : i32, i32
  }
  func.func @transform_4(%arg0: i32) -> (i32, i32, i32) {
    %c0_i32 = arith.constant 0 : i32
    %c0_i32_0 = arith.constant 0 : i32
    %c0_i32_1 = arith.constant 0 : i32
    return %arg0, %c0_i32, %c0_i32_0 : i32, i32, i32
  }
}

module attributes {stable_mosaic.version = 11 : i64} {
  func.func @_posconv_encln_kernel(%arg0: i32, %arg1: memref<1x18x32xf32, #tpu.memory_space<vmem>>, %arg2: memref<1x16x32xf32, #tpu.memory_space<vmem>>, %arg3: memref<2x48x16xf32, #tpu.memory_space<vmem>>, %arg4: memref<1x32xf32, #tpu.memory_space<vmem>>, %arg5: memref<1x32xf32, #tpu.memory_space<vmem>>, %arg6: memref<1x32xf32, #tpu.memory_space<vmem>>, %arg7: memref<1x16x32xf32, #tpu.memory_space<vmem>>) attributes {dimension_semantics = [#tpu.dimension_semantics<parallel>], iteration_bounds = array<i64: 2>, scalar_prefetch = 0 : i64, scratch_operands = 0 : i64, tpu.core_type = #tpu.core_type<tc>, window_params = [{transform_indices = @transform_0, window_bounds = array<i64: 1, 18, 32>}, {transform_indices = @transform_1, window_bounds = array<i64: 1, 16, 32>}, {pipeline_mode = #tpu.pipeline_mode<synchronous>, transform_indices = @transform_2, window_bounds = array<i64: 2, 48, 16>}, {pipeline_mode = #tpu.pipeline_mode<synchronous>, transform_indices = @transform_3, window_bounds = array<i64: 1, 32>}, {pipeline_mode = #tpu.pipeline_mode<synchronous>, transform_indices = @transform_4, window_bounds = array<i64: 1, 32>}, {pipeline_mode = #tpu.pipeline_mode<synchronous>, transform_indices = @transform_5, window_bounds = array<i64: 1, 32>}, {transform_indices = @transform_6, window_bounds = array<i64: 1, 16, 32>}]} {
    %c0 = arith.constant 0 : index
    %c0_0 = arith.constant 0 : index
    %c0_1 = arith.constant 0 : index
    %0 = vector.load %arg2[%c0, %c0_0, %c0_1] : memref<1x16x32xf32, #tpu.memory_space<vmem>>, vector<1x16x32xf32>
    %1 = vector.shape_cast %0 : vector<1x16x32xf32> to vector<16x32xf32>
    %c0_2 = arith.constant 0 : index
    %c0_3 = arith.constant 0 : index
    %c0_4 = arith.constant 0 : index
    %2 = vector.load %arg1[%c0_2, %c0_3, %c0_4] : memref<1x18x32xf32, #tpu.memory_space<vmem>>, vector<1x18x32xf32>
    %3 = vector.shape_cast %2 : vector<1x18x32xf32> to vector<18x32xf32>
    %4 = vector.extract_strided_slice %3 {offsets = [0, 0], sizes = [16, 16], strides = [1, 1]} : vector<18x32xf32> to vector<16x16xf32>
    %5 = vector.extract_strided_slice %3 {offsets = [1, 0], sizes = [16, 16], strides = [1, 1]} : vector<18x32xf32> to vector<16x16xf32>
    %6 = vector.extract_strided_slice %3 {offsets = [2, 0], sizes = [16, 16], strides = [1, 1]} : vector<18x32xf32> to vector<16x16xf32>
    %7 = tpu.concatenate %4, %5, %6 in 1 : vector<16x16xf32>, vector<16x16xf32>, vector<16x16xf32> -> vector<16x48xf32>
    %c0_5 = arith.constant 0 : index
    %c0_6 = arith.constant 0 : index
    %c0_7 = arith.constant 0 : index
    %8 = vector.load %arg3[%c0_5, %c0_6, %c0_7] : memref<2x48x16xf32, #tpu.memory_space<vmem>>, vector<1x48x16xf32>
    %9 = vector.shape_cast %8 : vector<1x48x16xf32> to vector<48x16xf32>
    %cst = arith.constant dense<0.000000e+00> : vector<16x16xf32>
    %10 = tpu.matmul %7, %9, %cst {dimension_numbers = #tpu.dot_dimension_numbers<[1], [0], [0], [1], [0, 0, 1, 1], [], []>} : vector<16x48xf32>, vector<48x16xf32>, vector<16x16xf32> -> vector<16x16xf32>
    %11 = vector.extract_strided_slice %3 {offsets = [0, 16], sizes = [16, 16], strides = [1, 1]} : vector<18x32xf32> to vector<16x16xf32>
    %12 = vector.extract_strided_slice %3 {offsets = [1, 16], sizes = [16, 16], strides = [1, 1]} : vector<18x32xf32> to vector<16x16xf32>
    %13 = vector.extract_strided_slice %3 {offsets = [2, 16], sizes = [16, 16], strides = [1, 1]} : vector<18x32xf32> to vector<16x16xf32>
    %14 = tpu.concatenate %11, %12, %13 in 1 : vector<16x16xf32>, vector<16x16xf32>, vector<16x16xf32> -> vector<16x48xf32>
    %c1 = arith.constant 1 : index
    %c0_8 = arith.constant 0 : index
    %c0_9 = arith.constant 0 : index
    %15 = vector.load %arg3[%c1, %c0_8, %c0_9] : memref<2x48x16xf32, #tpu.memory_space<vmem>>, vector<1x48x16xf32>
    %16 = vector.shape_cast %15 : vector<1x48x16xf32> to vector<48x16xf32>
    %cst_10 = arith.constant dense<0.000000e+00> : vector<16x16xf32>
    %17 = tpu.matmul %14, %16, %cst_10 {dimension_numbers = #tpu.dot_dimension_numbers<[1], [0], [0], [1], [0, 0, 1, 1], [], []>} : vector<16x48xf32>, vector<48x16xf32>, vector<16x16xf32> -> vector<16x16xf32>
    %18 = tpu.concatenate %10, %17 in 1 : vector<16x16xf32>, vector<16x16xf32> -> vector<16x32xf32>
    %c0_11 = arith.constant 0 : index
    %c0_12 = arith.constant 0 : index
    %19 = vector.load %arg4[%c0_11, %c0_12] : memref<1x32xf32, #tpu.memory_space<vmem>>, vector<1x32xf32>
    %20 = vector.broadcast %19 : vector<1x32xf32> to vector<16x32xf32>
    %21 = arith.addf %18, %20 : vector<16x32xf32>
    %22 = arith.mulf %21, %21 : vector<16x32xf32>
    %23 = arith.mulf %21, %22 : vector<16x32xf32>
    %cst_13 = arith.constant 4.471500e-02 : f32
    %24 = vector.broadcast %cst_13 : f32 to vector<16x32xf32>
    %25 = arith.mulf %24, %23 : vector<16x32xf32>
    %26 = arith.addf %21, %25 : vector<16x32xf32>
    %cst_14 = arith.constant 0.797884583 : f32
    %27 = vector.broadcast %cst_14 : f32 to vector<16x32xf32>
    %28 = arith.mulf %27, %26 : vector<16x32xf32>
    %29 = math.tanh %28 : vector<16x32xf32>
    %cst_15 = arith.constant 1.000000e+00 : f32
    %30 = vector.broadcast %cst_15 : f32 to vector<16x32xf32>
    %31 = arith.addf %30, %29 : vector<16x32xf32>
    %cst_16 = arith.constant 5.000000e-01 : f32
    %32 = vector.broadcast %cst_16 : f32 to vector<16x32xf32>
    %33 = arith.mulf %32, %31 : vector<16x32xf32>
    %34 = arith.mulf %21, %33 : vector<16x32xf32>
    %35 = arith.addf %1, %34 : vector<16x32xf32>
    %cst_17 = arith.constant dense<0.000000e+00> : vector<16xf32>
    %36 = vector.multi_reduction <add>, %35, %cst_17 [1] : vector<16x32xf32> to vector<16xf32>
    %37 = vector.shape_cast %36 : vector<16xf32> to vector<16x1xf32>
    %cst_18 = arith.constant 3.200000e+01 : f32
    %38 = vector.broadcast %cst_18 : f32 to vector<16x1xf32>
    %39 = arith.divf %37, %38 : vector<16x1xf32>
    %40 = vector.broadcast %39 : vector<16x1xf32> to vector<16x32xf32>
    %41 = arith.subf %35, %40 : vector<16x32xf32>
    %42 = arith.mulf %41, %41 : vector<16x32xf32>
    %cst_19 = arith.constant dense<0.000000e+00> : vector<16xf32>
    %43 = vector.multi_reduction <add>, %42, %cst_19 [1] : vector<16x32xf32> to vector<16xf32>
    %44 = vector.shape_cast %43 : vector<16xf32> to vector<16x1xf32>
    %cst_20 = arith.constant 3.200000e+01 : f32
    %45 = vector.broadcast %cst_20 : f32 to vector<16x1xf32>
    %46 = arith.divf %44, %45 : vector<16x1xf32>
    %47 = vector.broadcast %39 : vector<16x1xf32> to vector<16x32xf32>
    %48 = arith.subf %35, %47 : vector<16x32xf32>
    %cst_21 = arith.constant 9.99999974E-6 : f32
    %49 = vector.broadcast %cst_21 : f32 to vector<16x1xf32>
    %50 = arith.addf %46, %49 : vector<16x1xf32>
    %51 = math.rsqrt %50 : vector<16x1xf32>
    %52 = vector.broadcast %51 : vector<16x1xf32> to vector<16x32xf32>
    %53 = arith.mulf %48, %52 : vector<16x32xf32>
    %c0_22 = arith.constant 0 : index
    %c0_23 = arith.constant 0 : index
    %54 = vector.load %arg5[%c0_22, %c0_23] : memref<1x32xf32, #tpu.memory_space<vmem>>, vector<1x32xf32>
    %55 = vector.broadcast %54 : vector<1x32xf32> to vector<16x32xf32>
    %56 = arith.mulf %53, %55 : vector<16x32xf32>
    %c0_24 = arith.constant 0 : index
    %c0_25 = arith.constant 0 : index
    %57 = vector.load %arg6[%c0_24, %c0_25] : memref<1x32xf32, #tpu.memory_space<vmem>>, vector<1x32xf32>
    %58 = vector.broadcast %57 : vector<1x32xf32> to vector<16x32xf32>
    %59 = arith.addf %56, %58 : vector<16x32xf32>
    %c0_26 = arith.constant 0 : index
    %c0_27 = arith.constant 0 : index
    %c0_28 = arith.constant 0 : index
    %60 = vector.load %arg7[%c0_26, %c0_27, %c0_28] : memref<1x16x32xf32, #tpu.memory_space<vmem>>, vector<1x16x32xf32>
    %61 = vector.shape_cast %60 : vector<1x16x32xf32> to vector<16x32xf32>
    %62 = vector.shape_cast %59 : vector<16x32xf32> to vector<1x16x32xf32>
    tpu.vector_store %arg7[%c0_26, %c0_27, %c0_28], %62 {strides = array<i32>} : memref<1x16x32xf32, #tpu.memory_space<vmem>>, vector<1x16x32xf32>,
    return
  }
  func.func @transform_0(%arg0: i32) -> (i32, i32, i32) {
    %c0_i32 = arith.constant 0 : i32
    %c0_i32_0 = arith.constant 0 : i32
    %c0_i32_1 = arith.constant 0 : i32
    return %arg0, %c0_i32, %c0_i32_0 : i32, i32, i32
  }
  func.func @transform_1(%arg0: i32) -> (i32, i32, i32) {
    %c0_i32 = arith.constant 0 : i32
    %c0_i32_0 = arith.constant 0 : i32
    %c0_i32_1 = arith.constant 0 : i32
    return %arg0, %c0_i32, %c0_i32_0 : i32, i32, i32
  }
  func.func @transform_2(%arg0: i32) -> (i32, i32, i32) {
    %c0_i32 = arith.constant 0 : i32
    %c0_i32_0 = arith.constant 0 : i32
    %c0_i32_1 = arith.constant 0 : i32
    %c0_i32_2 = arith.constant 0 : i32
    return %c0_i32, %c0_i32_0, %c0_i32_1 : i32, i32, i32
  }
  func.func @transform_3(%arg0: i32) -> (i32, i32) {
    %c0_i32 = arith.constant 0 : i32
    %c0_i32_0 = arith.constant 0 : i32
    %c0_i32_1 = arith.constant 0 : i32
    return %c0_i32, %c0_i32_0 : i32, i32
  }
  func.func @transform_4(%arg0: i32) -> (i32, i32) {
    %c0_i32 = arith.constant 0 : i32
    %c0_i32_0 = arith.constant 0 : i32
    %c0_i32_1 = arith.constant 0 : i32
    return %c0_i32, %c0_i32_0 : i32, i32
  }
  func.func @transform_5(%arg0: i32) -> (i32, i32) {
    %c0_i32 = arith.constant 0 : i32
    %c0_i32_0 = arith.constant 0 : i32
    %c0_i32_1 = arith.constant 0 : i32
    return %c0_i32, %c0_i32_0 : i32, i32
  }
  func.func @transform_6(%arg0: i32) -> (i32, i32, i32) {
    %c0_i32 = arith.constant 0 : i32
    %c0_i32_0 = arith.constant 0 : i32
    %c0_i32_1 = arith.constant 0 : i32
    return %arg0, %c0_i32, %c0_i32_0 : i32, i32, i32
  }
}

module attributes {stable_mosaic.version = 11 : i64} {
  func.func @_ln_linear_kernel(%arg0: i32, %arg1: memref<32x32xf32, #tpu.memory_space<vmem>>, %arg2: memref<1x32xf32, #tpu.memory_space<vmem>>, %arg3: memref<1x32xf32, #tpu.memory_space<vmem>>, %arg4: memref<32x32xbf16, #tpu.memory_space<vmem>>, %arg5: memref<1x32xf32, #tpu.memory_space<vmem>>, %arg6: memref<32x32xf32, #tpu.memory_space<vmem>>) attributes {dimension_semantics = [#tpu.dimension_semantics<parallel>], iteration_bounds = array<i64: 1>, scalar_prefetch = 0 : i64, scratch_operands = 0 : i64, tpu.core_type = #tpu.core_type<tc>, window_params = [{transform_indices = @transform_0, window_bounds = array<i64: 32, 32>}, {pipeline_mode = #tpu.pipeline_mode<synchronous>, transform_indices = @transform_1, window_bounds = array<i64: 1, 32>}, {pipeline_mode = #tpu.pipeline_mode<synchronous>, transform_indices = @transform_2, window_bounds = array<i64: 1, 32>}, {pipeline_mode = #tpu.pipeline_mode<synchronous>, transform_indices = @transform_3, window_bounds = array<i64: 32, 32>}, {pipeline_mode = #tpu.pipeline_mode<synchronous>, transform_indices = @transform_4, window_bounds = array<i64: 1, 32>}, {transform_indices = @transform_5, window_bounds = array<i64: 32, 32>}]} {
    %c0 = arith.constant 0 : index
    %c0_0 = arith.constant 0 : index
    %0 = vector.load %arg1[%c0, %c0_0] : memref<32x32xf32, #tpu.memory_space<vmem>>, vector<32x32xf32>
    %cst = arith.constant dense<0.000000e+00> : vector<32xf32>
    %1 = vector.multi_reduction <add>, %0, %cst [1] : vector<32x32xf32> to vector<32xf32>
    %2 = vector.shape_cast %1 : vector<32xf32> to vector<32x1xf32>
    %cst_1 = arith.constant 3.200000e+01 : f32
    %3 = vector.broadcast %cst_1 : f32 to vector<32x1xf32>
    %4 = arith.divf %2, %3 : vector<32x1xf32>
    %5 = vector.broadcast %4 : vector<32x1xf32> to vector<32x32xf32>
    %6 = arith.subf %0, %5 : vector<32x32xf32>
    %7 = arith.mulf %6, %6 : vector<32x32xf32>
    %cst_2 = arith.constant dense<0.000000e+00> : vector<32xf32>
    %8 = vector.multi_reduction <add>, %7, %cst_2 [1] : vector<32x32xf32> to vector<32xf32>
    %9 = vector.shape_cast %8 : vector<32xf32> to vector<32x1xf32>
    %cst_3 = arith.constant 3.200000e+01 : f32
    %10 = vector.broadcast %cst_3 : f32 to vector<32x1xf32>
    %11 = arith.divf %9, %10 : vector<32x1xf32>
    %12 = vector.broadcast %4 : vector<32x1xf32> to vector<32x32xf32>
    %13 = arith.subf %0, %12 : vector<32x32xf32>
    %cst_4 = arith.constant 9.99999974E-6 : f32
    %14 = vector.broadcast %cst_4 : f32 to vector<32x1xf32>
    %15 = arith.addf %11, %14 : vector<32x1xf32>
    %16 = math.rsqrt %15 : vector<32x1xf32>
    %17 = vector.broadcast %16 : vector<32x1xf32> to vector<32x32xf32>
    %18 = arith.mulf %13, %17 : vector<32x32xf32>
    %c0_5 = arith.constant 0 : index
    %c0_6 = arith.constant 0 : index
    %19 = vector.load %arg2[%c0_5, %c0_6] : memref<1x32xf32, #tpu.memory_space<vmem>>, vector<1x32xf32>
    %20 = vector.broadcast %19 : vector<1x32xf32> to vector<32x32xf32>
    %21 = arith.mulf %18, %20 : vector<32x32xf32>
    %c0_7 = arith.constant 0 : index
    %c0_8 = arith.constant 0 : index
    %22 = vector.load %arg3[%c0_7, %c0_8] : memref<1x32xf32, #tpu.memory_space<vmem>>, vector<1x32xf32>
    %23 = vector.broadcast %22 : vector<1x32xf32> to vector<32x32xf32>
    %24 = arith.addf %21, %23 : vector<32x32xf32>
    %25 = arith.truncf %24 : vector<32x32xf32> to vector<32x32xbf16>
    %c0_9 = arith.constant 0 : index
    %c0_10 = arith.constant 0 : index
    %26 = vector.load %arg4[%c0_9, %c0_10] : memref<32x32xbf16, #tpu.memory_space<vmem>>, vector<32x32xbf16>
    %cst_11 = arith.constant dense<0.000000e+00> : vector<32x32xf32>
    %27 = tpu.matmul %25, %26, %cst_11 {dimension_numbers = #tpu.dot_dimension_numbers<[1], [0], [0], [1], [0, 0, 1, 1], [], []>} : vector<32x32xbf16>, vector<32x32xbf16>, vector<32x32xf32> -> vector<32x32xf32>
    %c0_12 = arith.constant 0 : index
    %c0_13 = arith.constant 0 : index
    %28 = vector.load %arg5[%c0_12, %c0_13] : memref<1x32xf32, #tpu.memory_space<vmem>>, vector<1x32xf32>
    %29 = vector.broadcast %28 : vector<1x32xf32> to vector<32x32xf32>
    %30 = arith.addf %27, %29 : vector<32x32xf32>
    %c0_14 = arith.constant 0 : index
    %c0_15 = arith.constant 0 : index
    %31 = vector.load %arg6[%c0_14, %c0_15] : memref<32x32xf32, #tpu.memory_space<vmem>>, vector<32x32xf32>
    tpu.vector_store %arg6[%c0_14, %c0_15], %30 {strides = array<i32>} : memref<32x32xf32, #tpu.memory_space<vmem>>, vector<32x32xf32>,
    return
  }
  func.func @transform_0(%arg0: i32) -> (i32, i32) {
    %c0_i32 = arith.constant 0 : i32
    %c0_i32_0 = arith.constant 0 : i32
    return %arg0, %c0_i32 : i32, i32
  }
  func.func @transform_1(%arg0: i32) -> (i32, i32) {
    %c0_i32 = arith.constant 0 : i32
    %c0_i32_0 = arith.constant 0 : i32
    %c0_i32_1 = arith.constant 0 : i32
    return %c0_i32, %c0_i32_0 : i32, i32
  }
  func.func @transform_2(%arg0: i32) -> (i32, i32) {
    %c0_i32 = arith.constant 0 : i32
    %c0_i32_0 = arith.constant 0 : i32
    %c0_i32_1 = arith.constant 0 : i32
    return %c0_i32, %c0_i32_0 : i32, i32
  }
  func.func @transform_3(%arg0: i32) -> (i32, i32) {
    %c0_i32 = arith.constant 0 : i32
    %c0_i32_0 = arith.constant 0 : i32
    %c0_i32_1 = arith.constant 0 : i32
    return %c0_i32, %c0_i32_0 : i32, i32
  }
  func.func @transform_4(%arg0: i32) -> (i32, i32) {
    %c0_i32 = arith.constant 0 : i32
    %c0_i32_0 = arith.constant 0 : i32
    %c0_i32_1 = arith.constant 0 : i32
    return %c0_i32, %c0_i32_0 : i32, i32
  }
  func.func @transform_5(%arg0: i32) -> (i32, i32) {
    %c0_i32 = arith.constant 0 : i32
    %c0_i32_0 = arith.constant 0 : i32
    return %arg0, %c0_i32 : i32, i32
  }
}

module attributes {stable_mosaic.version = 11 : i64} {
  func.func @_encoder_stack_kernel(%arg0: i32, %arg1: i32, %arg2: memref<3xf32, #tpu.memory_space<smem>>, %arg3: memref<1x16x32xf32, #tpu.memory_space<vmem>>, %arg4: memref<1x32x96xbf16, #tpu.memory_space<vmem>>, %arg5: memref<1x1x96xf32, #tpu.memory_space<vmem>>, %arg6: memref<1x32x32xbf16, #tpu.memory_space<vmem>>, %arg7: memref<1x1x32xf32, #tpu.memory_space<vmem>>, %arg8: memref<1x1x32xf32, #tpu.memory_space<vmem>>, %arg9: memref<1x1x32xf32, #tpu.memory_space<vmem>>, %arg10: memref<1x32x64xbf16, #tpu.memory_space<vmem>>, %arg11: memref<1x1x64xf32, #tpu.memory_space<vmem>>, %arg12: memref<1x64x32xbf16, #tpu.memory_space<vmem>>, %arg13: memref<1x1x32xf32, #tpu.memory_space<vmem>>, %arg14: memref<1x1x32xf32, #tpu.memory_space<vmem>>, %arg15: memref<1x1x32xf32, #tpu.memory_space<vmem>>, %arg16: memref<32x32xbf16, #tpu.memory_space<vmem>>, %arg17: memref<1x32xf32, #tpu.memory_space<vmem>>, %arg18: memref<32x2xbf16, #tpu.memory_space<vmem>>, %arg19: memref<1x2xf32, #tpu.memory_space<vmem>>, %arg20: memref<1x1x2xf32, #tpu.memory_space<vmem>>, %arg21: memref<16x32xf32, #tpu.memory_space<vmem>>, %arg22: memref<16x32xf32, #tpu.memory_space<vmem>>) attributes {dimension_semantics = [#tpu.dimension_semantics<parallel>, #tpu.dimension_semantics<arbitrary>], iteration_bounds = array<i64: 2, 2>, scalar_prefetch = 0 : i64, scratch_operands = 2 : i64, tpu.core_type = #tpu.core_type<tc>, window_params = [{transform_indices = @transform_0, window_bounds = array<i64: 3>}, {transform_indices = @transform_1, window_bounds = array<i64: 1, 16, 32>}, {transform_indices = @transform_2, window_bounds = array<i64: 1, 32, 96>}, {transform_indices = @transform_3, window_bounds = array<i64: 1, 1, 96>}, {transform_indices = @transform_4, window_bounds = array<i64: 1, 32, 32>}, {transform_indices = @transform_5, window_bounds = array<i64: 1, 1, 32>}, {transform_indices = @transform_6, window_bounds = array<i64: 1, 1, 32>}, {transform_indices = @transform_7, window_bounds = array<i64: 1, 1, 32>}, {transform_indices = @transform_8, window_bounds = array<i64: 1, 32, 64>}, {transform_indices = @transform_9, window_bounds = array<i64: 1, 1, 64>}, {transform_indices = @transform_10, window_bounds = array<i64: 1, 64, 32>}, {transform_indices = @transform_11, window_bounds = array<i64: 1, 1, 32>}, {transform_indices = @transform_12, window_bounds = array<i64: 1, 1, 32>}, {transform_indices = @transform_13, window_bounds = array<i64: 1, 1, 32>}, {pipeline_mode = #tpu.pipeline_mode<synchronous>, transform_indices = @transform_14, window_bounds = array<i64: 32, 32>}, {pipeline_mode = #tpu.pipeline_mode<synchronous>, transform_indices = @transform_15, window_bounds = array<i64: 1, 32>}, {pipeline_mode = #tpu.pipeline_mode<synchronous>, transform_indices = @transform_16, window_bounds = array<i64: 32, 2>}, {pipeline_mode = #tpu.pipeline_mode<synchronous>, transform_indices = @transform_17, window_bounds = array<i64: 1, 2>}, {transform_indices = @transform_18, window_bounds = array<i64: 1, 1, 2>}]} {
    %c0_i32 = arith.constant 0 : i32
    %0 = arith.cmpi eq, %arg1, %c0_i32 : i32
    %1 = arith.extui %0 : i1 to i32
    %c0_i32_0 = arith.constant 0 : i32
    %2 = arith.cmpi ne, %1, %c0_i32_0 : i32
    scf.if %2 {
      %c0_72 = arith.constant 0 : index
      %c0_73 = arith.constant 0 : index
      %c0_74 = arith.constant 0 : index
      %157 = vector.load %arg3[%c0_72, %c0_73, %c0_74] : memref<1x16x32xf32, #tpu.memory_space<vmem>>, vector<1x16x32xf32>
      %158 = vector.shape_cast %157 : vector<1x16x32xf32> to vector<16x32xf32>
      %c0_75 = arith.constant 0 : index
      %c0_76 = arith.constant 0 : index
      %159 = vector.load %arg21[%c0_75, %c0_76] : memref<16x32xf32, #tpu.memory_space<vmem>>, vector<16x32xf32>
      tpu.vector_store %arg21[%c0_75, %c0_76], %158 {strides = array<i32>} : memref<16x32xf32, #tpu.memory_space<vmem>>, vector<16x32xf32>,
      %c0_77 = arith.constant 0 : index
      %160 = memref.load %arg2[%c0_77] : memref<3xf32, #tpu.memory_space<smem>>
      %161 = vector.broadcast %160 : f32 to vector<16x32xf32>
      %162 = arith.mulf %161, %158 : vector<16x32xf32>
      %c0_78 = arith.constant 0 : index
      %c0_79 = arith.constant 0 : index
      %163 = vector.load %arg22[%c0_78, %c0_79] : memref<16x32xf32, #tpu.memory_space<vmem>>, vector<16x32xf32>
      tpu.vector_store %arg22[%c0_78, %c0_79], %162 {strides = array<i32>} : memref<16x32xf32, #tpu.memory_space<vmem>>, vector<16x32xf32>,
    } else {
    }
    %c0 = arith.constant 0 : index
    %c0_1 = arith.constant 0 : index
    %3 = vector.load %arg21[%c0, %c0_1] : memref<16x32xf32, #tpu.memory_space<vmem>>, vector<16x32xf32>
    %4 = arith.truncf %3 : vector<16x32xf32> to vector<16x32xbf16>
    %c0_2 = arith.constant 0 : index
    %c0_3 = arith.constant 0 : index
    %c0_4 = arith.constant 0 : index
    %5 = vector.load %arg4[%c0_2, %c0_3, %c0_4] : memref<1x32x96xbf16, #tpu.memory_space<vmem>>, vector<1x32x96xbf16>
    %6 = vector.shape_cast %5 : vector<1x32x96xbf16> to vector<32x96xbf16>
    %cst = arith.constant dense<0.000000e+00> : vector<16x96xf32>
    %7 = tpu.matmul %4, %6, %cst {dimension_numbers = #tpu.dot_dimension_numbers<[1], [0], [0], [1], [0, 0, 1, 1], [], []>} : vector<16x32xbf16>, vector<32x96xbf16>, vector<16x96xf32> -> vector<16x96xf32>
    %c0_5 = arith.constant 0 : index
    %c0_6 = arith.constant 0 : index
    %c0_7 = arith.constant 0 : index
    %8 = vector.load %arg5[%c0_5, %c0_6, %c0_7] : memref<1x1x96xf32, #tpu.memory_space<vmem>>, vector<1x1x96xf32>
    %9 = vector.shape_cast %8 : vector<1x1x96xf32> to vector<1x96xf32>
    %10 = vector.broadcast %9 : vector<1x96xf32> to vector<16x96xf32>
    %11 = arith.addf %7, %10 : vector<16x96xf32>
    %12 = vector.extract_strided_slice %11 {offsets = [0, 0], sizes = [16, 32], strides = [1, 1]} : vector<16x96xf32> to vector<16x32xf32>
    %cst_8 = arith.constant 2.500000e-01 : f32
    %13 = vector.broadcast %cst_8 : f32 to vector<16x32xf32>
    %14 = arith.mulf %12, %13 : vector<16x32xf32>
    %15 = vector.extract_strided_slice %11 {offsets = [0, 32], sizes = [16, 32], strides = [1, 1]} : vector<16x96xf32> to vector<16x32xf32>
    %16 = vector.extract_strided_slice %11 {offsets = [0, 64], sizes = [16, 32], strides = [1, 1]} : vector<16x96xf32> to vector<16x32xf32>
    %17 = vector.extract_strided_slice %14 {offsets = [0, 0], sizes = [16, 16], strides = [1, 1]} : vector<16x32xf32> to vector<16x16xf32>
    %18 = arith.truncf %17 : vector<16x16xf32> to vector<16x16xbf16>
    %19 = vector.extract_strided_slice %15 {offsets = [0, 0], sizes = [16, 16], strides = [1, 1]} : vector<16x32xf32> to vector<16x16xf32>
    %20 = arith.truncf %19 : vector<16x16xf32> to vector<16x16xbf16>
    %cst_9 = arith.constant dense<0.000000e+00> : vector<16x16xf32>
    %21 = tpu.matmul %18, %20, %cst_9 {dimension_numbers = #tpu.dot_dimension_numbers<[1], [1], [0], [0], [0, 0, 1, 0], [], []>} : vector<16x16xbf16>, vector<16x16xbf16>, vector<16x16xf32> -> vector<16x16xf32>
    %cst_10 = arith.constant dense<0xFF800000> : vector<16xf32>
    %22 = vector.multi_reduction <maximumf>, %21, %cst_10 [1] : vector<16x16xf32> to vector<16xf32>
    %23 = vector.shape_cast %22 : vector<16xf32> to vector<16x1xf32>
    %24 = vector.broadcast %23 : vector<16x1xf32> to vector<16x16xf32>
    %25 = arith.subf %21, %24 : vector<16x16xf32>
    %26 = math.exp %25 : vector<16x16xf32>
    %cst_11 = arith.constant dense<0.000000e+00> : vector<16xf32>
    %27 = vector.multi_reduction <add>, %26, %cst_11 [1] : vector<16x16xf32> to vector<16xf32>
    %28 = vector.shape_cast %27 : vector<16xf32> to vector<16x1xf32>
    %29 = vector.broadcast %28 : vector<16x1xf32> to vector<16x16xf32>
    %30 = arith.divf %26, %29 : vector<16x16xf32>
    %31 = arith.truncf %30 : vector<16x16xf32> to vector<16x16xbf16>
    %32 = vector.extract_strided_slice %16 {offsets = [0, 0], sizes = [16, 16], strides = [1, 1]} : vector<16x32xf32> to vector<16x16xf32>
    %33 = arith.truncf %32 : vector<16x16xf32> to vector<16x16xbf16>
    %cst_12 = arith.constant dense<0.000000e+00> : vector<16x16xf32>
    %34 = tpu.matmul %31, %33, %cst_12 {dimension_numbers = #tpu.dot_dimension_numbers<[1], [0], [0], [1], [0, 0, 1, 1], [], []>} : vector<16x16xbf16>, vector<16x16xbf16>, vector<16x16xf32> -> vector<16x16xf32>
    %35 = vector.extract_strided_slice %14 {offsets = [0, 16], sizes = [16, 16], strides = [1, 1]} : vector<16x32xf32> to vector<16x16xf32>
    %36 = arith.truncf %35 : vector<16x16xf32> to vector<16x16xbf16>
    %37 = vector.extract_strided_slice %15 {offsets = [0, 16], sizes = [16, 16], strides = [1, 1]} : vector<16x32xf32> to vector<16x16xf32>
    %38 = arith.truncf %37 : vector<16x16xf32> to vector<16x16xbf16>
    %cst_13 = arith.constant dense<0.000000e+00> : vector<16x16xf32>
    %39 = tpu.matmul %36, %38, %cst_13 {dimension_numbers = #tpu.dot_dimension_numbers<[1], [1], [0], [0], [0, 0, 1, 0], [], []>} : vector<16x16xbf16>, vector<16x16xbf16>, vector<16x16xf32> -> vector<16x16xf32>
    %cst_14 = arith.constant dense<0xFF800000> : vector<16xf32>
    %40 = vector.multi_reduction <maximumf>, %39, %cst_14 [1] : vector<16x16xf32> to vector<16xf32>
    %41 = vector.shape_cast %40 : vector<16xf32> to vector<16x1xf32>
    %42 = vector.broadcast %41 : vector<16x1xf32> to vector<16x16xf32>
    %43 = arith.subf %39, %42 : vector<16x16xf32>
    %44 = math.exp %43 : vector<16x16xf32>
    %cst_15 = arith.constant dense<0.000000e+00> : vector<16xf32>
    %45 = vector.multi_reduction <add>, %44, %cst_15 [1] : vector<16x16xf32> to vector<16xf32>
    %46 = vector.shape_cast %45 : vector<16xf32> to vector<16x1xf32>
    %47 = vector.broadcast %46 : vector<16x1xf32> to vector<16x16xf32>
    %48 = arith.divf %44, %47 : vector<16x16xf32>
    %49 = arith.truncf %48 : vector<16x16xf32> to vector<16x16xbf16>
    %50 = vector.extract_strided_slice %16 {offsets = [0, 16], sizes = [16, 16], strides = [1, 1]} : vector<16x32xf32> to vector<16x16xf32>
    %51 = arith.truncf %50 : vector<16x16xf32> to vector<16x16xbf16>
    %cst_16 = arith.constant dense<0.000000e+00> : vector<16x16xf32>
    %52 = tpu.matmul %49, %51, %cst_16 {dimension_numbers = #tpu.dot_dimension_numbers<[1], [0], [0], [1], [0, 0, 1, 1], [], []>} : vector<16x16xbf16>, vector<16x16xbf16>, vector<16x16xf32> -> vector<16x16xf32>
    %53 = tpu.concatenate %34, %52 in 1 : vector<16x16xf32>, vector<16x16xf32> -> vector<16x32xf32>
    %54 = arith.truncf %53 : vector<16x32xf32> to vector<16x32xbf16>
    %c0_17 = arith.constant 0 : index
    %c0_18 = arith.constant 0 : index
    %c0_19 = arith.constant 0 : index
    %55 = vector.load %arg6[%c0_17, %c0_18, %c0_19] : memref<1x32x32xbf16, #tpu.memory_space<vmem>>, vector<1x32x32xbf16>
    %56 = vector.shape_cast %55 : vector<1x32x32xbf16> to vector<32x32xbf16>
    %cst_20 = arith.constant dense<0.000000e+00> : vector<16x32xf32>
    %57 = tpu.matmul %54, %56, %cst_20 {dimension_numbers = #tpu.dot_dimension_numbers<[1], [0], [0], [1], [0, 0, 1, 1], [], []>} : vector<16x32xbf16>, vector<32x32xbf16>, vector<16x32xf32> -> vector<16x32xf32>
    %c0_21 = arith.constant 0 : index
    %c0_22 = arith.constant 0 : index
    %c0_23 = arith.constant 0 : index
    %58 = vector.load %arg7[%c0_21, %c0_22, %c0_23] : memref<1x1x32xf32, #tpu.memory_space<vmem>>, vector<1x1x32xf32>
    %59 = vector.shape_cast %58 : vector<1x1x32xf32> to vector<1x32xf32>
    %60 = vector.broadcast %59 : vector<1x32xf32> to vector<16x32xf32>
    %61 = arith.addf %57, %60 : vector<16x32xf32>
    %62 = arith.addf %3, %61 : vector<16x32xf32>
    %c0_24 = arith.constant 0 : index
    %c0_25 = arith.constant 0 : index
    %c0_26 = arith.constant 0 : index
    %63 = vector.load %arg8[%c0_24, %c0_25, %c0_26] : memref<1x1x32xf32, #tpu.memory_space<vmem>>, vector<1x1x32xf32>
    %64 = vector.shape_cast %63 : vector<1x1x32xf32> to vector<1x32xf32>
    %c0_27 = arith.constant 0 : index
    %c0_28 = arith.constant 0 : index
    %c0_29 = arith.constant 0 : index
    %65 = vector.load %arg9[%c0_27, %c0_28, %c0_29] : memref<1x1x32xf32, #tpu.memory_space<vmem>>, vector<1x1x32xf32>
    %66 = vector.shape_cast %65 : vector<1x1x32xf32> to vector<1x32xf32>
    %cst_30 = arith.constant dense<0.000000e+00> : vector<16xf32>
    %67 = vector.multi_reduction <add>, %62, %cst_30 [1] : vector<16x32xf32> to vector<16xf32>
    %68 = vector.shape_cast %67 : vector<16xf32> to vector<16x1xf32>
    %cst_31 = arith.constant 3.200000e+01 : f32
    %69 = vector.broadcast %cst_31 : f32 to vector<16x1xf32>
    %70 = arith.divf %68, %69 : vector<16x1xf32>
    %71 = vector.broadcast %70 : vector<16x1xf32> to vector<16x32xf32>
    %72 = arith.subf %62, %71 : vector<16x32xf32>
    %73 = arith.mulf %72, %72 : vector<16x32xf32>
    %cst_32 = arith.constant dense<0.000000e+00> : vector<16xf32>
    %74 = vector.multi_reduction <add>, %73, %cst_32 [1] : vector<16x32xf32> to vector<16xf32>
    %75 = vector.shape_cast %74 : vector<16xf32> to vector<16x1xf32>
    %cst_33 = arith.constant 3.200000e+01 : f32
    %76 = vector.broadcast %cst_33 : f32 to vector<16x1xf32>
    %77 = arith.divf %75, %76 : vector<16x1xf32>
    %78 = vector.broadcast %70 : vector<16x1xf32> to vector<16x32xf32>
    %79 = arith.subf %62, %78 : vector<16x32xf32>
    %cst_34 = arith.constant 9.99999974E-6 : f32
    %80 = vector.broadcast %cst_34 : f32 to vector<16x1xf32>
    %81 = arith.addf %77, %80 : vector<16x1xf32>
    %82 = math.rsqrt %81 : vector<16x1xf32>
    %83 = vector.broadcast %82 : vector<16x1xf32> to vector<16x32xf32>
    %84 = arith.mulf %79, %83 : vector<16x32xf32>
    %85 = vector.broadcast %64 : vector<1x32xf32> to vector<16x32xf32>
    %86 = arith.mulf %84, %85 : vector<16x32xf32>
    %87 = vector.broadcast %66 : vector<1x32xf32> to vector<16x32xf32>
    %88 = arith.addf %86, %87 : vector<16x32xf32>
    %89 = arith.truncf %88 : vector<16x32xf32> to vector<16x32xbf16>
    %c0_35 = arith.constant 0 : index
    %c0_36 = arith.constant 0 : index
    %c0_37 = arith.constant 0 : index
    %90 = vector.load %arg10[%c0_35, %c0_36, %c0_37] : memref<1x32x64xbf16, #tpu.memory_space<vmem>>, vector<1x32x64xbf16>
    %91 = vector.shape_cast %90 : vector<1x32x64xbf16> to vector<32x64xbf16>
    %cst_38 = arith.constant dense<0.000000e+00> : vector<16x64xf32>
    %92 = tpu.matmul %89, %91, %cst_38 {dimension_numbers = #tpu.dot_dimension_numbers<[1], [0], [0], [1], [0, 0, 1, 1], [], []>} : vector<16x32xbf16>, vector<32x64xbf16>, vector<16x64xf32> -> vector<16x64xf32>
    %c0_39 = arith.constant 0 : index
    %c0_40 = arith.constant 0 : index
    %c0_41 = arith.constant 0 : index
    %93 = vector.load %arg11[%c0_39, %c0_40, %c0_41] : memref<1x1x64xf32, #tpu.memory_space<vmem>>, vector<1x1x64xf32>
    %94 = vector.shape_cast %93 : vector<1x1x64xf32> to vector<1x64xf32>
    %95 = vector.broadcast %94 : vector<1x64xf32> to vector<16x64xf32>
    %96 = arith.addf %92, %95 : vector<16x64xf32>
    %97 = arith.mulf %96, %96 : vector<16x64xf32>
    %98 = arith.mulf %96, %97 : vector<16x64xf32>
    %cst_42 = arith.constant 4.471500e-02 : f32
    %99 = vector.broadcast %cst_42 : f32 to vector<16x64xf32>
    %100 = arith.mulf %99, %98 : vector<16x64xf32>
    %101 = arith.addf %96, %100 : vector<16x64xf32>
    %cst_43 = arith.constant 0.797884583 : f32
    %102 = vector.broadcast %cst_43 : f32 to vector<16x64xf32>
    %103 = arith.mulf %102, %101 : vector<16x64xf32>
    %104 = math.tanh %103 : vector<16x64xf32>
    %cst_44 = arith.constant 1.000000e+00 : f32
    %105 = vector.broadcast %cst_44 : f32 to vector<16x64xf32>
    %106 = arith.addf %105, %104 : vector<16x64xf32>
    %cst_45 = arith.constant 5.000000e-01 : f32
    %107 = vector.broadcast %cst_45 : f32 to vector<16x64xf32>
    %108 = arith.mulf %107, %106 : vector<16x64xf32>
    %109 = arith.mulf %96, %108 : vector<16x64xf32>
    %110 = arith.truncf %109 : vector<16x64xf32> to vector<16x64xbf16>
    %c0_46 = arith.constant 0 : index
    %c0_47 = arith.constant 0 : index
    %c0_48 = arith.constant 0 : index
    %111 = vector.load %arg12[%c0_46, %c0_47, %c0_48] : memref<1x64x32xbf16, #tpu.memory_space<vmem>>, vector<1x64x32xbf16>
    %112 = vector.shape_cast %111 : vector<1x64x32xbf16> to vector<64x32xbf16>
    %cst_49 = arith.constant dense<0.000000e+00> : vector<16x32xf32>
    %113 = tpu.matmul %110, %112, %cst_49 {dimension_numbers = #tpu.dot_dimension_numbers<[1], [0], [0], [1], [0, 0, 1, 1], [], []>} : vector<16x64xbf16>, vector<64x32xbf16>, vector<16x32xf32> -> vector<16x32xf32>
    %c0_50 = arith.constant 0 : index
    %c0_51 = arith.constant 0 : index
    %c0_52 = arith.constant 0 : index
    %114 = vector.load %arg13[%c0_50, %c0_51, %c0_52] : memref<1x1x32xf32, #tpu.memory_space<vmem>>, vector<1x1x32xf32>
    %115 = vector.shape_cast %114 : vector<1x1x32xf32> to vector<1x32xf32>
    %116 = vector.broadcast %115 : vector<1x32xf32> to vector<16x32xf32>
    %117 = arith.addf %113, %116 : vector<16x32xf32>
    %118 = arith.addf %88, %117 : vector<16x32xf32>
    %c0_53 = arith.constant 0 : index
    %c0_54 = arith.constant 0 : index
    %c0_55 = arith.constant 0 : index
    %119 = vector.load %arg14[%c0_53, %c0_54, %c0_55] : memref<1x1x32xf32, #tpu.memory_space<vmem>>, vector<1x1x32xf32>
    %120 = vector.shape_cast %119 : vector<1x1x32xf32> to vector<1x32xf32>
    %c0_56 = arith.constant 0 : index
    %c0_57 = arith.constant 0 : index
    %c0_58 = arith.constant 0 : index
    %121 = vector.load %arg15[%c0_56, %c0_57, %c0_58] : memref<1x1x32xf32, #tpu.memory_space<vmem>>, vector<1x1x32xf32>
    %122 = vector.shape_cast %121 : vector<1x1x32xf32> to vector<1x32xf32>
    %cst_59 = arith.constant dense<0.000000e+00> : vector<16xf32>
    %123 = vector.multi_reduction <add>, %118, %cst_59 [1] : vector<16x32xf32> to vector<16xf32>
    %124 = vector.shape_cast %123 : vector<16xf32> to vector<16x1xf32>
    %cst_60 = arith.constant 3.200000e+01 : f32
    %125 = vector.broadcast %cst_60 : f32 to vector<16x1xf32>
    %126 = arith.divf %124, %125 : vector<16x1xf32>
    %127 = vector.broadcast %126 : vector<16x1xf32> to vector<16x32xf32>
    %128 = arith.subf %118, %127 : vector<16x32xf32>
    %129 = arith.mulf %128, %128 : vector<16x32xf32>
    %cst_61 = arith.constant dense<0.000000e+00> : vector<16xf32>
    %130 = vector.multi_reduction <add>, %129, %cst_61 [1] : vector<16x32xf32> to vector<16xf32>
    %131 = vector.shape_cast %130 : vector<16xf32> to vector<16x1xf32>
    %cst_62 = arith.constant 3.200000e+01 : f32
    %132 = vector.broadcast %cst_62 : f32 to vector<16x1xf32>
    %133 = arith.divf %131, %132 : vector<16x1xf32>
    %134 = vector.broadcast %126 : vector<16x1xf32> to vector<16x32xf32>
    %135 = arith.subf %118, %134 : vector<16x32xf32>
    %cst_63 = arith.constant 9.99999974E-6 : f32
    %136 = vector.broadcast %cst_63 : f32 to vector<16x1xf32>
    %137 = arith.addf %133, %136 : vector<16x1xf32>
    %138 = math.rsqrt %137 : vector<16x1xf32>
    %139 = vector.broadcast %138 : vector<16x1xf32> to vector<16x32xf32>
    %140 = arith.mulf %135, %139 : vector<16x32xf32>
    %141 = vector.broadcast %120 : vector<1x32xf32> to vector<16x32xf32>
    %142 = arith.mulf %140, %141 : vector<16x32xf32>
    %143 = vector.broadcast %122 : vector<1x32xf32> to vector<16x32xf32>
    %144 = arith.addf %142, %143 : vector<16x32xf32>
    %c0_64 = arith.constant 0 : index
    %c0_65 = arith.constant 0 : index
    %145 = vector.load %arg21[%c0_64, %c0_65] : memref<16x32xf32, #tpu.memory_space<vmem>>, vector<16x32xf32>
    tpu.vector_store %arg21[%c0_64, %c0_65], %144 {strides = array<i32>} : memref<16x32xf32, #tpu.memory_space<vmem>>, vector<16x32xf32>,
    %c0_66 = arith.constant 0 : index
    %c0_67 = arith.constant 0 : index
    %146 = vector.load %arg22[%c0_66, %c0_67] : memref<16x32xf32, #tpu.memory_space<vmem>>, vector<16x32xf32>
    %c1_i32 = arith.constant 1 : i32
    %147 = arith.addi %arg1, %c1_i32 : i32
    %148 = arith.index_cast %147 : i32 to index
    %149 = memref.load %arg2[%148] : memref<3xf32, #tpu.memory_space<smem>>
    %150 = vector.broadcast %149 : f32 to vector<16x32xf32>
    %151 = arith.mulf %150, %144 : vector<16x32xf32>
    %152 = arith.addf %146, %151 : vector<16x32xf32>
    %c0_68 = arith.constant 0 : index
    %c0_69 = arith.constant 0 : index
    %153 = vector.load %arg22[%c0_68, %c0_69] : memref<16x32xf32, #tpu.memory_space<vmem>>, vector<16x32xf32>
    tpu.vector_store %arg22[%c0_68, %c0_69], %152 {strides = array<i32>} : memref<16x32xf32, #tpu.memory_space<vmem>>, vector<16x32xf32>,
    %c1_i32_70 = arith.constant 1 : i32
    %154 = arith.cmpi eq, %arg1, %c1_i32_70 : i32
    %155 = arith.extui %154 : i1 to i32
    %c0_i32_71 = arith.constant 0 : i32
    %156 = arith.cmpi ne, %155, %c0_i32_71 : i32
    scf.if %156 {
      %c0_72 = arith.constant 0 : index
      %c0_73 = arith.constant 0 : index
      %157 = vector.load %arg22[%c0_72, %c0_73] : memref<16x32xf32, #tpu.memory_space<vmem>>, vector<16x32xf32>
      %cst_74 = arith.constant dense<0.000000e+00> : vector<32xf32>
      %158 = vector.multi_reduction <add>, %157, %cst_74 [0] : vector<16x32xf32> to vector<32xf32>
      %159 = vector.shape_cast %158 : vector<32xf32> to vector<1x32xf32>
      %cst_75 = arith.constant 1.600000e+01 : f32
      %160 = vector.broadcast %cst_75 : f32 to vector<1x32xf32>
      %161 = arith.divf %159, %160 : vector<1x32xf32>
      %162 = arith.truncf %161 : vector<1x32xf32> to vector<1x32xbf16>
      %c0_76 = arith.constant 0 : index
      %c0_77 = arith.constant 0 : index
      %163 = vector.load %arg16[%c0_76, %c0_77] : memref<32x32xbf16, #tpu.memory_space<vmem>>, vector<32x32xbf16>
      %cst_78 = arith.constant dense<0.000000e+00> : vector<1x32xf32>
      %164 = tpu.matmul %162, %163, %cst_78 {dimension_numbers = #tpu.dot_dimension_numbers<[1], [0], [0], [1], [0, 0, 1, 1], [], []>} : vector<1x32xbf16>, vector<32x32xbf16>, vector<1x32xf32> -> vector<1x32xf32>
      %c0_79 = arith.constant 0 : index
      %c0_80 = arith.constant 0 : index
      %165 = vector.load %arg17[%c0_79, %c0_80] : memref<1x32xf32, #tpu.memory_space<vmem>>, vector<1x32xf32>
      %166 = arith.addf %164, %165 : vector<1x32xf32>
      %167 = arith.truncf %166 : vector<1x32xf32> to vector<1x32xbf16>
      %c0_81 = arith.constant 0 : index
      %c0_82 = arith.constant 0 : index
      %168 = vector.load %arg18[%c0_81, %c0_82] : memref<32x2xbf16, #tpu.memory_space<vmem>>, vector<32x2xbf16>
      %cst_83 = arith.constant dense<0.000000e+00> : vector<1x2xf32>
      %169 = tpu.matmul %167, %168, %cst_83 {dimension_numbers = #tpu.dot_dimension_numbers<[1], [0], [0], [1], [0, 0, 1, 1], [], []>} : vector<1x32xbf16>, vector<32x2xbf16>, vector<1x2xf32> -> vector<1x2xf32>
      %c0_84 = arith.constant 0 : index
      %c0_85 = arith.constant 0 : index
      %170 = vector.load %arg19[%c0_84, %c0_85] : memref<1x2xf32, #tpu.memory_space<vmem>>, vector<1x2xf32>
      %171 = arith.addf %169, %170 : vector<1x2xf32>
      %c0_86 = arith.constant 0 : index
      %c0_87 = arith.constant 0 : index
      %c0_88 = arith.constant 0 : index
      %172 = vector.load %arg20[%c0_86, %c0_87, %c0_88] : memref<1x1x2xf32, #tpu.memory_space<vmem>>, vector<1x1x2xf32>
      %173 = vector.shape_cast %172 : vector<1x1x2xf32> to vector<1x2xf32>
      %174 = vector.shape_cast %171 : vector<1x2xf32> to vector<1x1x2xf32>
      tpu.vector_store %arg20[%c0_86, %c0_87, %c0_88], %174 {strides = array<i32>} : memref<1x1x2xf32, #tpu.memory_space<vmem>>, vector<1x1x2xf32>,
    } else {
    }
    return
  }
  func.func @transform_0(%arg0: i32, %arg1: i32) -> i32 {
    %c0_i32 = arith.constant 0 : i32
    %c0_i32_0 = arith.constant 0 : i32
    return %c0_i32 : i32
  }
  func.func @transform_1(%arg0: i32, %arg1: i32) -> (i32, i32, i32) {
    %c0_i32 = arith.constant 0 : i32
    %c0_i32_0 = arith.constant 0 : i32
    %c0_i32_1 = arith.constant 0 : i32
    return %arg0, %c0_i32, %c0_i32_0 : i32, i32, i32
  }
  func.func @transform_2(%arg0: i32, %arg1: i32) -> (i32, i32, i32) {
    %c0_i32 = arith.constant 0 : i32
    %c0_i32_0 = arith.constant 0 : i32
    %c0_i32_1 = arith.constant 0 : i32
    return %arg1, %c0_i32, %c0_i32_0 : i32, i32, i32
  }
  func.func @transform_3(%arg0: i32, %arg1: i32) -> (i32, i32, i32) {
    %c0_i32 = arith.constant 0 : i32
    %c0_i32_0 = arith.constant 0 : i32
    %c0_i32_1 = arith.constant 0 : i32
    return %arg1, %c0_i32, %c0_i32_0 : i32, i32, i32
  }
  func.func @transform_4(%arg0: i32, %arg1: i32) -> (i32, i32, i32) {
    %c0_i32 = arith.constant 0 : i32
    %c0_i32_0 = arith.constant 0 : i32
    %c0_i32_1 = arith.constant 0 : i32
    return %arg1, %c0_i32, %c0_i32_0 : i32, i32, i32
  }
  func.func @transform_5(%arg0: i32, %arg1: i32) -> (i32, i32, i32) {
    %c0_i32 = arith.constant 0 : i32
    %c0_i32_0 = arith.constant 0 : i32
    %c0_i32_1 = arith.constant 0 : i32
    return %arg1, %c0_i32, %c0_i32_0 : i32, i32, i32
  }
  func.func @transform_6(%arg0: i32, %arg1: i32) -> (i32, i32, i32) {
    %c0_i32 = arith.constant 0 : i32
    %c0_i32_0 = arith.constant 0 : i32
    %c0_i32_1 = arith.constant 0 : i32
    return %arg1, %c0_i32, %c0_i32_0 : i32, i32, i32
  }
  func.func @transform_7(%arg0: i32, %arg1: i32) -> (i32, i32, i32) {
    %c0_i32 = arith.constant 0 : i32
    %c0_i32_0 = arith.constant 0 : i32
    %c0_i32_1 = arith.constant 0 : i32
    return %arg1, %c0_i32, %c0_i32_0 : i32, i32, i32
  }
  func.func @transform_8(%arg0: i32, %arg1: i32) -> (i32, i32, i32) {
    %c0_i32 = arith.constant 0 : i32
    %c0_i32_0 = arith.constant 0 : i32
    %c0_i32_1 = arith.constant 0 : i32
    return %arg1, %c0_i32, %c0_i32_0 : i32, i32, i32
  }
  func.func @transform_9(%arg0: i32, %arg1: i32) -> (i32, i32, i32) {
    %c0_i32 = arith.constant 0 : i32
    %c0_i32_0 = arith.constant 0 : i32
    %c0_i32_1 = arith.constant 0 : i32
    return %arg1, %c0_i32, %c0_i32_0 : i32, i32, i32
  }
  func.func @transform_10(%arg0: i32, %arg1: i32) -> (i32, i32, i32) {
    %c0_i32 = arith.constant 0 : i32
    %c0_i32_0 = arith.constant 0 : i32
    %c0_i32_1 = arith.constant 0 : i32
    return %arg1, %c0_i32, %c0_i32_0 : i32, i32, i32
  }
  func.func @transform_11(%arg0: i32, %arg1: i32) -> (i32, i32, i32) {
    %c0_i32 = arith.constant 0 : i32
    %c0_i32_0 = arith.constant 0 : i32
    %c0_i32_1 = arith.constant 0 : i32
    return %arg1, %c0_i32, %c0_i32_0 : i32, i32, i32
  }
  func.func @transform_12(%arg0: i32, %arg1: i32) -> (i32, i32, i32) {
    %c0_i32 = arith.constant 0 : i32
    %c0_i32_0 = arith.constant 0 : i32
    %c0_i32_1 = arith.constant 0 : i32
    return %arg1, %c0_i32, %c0_i32_0 : i32, i32, i32
  }
  func.func @transform_13(%arg0: i32, %arg1: i32) -> (i32, i32, i32) {
    %c0_i32 = arith.constant 0 : i32
    %c0_i32_0 = arith.constant 0 : i32
    %c0_i32_1 = arith.constant 0 : i32
    return %arg1, %c0_i32, %c0_i32_0 : i32, i32, i32
  }
  func.func @transform_14(%arg0: i32, %arg1: i32) -> (i32, i32) {
    %c0_i32 = arith.constant 0 : i32
    %c0_i32_0 = arith.constant 0 : i32
    %c0_i32_1 = arith.constant 0 : i32
    return %c0_i32, %c0_i32_0 : i32, i32
  }
  func.func @transform_15(%arg0: i32, %arg1: i32) -> (i32, i32) {
    %c0_i32 = arith.constant 0 : i32
    %c0_i32_0 = arith.constant 0 : i32
    %c0_i32_1 = arith.constant 0 : i32
    return %c0_i32, %c0_i32_0 : i32, i32
  }
  func.func @transform_16(%arg0: i32, %arg1: i32) -> (i32, i32) {
    %c0_i32 = arith.constant 0 : i32
    %c0_i32_0 = arith.constant 0 : i32
    %c0_i32_1 = arith.constant 0 : i32
    return %c0_i32, %c0_i32_0 : i32, i32
  }
  func.func @transform_17(%arg0: i32, %arg1: i32) -> (i32, i32) {
    %c0_i32 = arith.constant 0 : i32
    %c0_i32_0 = arith.constant 0 : i32
    %c0_i32_1 = arith.constant 0 : i32
    return %c0_i32, %c0_i32_0 : i32, i32
  }
  func.func @transform_18(%arg0: i32, %arg1: i32) -> (i32, i32, i32) {
    %c0_i32 = arith.constant 0 : i32
    %c0_i32_0 = arith.constant 0 : i32
    %c0_i32_1 = arith.constant 0 : i32
    return %arg0, %c0_i32, %c0_i32_0 : i32, i32, i32
  }
}

</mosaic_0001>

<bundles_post_ra>
// kernel: classifier_forward.6
= control target key start
LH: loop header
LB: loop body
LE: loop exit
PB: predicated region body
PF: predicated region fallthrough
CT: control target
= control target key end

     0   :  { %s491_s15 = smov 0   ;;  %s548_s0 = inlined_call_operand.vmem [shape: f32[2,17,64], index: 0, kind: input, shape index: {}]   ;;  %s549_s1 = inlined_call_operand.vmem [shape: f32[96,32], index: 1, kind: input, shape index: {}]   ;;  %s550_s2 = inlined_call_operand.vmem [shape: f32[1,32], index: 2, kind: input, shape index: {}]   ;;  %s551_s3 = inlined_call_operand.vmem [shape: f32[1,32], index: 3, kind: input, shape index: {}]   ;;  %s552_s4 = inlined_call_operand.vmem [shape: f32[2,16,32], index: 4, kind: output, shape index: {}]  }
   0x1 LB: > { %s389_s16 = sadd.s32 4294967295, %s463_s15   ;;  %p393_p0 = scmp.ge.s32.totalorder %s463_s15, 1  ;;  %s463_s15 = sphi %s491_s15, %s14_s15  }
   0x2   : > { %p162_p1 = scmp.lt.s32.totalorder %s463_s15, 3 }
   0x4   : > { %p163_p2 = pnand %p393_p0, %p162_p1 }
   0x5   : > { %p188_p3 = scmp.lt.s32.totalorder (!%p163_p2), %s389_s16, 1  ;;  %s465_s7 = smov (!%p163_p2), 64  }
   0x6   : > { %166 = sbr.rel (%p163_p2) target bundleno = 365 (0x16d), region = 36 }
   0xb   : > { %v230_v0 = vld [vmem:[%s549_s1 + $0x58] sm:$0xff]  ;;  %v229_v1 = vld [vmem:[%s549_s1 + $0x50] sm:$0xff]  ;;  %s554_s16 = smov (!%p188_p3, %s389_s16), 1  ;;  %v228_v2 = vld [vmem:[%s549_s1 + $0x48] sm:$0xff]  ;;  %vm204_vm0 = vcmask 1046528   ;;  %vm216_vm1 = vcmask 523264  }
   0xc   : > { %416 = vmatprep.subr.mxu0 %v230_v0  ;;  %s443_s21 = smul.u32 24, %s554_s16  ;;  %v227_v3 = vld [vmem:[%s549_s1 + $0x40] sm:$0xff]  ;;  %v226_v4 = vld [vmem:[%s549_s1 + $0x38] sm:$0xff]  ;;  %v225_v11 = vld [vmem:[%s549_s1 + $0x30] sm:$0xff]  ;;  %vm231_vm2 = vcmask 785408   ;;  %s401_s18 = sshll.u32 %s554_s16, 4 }
   0xd   : > { %417 = vmatpush3.msra.mxu0 %v230_v0  ;;  %v224_v13 = vld [vmem:[%s549_s1 + $0x28] sm:$0xff]  ;;  %v223_v15 = vld [vmem:[%s549_s1 + $0x20] sm:$0xff]  ;;  %v222_v16 = vld [vmem:[%s549_s1 + $0x18] sm:$0xff]  ;;  %vm331_vm3 = vcmask 261120  }
   0xe   : > { %418 = vmatprep.subr.mxu0 %v229_v1  ;;  %s192_s26 = scalar_lea.vmem %s548_s0, %s443_s21  ;;  %v221_v17 = vld [vmem:[%s549_s1 + $0x10] sm:$0xff]  ;;  %v220_v18 = vld [vmem:[%s549_s1 + $0x8] sm:$0xff]  ;;  %v219_v19 = vld [vmem:[%s549_s1] sm:$0xff]  ;;  %s197_s21 = scalar_lea.vmem %s552_s4, %s401_s18 }
   0xf   : > { %419 = vmatpush3.msra.mxu0 %v229_v1  ;;  %v198_v5 = vld [vmem:[%s192_s26] sm:$0xff]  ;;  %v199_v6 = vld [vmem:[%s192_s26 + $0x8] sm:$0xff]  ;;  %v200_v7 = vld [vmem:[%s192_s26 + $0x10] sm:$0x1] }
  0x10   : > { %420 = vmatprep.subr.mxu0 %v228_v2  ;;  %v205_v8 = vrot.slane %v198_v5, 1  ;;  %v206_v9 = vrot.slane %v199_v6, 1  ;;  %v208_v10 = vrot.slane %v200_v7, 1 }
  0x11   : > { %421 = vmatpush3.msra.mxu0 %v228_v2 }
  0x12   : > { %422 = vmatprep.subr.mxu0 %v227_v3  ;;  %v207_v12 = vsel %vm204_vm0, %v205_v8, %v206_v9  ;;  %v209_v14 = vsel %vm204_vm0, %v206_v9, %v208_v10 }
  0x13   : > { %423 = vmatpush3.msra.mxu0 %v227_v3  ;;  %210 = vrot.lane.b32.xlu0 %v207_v12, %s465_s7 }
  0x14   : > { %424 = vmatprep.subr.mxu0 %v226_v4 }
  0x15   : > { %425 = vmatpush3.msra.mxu0 %v226_v4 }
  0x16   : > { %426 = vmatprep.subr.mxu0 %v225_v11 }
  0x17   : > { %427 = vmatpush3.msra.mxu0 %v225_v11  ;;  %212 = vrot.lane.b32.xlu0 %v209_v14, %s465_s7 }
  0x18   : > { %428 = vmatprep.subr.mxu0 %v224_v13 }
  0x19   : > { %429 = vmatpush3.msra.mxu0 %v224_v13 }
  0x1a   : > { %430 = vmatprep.subr.mxu0 %v223_v15 }
  0x1b   : > { %431 = vmatpush3.msra.mxu0 %v223_v15 }
  0x1c   : > { %432 = vmatprep.subr.mxu0 %v222_v16 }
  0x1d   : > { %433 = vmatpush3.msra.mxu0 %v222_v16 }
  0x1e   : > { %434 = vmatprep.subr.mxu0 %v221_v17 }
  0x1f   : > { %435 = vmatpush3.msra.mxu0 %v221_v17 }
  0x20   : > { %436 = vmatprep.subr.mxu0 %v220_v18 }
  0x21   : > { %437 = vmatpush3.msra.mxu0 %v220_v18 }
  0x22   : > { %438 = vmatprep.subr.mxu0 %v219_v19 }
  0x23   : > { %439 = vmatpush3.msra.mxu0 %v219_v19 }
  0x85   : > { %v211_v20 = vpop.permute.xlu0 %210 }
  0x86   : > { %v217_v21 = vsel %vm216_vm1, %v198_v5, %v211_v20 }
  0x87   : > { %440 = vmatprep.mubr.msk.f32.mxu0 %vm231_vm2, %v217_v21 }
  0x89   : > { %v213_v22 = vpop.permute.xlu0 %212 }
  0x8a   : > { %v218_v23 = vsel %vm216_vm1, %v199_v6, %v213_v22 }
  0x8b   : > { %441 = vmatmul.mubr.msk.f32.vlgmr.msra.gmra.mxu0 %vm231_vm2, %v218_v23 }
 0x14b   : > { %v442_v24 = vpop.f32.mrf.mxu0 }
 0x14c   : > { %v314_v25 = vmul.f32 %v442_v24, %v442_v24 }
 0x14d   : > { %v304_v26 = vpop.f32.mrf.mxu0 }
 0x14e   : > { %v316_v27 = vmul.f32 %v442_v24, %v314_v25  ;;  %v313_v28 = vmul.f32 %v304_v26, %v304_v26 }
 0x150   : > { %v318_v29 = vmul.f32 0.044715, %v316_v27  ;;  %v315_v30 = vmul.f32 %v313_v28, %v304_v26 }
 0x152   : > { %v320_v31 = vadd.f32 %v442_v24, %v318_v29  ;;  %v317_v32 = vmul.f32 0.044715, %v315_v30 }
 0x154   : > { %v322_v33 = vmul.f32 0.7978846, %v320_v31  ;;  %v319_v34 = vadd.f32 %v317_v32, %v304_v26 }
 0x156   : > { %453 = vtanh.f32 %v322_v33  ;;  %v321_v35 = vmul.f32 0.7978846, %v319_v34 }
 0x158   : > { %455 = vtanh.f32 %v321_v35 }
 0x163   : > { %v454_v36 = vpop.eup %453 }
 0x164   : > { %v326_v37 = vadd.f32 1.0, %v454_v36 }
 0x165   : > { %v456_v38 = vpop.eup %455 }
 0x166   : > { %v328_v39 = vmul.f32 0.5, %v326_v37  ;;  %v325_v40 = vadd.f32 1.0, %v456_v38 }
 0x168   : > { %v330_v41 = vmul.f32 %v442_v24, %v328_v39  ;;  %v327_v42 = vmul.f32 0.5, %v325_v40 }
 0x16a   : > { %333 = vst.msk [vmem:[%s197_s21 + $0x8] sm:$0xff] %vm331_vm3, %v330_v41  ;;  %v329_v43 = vmul.f32 %v327_v42, %v304_v26 }
 0x16c   : > { %332 = vst.msk [vmem:[%s197_s21] sm:$0xff] %vm331_vm3, %v329_v43 }
 0x16d PF: > { %s14_s15 = sadd.s32 1, %s463_s15  }
 0x16e   : > { %p11_p4 = scmp.ge.s32.totalorder %s14_s15, 4  }
 0x170   :  { %13 = sbr.rel (!%p11_p4) target bundleno = 1 (0x1), region = 66 }

// kernel: classifier_forward.5
= control target key start
LH: loop header
LB: loop body
LE: loop exit
PB: predicated region body
PF: predicated region fallthrough
CT: control target
= control target key end

     0   :  { %s663_s15 = smov 0   ;;  %s758_s0 = inlined_call_operand.vmem [shape: f32[2,34,5], index: 0, kind: input, shape index: {}]   ;;  %s759_s1 = inlined_call_operand.vmem [shape: f32[10,32], index: 1, kind: input, shape index: {}]   ;;  %s760_s2 = inlined_call_operand.vmem [shape: f32[1,32], index: 2, kind: input, shape index: {}]   ;;  %s761_s3 = inlined_call_operand.vmem [shape: f32[1,32], index: 3, kind: input, shape index: {}]   ;;  %s762_s4 = inlined_call_operand.vmem [shape: f32[2,33,32], index: 4, kind: output, shape index: {}]  }
   0x1 LB: > { %s556_s16 = sadd.s32 4294967295, %s633_s15   ;;  %p560_p0 = scmp.ge.s32.totalorder %s633_s15, 1  ;;  %s633_s15 = sphi %s663_s15, %s14_s15  }
   0x2   : > { %p162_p1 = scmp.lt.s32.totalorder %s633_s15, 3 }
   0x4   : > { %p163_p2 = pnand %p560_p0, %p162_p1 }
   0x5   : > { %p188_p3 = scmp.lt.s32.totalorder (!%p163_p2), %s556_s16, 1  ;;  %s637_s25 = smov (!%p163_p2), 5  }
   0x6   : > { %166 = sbr.rel (%p163_p2) target bundleno = 446 (0x1be), region = 36 }
   0xb   : > { %v635_v0 = vmov 0.0   ;;  %v264_v1 = vld [vmem:[%s759_s1 + $0x8] sm:$0x3]  ;;  %vm281_vm0 = vcmask 1041408   ;;  %s764_s16 = smov (!%p188_p3, %s556_s16), 1  ;;  %v263_v2 = vld [vmem:[%s759_s1] sm:$0xff] }
   0xc   : > { %580 = vmatprep.subr.mxu0 %v635_v0  ;;  %599 = vmatprep.subr.mxu1 %v635_v0  ;;  %vm636_vm1 = vmmov 0   ;;  %s603_s21 = smul.u32 40, %s764_s16  ;;  %vm208_vm2 = vcmask 1046528   ;;  %vm233_vm3 = vcmask 39936   ;;  %vm239_vm4 = vcmask 48128  }
   0xd   : > { %581 = vmatpush3.msk.msra.mxu0 %vm281_vm0, %v264_v1  ;;  %601 = vmatpush3.msk.msra.mxu1 %vm281_vm0, %v264_v1  ;;  %vm245_vm5 = vcmask 56320   ;;  %vm251_vm6 = vcmask 64512   ;;  %vm257_vm7 = vcmask 72704   ;;  %vm265_vm8 = vcmask 80896  }
   0xe   : > { %582 = vmatprep.subr.mxu0 %v635_v0  ;;  %584 = vmatprep.mubr.msk.f32.mxu0 %vm636_vm1, %v635_v0  ;;  %s192_s24 = scalar_lea.vmem %s758_s0, %s603_s21  ;;  %vm375_vm9 = vcmask 261120   ;;  %vm383_vm10 = vcmask 253952   ;;  %s197_s6 = scalar_lea.vmem %s762_s4, %s603_s21 }
   0xf   : > { %583 = vmatpush3.msra.mxu0 %v263_v2  ;;  %600 = vmatprep.subr.mxu1 %v635_v0  ;;  %v200_v3 = vld [vmem:[%s192_s24 + $0x10] sm:$0xff]  ;;  %v201_v4 = vld [vmem:[%s192_s24 + $0x18] sm:$0xff]  ;;  %v198_v5 = vld [vmem:[%s192_s24] sm:$0xff] }
  0x10   : > { %602 = vmatpush3.msra.mxu1 %v263_v2  ;;  %593 = vmatprep.mubr.msk.f32.mxu1 %vm636_vm1, %v635_v0  ;;  %v212_v6 = vrot.slane %v200_v3, 1  ;;  %v214_v7 = vrot.slane %v201_v4, 1  ;;  %v199_v8 = vld [vmem:[%s192_s24 + $0x8] sm:$0xff]  ;;  %v209_v9 = vrot.slane %v198_v5, 1  ;;  %v202_v10 = vld [vmem:[%s192_s24 + $0x20] sm:$0x3] }
  0x11   : > { %v210_v11 = vrot.slane %v199_v8, 1  ;;  %v216_v12 = vrot.slane %v202_v10, 1 }
  0x12   : > { %v215_v13 = vsel %vm208_vm2, %v212_v6, %v214_v7 }
  0x13   : > { %222 = vrot.lane.b32.xlu1 %v215_v13, %s637_s25  ;;  %v211_v14 = vsel %vm208_vm2, %v209_v9, %v210_v11  ;;  %v217_v15 = vsel %vm208_vm2, %v214_v7, %v216_v12  ;;  %v213_v16 = vsel %vm208_vm2, %v210_v11, %v212_v6 }
  0x14   : > { %218 = vrot.lane.b32.xlu0 %v211_v14, %s637_s25 }
  0x17   : > { %224 = vrot.lane.b32.xlu1 %v217_v15, %s637_s25 }
  0x18   : > { %220 = vrot.lane.b32.xlu0 %v213_v16, %s637_s25 }
  0x1c   : > { %226 = vrot.lane.b32.xlu0 %v216_v12, %s637_s25 }
  0x85   : > { %v223_v17 = vpop.permute.xlu1 %222 }
  0x86   : > { %v219_v18 = vpop.permute.xlu0 %218  ;;  %v236_v19 = vsel %vm233_vm3, %v200_v3, %v223_v17 }
  0x87   : > { %v234_v20 = vsel %vm233_vm3, %v198_v5, %v219_v18  ;;  %v242_v24 = vsel %vm239_vm4, %v236_v19, %v223_v17 }
  0x88   : > { %v240_v21 = vsel %vm239_vm4, %v234_v20, %v219_v18  ;;  %v248_v35 = vsel %vm245_vm5, %v242_v24, %v223_v17 }
  0x89   : > { %v225_v22 = vpop.permute.xlu1 %224  ;;  %v246_v23 = vsel %vm245_vm5, %v240_v21, %v219_v18  ;;  %v254_v42 = vsel %vm251_vm6, %v248_v35, %v223_v17 }
  0x8a   : > { %v237_v25 = vsel %vm233_vm3, %v201_v4, %v225_v22  ;;  %v221_v26 = vpop.permute.xlu0 %220  ;;  %v252_v27 = vsel %vm251_vm6, %v246_v23, %v219_v18  ;;  %v260_v45 = vsel %vm257_vm7, %v254_v42, %v223_v17 }
  0x8b   : > { %v243_v28 = vsel %vm239_vm4, %v237_v25, %v225_v22  ;;  %v235_v29 = vsel %vm233_vm3, %v199_v8, %v221_v26  ;;  %v258_v30 = vsel %vm257_vm7, %v252_v27, %v219_v18 }
  0x8c   : > { %v249_v31 = vsel %vm245_vm5, %v243_v28, %v225_v22  ;;  %v241_v32 = vsel %vm239_vm4, %v235_v29, %v221_v26  ;;  %585 = vmatmul.mubr.msk.f32.vlgmr.msra.gmra.mxu0 %vm265_vm8, %v258_v30 }
  0x8d   : > { %587 = vmatprep.mubr.msk.f32.mxu0 %vm636_vm1, %v635_v0  ;;  %v247_v33 = vsel %vm245_vm5, %v241_v32, %v221_v26  ;;  %v255_v34 = vsel %vm251_vm6, %v249_v31, %v225_v22 }
  0x8e   : > { %v227_v36 = vpop.permute.xlu0 %226  ;;  %v253_v37 = vsel %vm251_vm6, %v247_v33, %v221_v26  ;;  %v261_v38 = vsel %vm257_vm7, %v255_v34, %v225_v22 }
  0x8f   : > { %v238_v39 = vsel %vm233_vm3, %v202_v10, %v227_v36  ;;  %v259_v40 = vsel %vm257_vm7, %v253_v37, %v221_v26  ;;  %594 = vmatmul.mubr.msk.f32.vlgmr.msra.gmra.mxu1 %vm265_vm8, %v261_v38  ;;  %v569_v37 = vld [vmem:[%s760_s2] ss:$0 sm:$0xff] }
  0x90   : > { %v244_v41 = vsel %vm239_vm4, %v238_v39, %v227_v36  ;;  %588 = vmatmul.mubr.msk.f32.gmra.mxu0 %vm265_vm8, %v259_v40  ;;  %596 = vmatprep.mubr.msk.f32.mxu1 %vm636_vm1, %v635_v0 }
  0x91   : > { %v250_v43 = vsel %vm245_vm5, %v244_v41, %v227_v36  ;;  %590 = vmatprep.mubr.msk.f32.mxu0 %vm636_vm1, %v635_v0 }
  0x92   : > { %v256_v44 = vsel %vm251_vm6, %v250_v43, %v227_v36  ;;  %v570_v43 = vld [vmem:[%s761_s3] ss:$0 sm:$0xff] }
  0x93   : > { %v262_v46 = vsel %vm257_vm7, %v256_v44, %v227_v36 }
  0x94   : > { %591 = vmatmul.mubr.msk.f32.gmra.mxu0 %vm265_vm8, %v260_v45  ;;  %597 = vmatmul.mubr.msk.f32.gmra.mxu1 %vm265_vm8, %v262_v46 }
 0x14c   : > { %v351_v47 = vpop.f32.mrf.mxu0 }
 0x14d   : > { %v376_v54 = vsel %vm375_vm9, %v351_v47, 0.0 }
 0x14e   : > { %v586_v48 = vpop.f32.mrf.mxu0 }
 0x14f   : > { %v366_v49 = vpop.f32.mrf.mxu1 }
 0x150   : > { %v356_v50 = vpop.f32.mrf.mxu0  ;;  %v381_v62 = vsel %vm375_vm9, %v366_v49, 0.0 }
 0x151   : > { %v377_v51 = vsel %vm375_vm9, %v356_v50, 0.0  ;;  %v595_v52 = vpop.f32.mrf.mxu1 }
 0x152   : > { %v589_v53 = vpop.f32.mrf.mxu0  ;;  %v378_v55 = vadd.f32 %v377_v51, %v376_v54 }
 0x154   : > { %v361_v56 = vpop.f32.mrf.mxu0  ;;  %v371_v57 = vpop.f32.mrf.mxu1 }
 0x155   : > { %v379_v58 = vsel %vm375_vm9, %v361_v56, 0.0  ;;  %v384_v0 = vsel %vm383_vm10, %v371_v57, 0.0 }
 0x156   : > { %v380_v59 = vadd.f32 %v379_v58, %v378_v55  ;;  %v592_v60 = vpop.f32.mrf.mxu0  ;;  %v598_v61 = vpop.f32.mrf.mxu1 }
 0x158   : > { %v382_v63 = vadd.f32 %v381_v62, %v380_v59 }
 0x15a   : > { %v385_v1 = vadd.f32 %v384_v0, %v382_v63 }
 0x15c   : > { %v386_v2 = vrot.slane %v385_v1, 4 }
 0x15e   : > { %v387_v3 = vadd.f32 %v386_v2, %v385_v1 }
 0x160   : > { %v388_v4 = vrot.slane %v387_v3, 2 }
 0x162   : > { %v389_v5 = vadd.f32 %v388_v4, %v387_v3 }
 0x164   : > { %v390_v6 = vrot.slane %v389_v5, 1 }
 0x166   : > { %v391_v7 = vadd.f32 %v390_v6, %v389_v5 }
 0x168   : > { %v393_v8 = vmul.f32 0.030303031, %v391_v7 }
 0x16a   : > { %v394_v9 = vsub.f32 %v351_v47, %v393_v8  ;;  %v395_v10 = vsub.f32 %v356_v50, %v393_v8  ;;  %v396_v11 = vsub.f32 %v361_v56, %v393_v8  ;;  %v397_v12 = vsub.f32 %v366_v49, %v393_v8 }
 0x16b   : > { %v398_v13 = vsub.f32 %v371_v57, %v393_v8 }
 0x16c   : > { %v399_v14 = vmul.f32 %v394_v9, %v394_v9  ;;  %v400_v15 = vmul.f32 %v395_v10, %v395_v10  ;;  %v401_v16 = vmul.f32 %v396_v11, %v396_v11  ;;  %v402_v17 = vmul.f32 %v397_v12, %v397_v12 }
 0x16d   : > { %v403_v21 = vmul.f32 %v398_v13, %v398_v13 }
 0x16e   : > { %v404_v18 = vsel %vm375_vm9, %v399_v14, 0.0  ;;  %v405_v19 = vsel %vm375_vm9, %v400_v15, 0.0  ;;  %v407_v22 = vsel %vm375_vm9, %v401_v16, 0.0  ;;  %v409_v24 = vsel %vm375_vm9, %v402_v17, 0.0 }
 0x16f   : > { %v406_v20 = vadd.f32 %v405_v19, %v404_v18  ;;  %v411_v26 = vsel %vm383_vm10, %v403_v21, 0.0 }
 0x171   : > { %v408_v23 = vadd.f32 %v407_v22, %v406_v20 }
 0x173   : > { %v410_v25 = vadd.f32 %v409_v24, %v408_v23 }
 0x175   : > { %v412_v27 = vadd.f32 %v411_v26, %v410_v25 }
 0x177   : > { %v413_v28 = vrot.slane %v412_v27, 4 }
 0x179   : > { %v414_v29 = vadd.f32 %v413_v28, %v412_v27 }
 0x17b   : > { %v415_v30 = vrot.slane %v414_v29, 2 }
 0x17d   : > { %v416_v31 = vadd.f32 %v415_v30, %v414_v29 }
 0x17f   : > { %v417_v32 = vrot.slane %v416_v31, 1 }
 0x181   : > { %v418_v33 = vadd.f32 %v417_v32, %v416_v31 }
 0x183   : > { %v419_v34 = vmul.f32 0.030303031, %v418_v33 }
 0x185   : > { %v420_v35 = vadd.f32 1e-05, %v419_v34 }
 0x187   : > { %615 = vrsqrt.f32 %v420_v35 }
 0x194   : > { %v616_v36 = vpop.eup %615 }
 0x195   : > { %v422_v38 = vmul.f32 %v616_v36, %v394_v9  ;;  %v423_v39 = vmul.f32 %v616_v36, %v395_v10  ;;  %v424_v40 = vmul.f32 %v616_v36, %v396_v11  ;;  %v425_v41 = vmul.f32 %v616_v36, %v397_v12 }
 0x196   : > { %v426_v42 = vmul.f32 %v616_v36, %v398_v13 }
 0x197   : > { %v434_v44 = vmul.f32 %v569_v37, %v422_v38  ;;  %v435_v45 = vmul.f32 %v569_v37, %v423_v39  ;;  %v436_v46 = vmul.f32 %v569_v37, %v424_v40  ;;  %v437_v47 = vmul.f32 %v569_v37, %v425_v41 }
 0x198   : > { %v438_v48 = vmul.f32 %v569_v37, %v426_v42 }
 0x199   : > { %v446_v49 = vadd.f32 %v570_v43, %v434_v44  ;;  %v447_v50 = vadd.f32 %v570_v43, %v435_v45  ;;  %v448_v51 = vadd.f32 %v570_v43, %v436_v46  ;;  %v449_v52 = vadd.f32 %v570_v43, %v437_v47 }
 0x19a   : > { %v450_v53 = vadd.f32 %v570_v43, %v438_v48 }
 0x19b   : > { %v451_v54 = vmul.f32 %v446_v49, %v446_v49  ;;  %v452_v55 = vmul.f32 %v447_v50, %v447_v50  ;;  %v453_v56 = vmul.f32 %v448_v51, %v448_v51  ;;  %v454_v57 = vmul.f32 %v449_v52, %v449_v52 }
 0x19c   : > { %v455_v58 = vmul.f32 %v450_v53, %v450_v53 }
 0x19d   : > { %v456_v59 = vmul.f32 %v451_v54, %v446_v49  ;;  %v457_v60 = vmul.f32 %v452_v55, %v447_v50  ;;  %v458_v61 = vmul.f32 %v453_v56, %v448_v51  ;;  %v459_v62 = vmul.f32 %v454_v57, %v449_v52 }
 0x19e   : > { %v460_v63 = vmul.f32 %v455_v58, %v450_v53 }
 0x19f   : > { %v461_v0 = vmul.f32 0.044715, %v456_v59  ;;  %v462_v1 = vmul.f32 0.044715, %v457_v60  ;;  %v463_v2 = vmul.f32 0.044715, %v458_v61 }
 0x1a0   : > { %v464_v3 = vmul.f32 0.044715, %v459_v62  ;;  %v465_v4 = vmul.f32 0.044715, %v460_v63 }
 0x1a1   : > { %v466_v5 = vadd.f32 %v461_v0, %v446_v49  ;;  %v467_v6 = vadd.f32 %v462_v1, %v447_v50  ;;  %v468_v7 = vadd.f32 %v463_v2, %v448_v51 }
 0x1a2   : > { %v469_v8 = vadd.f32 %v464_v3, %v449_v52  ;;  %v470_v9 = vadd.f32 %v465_v4, %v450_v53 }
 0x1a3   : > { %v471_v10 = vmul.f32 0.7978846, %v466_v5  ;;  %v472_v11 = vmul.f32 0.7978846, %v467_v6  ;;  %v473_v12 = vmul.f32 0.7978846, %v468_v7 }
 0x1a4   : > { %v474_v13 = vmul.f32 0.7978846, %v469_v8  ;;  %v475_v14 = vmul.f32 0.7978846, %v470_v9 }
 0x1a5   : > { %617 = vtanh.f32 %v471_v10 }
 0x1a6   : > { %619 = vtanh.f32 %v472_v11 }
 0x1a7   : > { %621 = vtanh.f32 %v473_v12 }
 0x1a8   : > { %623 = vtanh.f32 %v474_v13 }
 0x1a9   : > { %625 = vtanh.f32 %v475_v14 }
 0x1b2   : > { %v618_v15 = vpop.eup %617 }
 0x1b3   : > { %v620_v16 = vpop.eup %619  ;;  %v481_v17 = vadd.f32 1.0, %v618_v15 }
 0x1b4   : > { %v622_v18 = vpop.eup %621  ;;  %v482_v19 = vadd.f32 1.0, %v620_v16 }
 0x1b5   : > { %v624_v20 = vpop.eup %623  ;;  %v483_v21 = vadd.f32 1.0, %v622_v18  ;;  %v486_v22 = vmul.f32 0.5, %v481_v17 }
 0x1b6   : > { %v626_v23 = vpop.eup %625  ;;  %v484_v24 = vadd.f32 1.0, %v624_v20  ;;  %v487_v25 = vmul.f32 0.5, %v482_v19 }
 0x1b7   : > { %v485_v26 = vadd.f32 1.0, %v626_v23  ;;  %v488_v27 = vmul.f32 0.5, %v483_v21  ;;  %v491_v28 = vmul.f32 %v486_v22, %v446_v49 }
 0x1b8   : > { %v489_v29 = vmul.f32 0.5, %v484_v24  ;;  %v492_v30 = vmul.f32 %v487_v25, %v447_v50 }
 0x1b9   : > { %v490_v31 = vmul.f32 0.5, %v485_v26  ;;  %v493_v32 = vmul.f32 %v488_v27, %v448_v51  ;;  %496 = vst.msk [vmem:[%s197_s6] sm:$0xff] %vm375_vm9, %v491_v28 }
 0x1ba   : > { %v494_v33 = vmul.f32 %v489_v29, %v449_v52  ;;  %497 = vst.msk [vmem:[%s197_s6 + $0x8] sm:$0xff] %vm375_vm9, %v492_v30 }
 0x1bb   : > { %v495_v34 = vmul.f32 %v490_v31, %v450_v53  ;;  %498 = vst.msk [vmem:[%s197_s6 + $0x10] sm:$0xff] %vm375_vm9, %v493_v32 }
 0x1bc   : > { %499 = vst.msk [vmem:[%s197_s6 + $0x18] sm:$0xff] %vm375_vm9, %v494_v33 }
 0x1bd   : > { %500 = vst.msk [vmem:[%s197_s6 + $0x20] sm:$0x1] %vm383_vm10, %v495_v34 }
 0x1be PF: > { %s14_s15 = sadd.s32 1, %s633_s15  }
 0x1bf   : > { %p11_p4 = scmp.ge.s32.totalorder %s14_s15, 4  }
 0x1c1   :  { %13 = sbr.rel (!%p11_p4) target bundleno = 1 (0x1), region = 66 }

// kernel: classifier_forward.7
= control target key start
LH: loop header
LB: loop body
LE: loop exit
PB: predicated region body
PF: predicated region fallthrough
CT: control target
= control target key end

     0   :  { %vm25_vm0 = vcmask 261120   ;;  %s301_s0 = inlined_call_operand.vmem [shape: f32[32,32], index: 0, kind: input, shape index: {}]   ;;  %s302_s3 = inlined_call_operand.vmem [shape: bf16[32,32], index: 3, kind: input, shape index: {}]   ;;  %s303_s1 = inlined_call_operand.vmem [shape: f32[1,32], index: 1, kind: input, shape index: {}]   ;;  %s304_s2 = inlined_call_operand.vmem [shape: f32[1,32], index: 2, kind: input, shape index: {}]   ;;  %s305_s4 = inlined_call_operand.vmem [shape: f32[1,32], index: 4, kind: input, shape index: {}]   ;;  %s306_s5 = inlined_call_operand.vmem [shape: f32[32,32], index: 5, kind: output, shape index: {}]  }
   0x1   :  { %v21_v0 = vld [vmem:[%s301_s0] sm:$0xff]  ;;  %v23_v1 = vld [vmem:[%s301_s0 + $0x10] sm:$0xff]  ;;  %v22_v2 = vld [vmem:[%s301_s0 + $0x8] sm:$0xff] }
   0x2   :  { %v26_v3 = vsel %vm25_vm0, %v21_v0, 0.0  ;;  %v32_v4 = vsel %vm25_vm0, %v23_v1, 0.0  ;;  %v24_v5 = vld [vmem:[%s301_s0 + $0x18] sm:$0xff]  ;;  %v29_v6 = vsel %vm25_vm0, %v22_v2, 0.0  ;;  %v208_v28 = vld [vmem:[%s302_s3 + $0x8] sm:$0xff]   ;;  %v209_v29 = vld [vmem:[%s302_s3] sm:$0xff]  }
   0x3   :  { %27 = vadd.xlane.f32.xlu0 %v26_v3  ;;  %33 = vadd.xlane.f32.xlu1 %v32_v4  ;;  %v35_v7 = vsel %vm25_vm0, %v24_v5, 0.0  ;;  %v189_v44 = vld [vmem:[%s303_s1] ss:$0 sm:$0xff] }
   0x4   :  { %200 = vmatprep.subr.bf16.mxu0 %v208_v28  ;;  %v190_v49 = vld [vmem:[%s304_s2] ss:$0 sm:$0xff] }
   0x5   :  { %201 = vmatpush3.bf16.msra.mxu0 %v208_v28  ;;  %v191_v62 = vld [vmem:[%s305_s4] ss:$0 sm:$0xff] }
   0x6   :  { %202 = vmatprep.subr.bf16.mxu0 %v209_v29 }
   0x7   :  { %30 = vadd.xlane.f32.xlu0 %v29_v6  ;;  %36 = vadd.xlane.f32.xlu1 %v35_v7 }
   0x9   :  { %203 = vmatpush3.bf16.msra.mxu0 %v209_v29 }
  0x8c   :  { %v28_v8 = vpop.xlane.xlu0 %27  ;;  %v34_v9 = vpop.xlane.xlu1 %33 }
  0x8d   :  { %v39_v10 = vmul.f32 0.03125, %v28_v8  ;;  %v41_v11 = vmul.f32 0.03125, %v34_v9 }
  0x8f   :  { %v43_v12 = vsub.f32 %v21_v0, %v39_v10  ;;  %v45_v13 = vsub.f32 %v23_v1, %v41_v11 }
  0x90   :  { %v31_v14 = vpop.xlane.xlu0 %30  ;;  %v37_v15 = vpop.xlane.xlu1 %36 }
  0x91   :  { %v40_v16 = vmul.f32 0.03125, %v31_v14  ;;  %v42_v17 = vmul.f32 0.03125, %v37_v15  ;;  %v47_v18 = vmul.f32 %v43_v12, %v43_v12  ;;  %v49_v19 = vmul.f32 %v45_v13, %v45_v13 }
  0x93   :  { %v44_v20 = vsub.f32 %v22_v2, %v40_v16  ;;  %v46_v21 = vsub.f32 %v24_v5, %v42_v17  ;;  %v51_v22 = vsel %vm25_vm0, %v47_v18, 0.0  ;;  %v57_v23 = vsel %vm25_vm0, %v49_v19, 0.0 }
  0x94   :  { %52 = vadd.xlane.f32.xlu0 %v51_v22 }
  0x95   :  { %v48_v24 = vmul.f32 %v44_v20, %v44_v20  ;;  %v50_v25 = vmul.f32 %v46_v21, %v46_v21 }
  0x97   :  { %v54_v26 = vsel %vm25_vm0, %v48_v24, 0.0  ;;  %v60_v27 = vsel %vm25_vm0, %v50_v25, 0.0 }
  0x98   :  { %58 = vadd.xlane.f32.xlu0 %v57_v23  ;;  %55 = vadd.xlane.f32.xlu1 %v54_v26 }
  0x9c   :  { %61 = vadd.xlane.f32.xlu1 %v60_v27 }
 0x11d   :  { %v53_v30 = vpop.xlane.xlu0 %52 }
 0x11e   :  { %v63_v31 = vmul.f32 0.03125, %v53_v30 }
 0x120   :  { %v67_v32 = vadd.f32 1e-05, %v63_v31 }
 0x121   :  { %v56_v33 = vpop.xlane.xlu1 %55  ;;  %v59_v34 = vpop.xlane.xlu0 %58 }
 0x122   :  { %210 = vrsqrt.f32 %v67_v32  ;;  %v64_v35 = vmul.f32 0.03125, %v56_v33  ;;  %v65_v36 = vmul.f32 0.03125, %v59_v34 }
 0x124   :  { %v68_v37 = vadd.f32 1e-05, %v64_v35  ;;  %v69_v38 = vadd.f32 1e-05, %v65_v36 }
 0x125   :  { %v62_v39 = vpop.xlane.xlu1 %61 }
 0x126   :  { %212 = vrsqrt.f32 %v68_v37  ;;  %v66_v40 = vmul.f32 0.03125, %v62_v39 }
 0x127   :  { %214 = vrsqrt.f32 %v69_v38 }
 0x128   :  { %v70_v41 = vadd.f32 1e-05, %v66_v40 }
 0x12a   :  { %216 = vrsqrt.f32 %v70_v41 }
 0x12f   :  { %v211_v42 = vpop.eup %210 }
 0x130   :  { %v75_v43 = vmul.f32 %v211_v42, %v43_v12 }
 0x132   :  { %v86_v48 = vmul.f32 %v189_v44, %v75_v43 }
 0x133   :  { %v213_v45 = vpop.eup %212 }
 0x134   :  { %v215_v46 = vpop.eup %214  ;;  %v76_v47 = vmul.f32 %v213_v45, %v44_v20  ;;  %v97_v53 = vadd.f32 %v190_v49, %v86_v48 }
 0x135   :  { %v77_v50 = vmul.f32 %v215_v46, %v45_v13 }
 0x136   :  { %v87_v51 = vmul.f32 %v189_v44, %v76_v47 }
 0x137   :  { %v217_v52 = vpop.eup %216  ;;  %v88_v56 = vmul.f32 %v189_v44, %v77_v50 }
 0x138   :  { %v98_v54 = vadd.f32 %v190_v49, %v87_v51  ;;  %v78_v55 = vmul.f32 %v217_v52, %v46_v21 }
 0x139   :  { %v99_v59 = vadd.f32 %v190_v49, %v88_v56 }
 0x13a   :  { %v101_v57 = vpack.c.bf16 %v98_v54, %v97_v53  ;;  %v89_v58 = vmul.f32 %v189_v44, %v78_v55 }
 0x13c   :  { %204 = vmatprep.mubr.msk.bf16.mxu0 %vm25_vm0, %v101_v57  ;;  %v100_v60 = vadd.f32 %v190_v49, %v89_v58 }
 0x13e   :  { %v102_v61 = vpack.c.bf16 %v100_v60, %v99_v59 }
 0x140   :  { %205 = vmatmul.mubr.msk.bf16.vlgmr.msra.gmra.mxu0 %vm25_vm0, %v102_v61 }
 0x200   :  { %v206_v63 = vpop.f32.mrf.mxu0 }
 0x201   :  { %v175_v0 = vadd.f32 %v206_v63, %v191_v62 }
 0x202   :  { %v166_v1 = vpop.f32.mrf.mxu0 }
 0x203   :  { %183 = vst.msk [vmem:[%s306_s5 + $0x10] sm:$0xff] %vm25_vm0, %v175_v0  ;;  %v167_v2 = vadd.f32 %v191_v62, %v166_v1 }
 0x204   :  { %v207_v3 = vpop.f32.mrf.mxu0 }
 0x205   :  { %181 = vst.msk [vmem:[%s306_s5] sm:$0xff] %vm25_vm0, %v167_v2  ;;  %v178_v4 = vadd.f32 %v207_v3, %v191_v62 }
 0x206   :  { %v169_v5 = vpop.f32.mrf.mxu0 }
 0x207   :  { %184 = vst.msk [vmem:[%s306_s5 + $0x18] sm:$0xff] %vm25_vm0, %v178_v4  ;;  %v170_v6 = vadd.f32 %v191_v62, %v169_v5 }
 0x209   :  { %182 = vst.msk [vmem:[%s306_s5 + $0x8] sm:$0xff] %vm25_vm0, %v170_v6 }

// kernel: classifier_forward.8
= control target key start
LH: loop header
LB: loop body
LE: loop exit
PB: predicated region body
PF: predicated region fallthrough
CT: control target
= control target key end

     0   :  { %s796_s21 = smov 0   ;;  %s899_s0 = inlined_call_operand.vmem [shape: f32[2,18,32], index: 0, kind: input, shape index: {}]   ;;  %s900_s1 = inlined_call_operand.vmem [shape: f32[2,16,32], index: 1, kind: input, shape index: {}]   ;;  %s901_s2 = inlined_call_operand.vmem [shape: f32[2,48,16], index: 2, kind: input, shape index: {}]   ;;  %s902_s3 = inlined_call_operand.vmem [shape: f32[1,32], index: 3, kind: input, shape index: {}]   ;;  %s903_s4 = inlined_call_operand.vmem [shape: f32[1,32], index: 4, kind: input, shape index: {}]   ;;  %s904_s5 = inlined_call_operand.vmem [shape: f32[1,32], index: 5, kind: input, shape index: {}]   ;;  %s905_s6 = inlined_call_operand.vmem [shape: f32[2,16,32], index: 6, kind: output, shape index: {}]  }
   0x1 LB: > { %s657_s22 = sadd.s32 4294967295, %s756_s21   ;;  %p661_p0 = scmp.ge.s32.totalorder %s756_s21, 1  ;;  %s756_s21 = sphi %s796_s21, %s16_s21  }
   0x2   : > { %p222_p1 = scmp.lt.s32.totalorder %s756_s21, 3 }
   0x4   : > { %p223_p2 = pnand %p661_p0, %p222_p1 }
   0x5   : > { %p257_p3 = scmp.lt.s32.totalorder (!%p223_p2), %s657_s22, 1  ;;  %s758_s19 = smov (!%p223_p2), 112  }
   0x6   : > { %226 = sbr.rel (%p223_p2) target bundleno = 798 (0x31e), region = 44  ;;  %s759_s26 = smov (!%p223_p2), 16  }
   0x7   : > { %s760_s7 = smov (!%p223_p2), 32  }
   0xb   : > { %v674_v0 = vld [vmem:[%s901_s2 + $0x58] sm:$0xff]  ;;  %v673_v1 = vld [vmem:[%s901_s2 + $0x50] sm:$0xff]  ;;  %s907_s22 = smov (!%p257_p3, %s657_s22), 1  ;;  %v672_v2 = vld [vmem:[%s901_s2 + $0x48] sm:$0xff]  ;;  %vm292_vm0 = vcmask 1045504   ;;  %vm280_vm1 = vcmask 1046528  }
   0xc   : > { %715 = vmatprep.subr.mxu1 %v674_v0  ;;  %v315_v3 = vld [vmem:[%s901_s2 + $0x28] sm:$0xff]  ;;  %v314_v4 = vld [vmem:[%s901_s2 + $0x20] sm:$0xff]  ;;  %s730_s9 = smul.u32 24, %s907_s22  ;;  %v670_v6 = vld [vmem:[%s901_s2 + $0x38] sm:$0xff]  ;;  %vm304_vm2 = vcmask 130048   ;;  %vm307_vm3 = vcmask 261120  }
   0xd   : > { %716 = vmatpush3.msra.mxu1 %v674_v0  ;;  %v671_v5 = vld [vmem:[%s901_s2 + $0x40] sm:$0xff]  ;;  %700 = vmatprep.subr.mxu0 %v315_v3  ;;  %v313_v7 = vld [vmem:[%s901_s2 + $0x18] sm:$0xff]  ;;  %v669_v14 = vld [vmem:[%s901_s2 + $0x30] sm:$0xff]  ;;  %vm316_vm4 = vcmask 392192   ;;  %s682_s10 = sshll.u32 %s907_s22, 4 }
   0xe   : > { %717 = vmatprep.subr.mxu1 %v673_v1  ;;  %701 = vmatpush3.msra.mxu0 %v315_v3  ;;  %s261_s14 = scalar_lea.vmem %s899_s0, %s730_s9  ;;  %v312_v18 = vld [vmem:[%s901_s2 + $0x10] sm:$0xff]  ;;  %v311_v21 = vld [vmem:[%s901_s2 + $0x8] sm:$0xff]  ;;  %v310_v23 = vld [vmem:[%s901_s2] sm:$0xff]  ;;  %s266_s13 = scalar_lea.vmem %s900_s1, %s682_s10 }
   0xf   : > { %718 = vmatpush3.msra.mxu1 %v673_v1  ;;  %702 = vmatprep.subr.mxu0 %v314_v4  ;;  %v274_v8 = vld [vmem:[%s261_s14] sm:$0xff]  ;;  %v275_v9 = vld [vmem:[%s261_s14 + $0x8] sm:$0xff]  ;;  %v276_v10 = vld [vmem:[%s261_s14 + $0x10] sm:$0x3]  ;;  %s271_s20 = scalar_lea.vmem %s905_s6, %s682_s10 }
  0x10   : > { %719 = vmatprep.subr.mxu1 %v672_v2  ;;  %703 = vmatpush3.msra.mxu0 %v314_v4  ;;  %v293_v11 = vrot.slane %v274_v8, 2  ;;  %v294_v12 = vrot.slane %v275_v9, 2  ;;  %v296_v13 = vrot.slane %v276_v10, 2  ;;  %v281_v15 = vrot.slane %v274_v8, 1  ;;  %v677_v44 = vld [vmem:[%s902_s3] ss:$0 sm:$0xff] }
  0x11   : > { %720 = vmatpush3.msra.mxu1 %v672_v2  ;;  %398 = vrot.lane.b32.xlu0 %v274_v8, %s758_s19  ;;  %v282_v16 = vrot.slane %v275_v9, 1  ;;  %v284_v20 = vrot.slane %v276_v10, 1  ;;  %v273_v3 = vld [vmem:[%s266_s13 + $0x8] sm:$0xff] }
  0x12   : > { %721 = vmatprep.subr.mxu1 %v671_v5  ;;  %704 = vmatprep.subr.mxu0 %v313_v7  ;;  %v295_v17 = vsel %vm292_vm0, %v293_v11, %v294_v12  ;;  %v297_v19 = vsel %vm292_vm0, %v294_v12, %v296_v13 }
  0x13   : > { %722 = vmatpush3.msra.mxu1 %v671_v5  ;;  %705 = vmatpush3.msra.mxu0 %v313_v7  ;;  %v283_v22 = vsel %vm280_vm1, %v281_v15, %v282_v16  ;;  %v285_v24 = vsel %vm280_vm1, %v282_v16, %v284_v20 }
  0x14   : > { %723 = vmatprep.subr.mxu1 %v670_v6  ;;  %406 = vrot.lane.b32.xlu1 %v295_v17, %s759_s26 }
  0x15   : > { %724 = vmatpush3.msra.mxu1 %v670_v6  ;;  %400 = vrot.lane.b32.xlu0 %v275_v9, %s758_s19  ;;  %v272_v6 = vld [vmem:[%s266_s13] sm:$0xff] }
  0x16   : > { %725 = vmatprep.subr.mxu1 %v669_v14  ;;  %706 = vmatprep.subr.mxu0 %v312_v18 }
  0x17   : > { %726 = vmatpush3.msra.mxu1 %v669_v14  ;;  %707 = vmatpush3.msra.mxu0 %v312_v18 }
  0x18   : > { %408 = vrot.lane.b32.xlu1 %v297_v19, %s759_s26  ;;  %708 = vmatprep.subr.mxu0 %v311_v21 }
  0x19   : > { %286 = vrot.lane.b32.xlu0 %v283_v22, %s759_s26  ;;  %709 = vmatpush3.msra.mxu0 %v311_v21 }
  0x1a   : > { %710 = vmatprep.subr.mxu0 %v310_v23 }
  0x1b   : > { %711 = vmatpush3.msra.mxu0 %v310_v23 }
  0x1c   : > { %288 = vrot.lane.b32.xlu1 %v285_v24, %s759_s26 }
  0x1d   : > { %298 = vrot.lane.b32.xlu0 %v295_v17, %s760_s7 }
  0x20   : > { %300 = vrot.lane.b32.xlu1 %v297_v19, %s760_s7 }
  0x83   : > { %v399_v25 = vpop.permute.xlu0 %398 }
  0x84   : > { %v412_v26 = vsel %vm304_vm2, %v399_v25, %v283_v22 }
  0x86   : > { %v407_v27 = vpop.permute.xlu1 %406 }
  0x87   : > { %v414_v28 = vsel %vm307_vm3, %v412_v26, %v407_v27  ;;  %v401_v29 = vpop.permute.xlu0 %400 }
  0x88   : > { %727 = vmatprep.mubr.msk.f32.mxu1 %vm316_vm4, %v414_v28  ;;  %v413_v30 = vsel %vm304_vm2, %v401_v29, %v285_v24  ;;  %v678_v29 = vld [vmem:[%s903_s4] ss:$0 sm:$0xff] }
  0x8a   : > { %v409_v31 = vpop.permute.xlu1 %408 }
  0x8b   : > { %v415_v32 = vsel %vm307_vm3, %v413_v30, %v409_v31  ;;  %v287_v33 = vpop.permute.xlu0 %286  ;;  %v679_v31 = vld [vmem:[%s904_s5] ss:$0 sm:$0xff] }
  0x8c   : > { %728 = vmatmul.mubr.msk.f32.vlgmr.msra.gmra.mxu1 %vm316_vm4, %v415_v32  ;;  %v305_v34 = vsel %vm304_vm2, %v274_v8, %v287_v33 }
  0x8e   : > { %v289_v35 = vpop.permute.xlu1 %288 }
  0x8f   : > { %v299_v36 = vpop.permute.xlu0 %298  ;;  %v306_v37 = vsel %vm304_vm2, %v275_v9, %v289_v35 }
  0x90   : > { %v308_v38 = vsel %vm307_vm3, %v305_v34, %v299_v36 }
  0x91   : > { %712 = vmatprep.mubr.msk.f32.mxu0 %vm316_vm4, %v308_v38 }
  0x92   : > { %v301_v39 = vpop.permute.xlu1 %300 }
  0x93   : > { %v309_v40 = vsel %vm307_vm3, %v306_v37, %v301_v39 }
  0x94   : > { %713 = vmatmul.mubr.msk.f32.vlgmr.msra.gmra.mxu0 %vm316_vm4, %v309_v40 }
 0x14c   : > { %v729_v41 = vpop.f32.mrf.mxu1 }
 0x14d   : > { %508 = vrot.lane.b32.xlu1 %v729_v41, %s759_s26 }
 0x14e   : > { %v495_v42 = vpop.f32.mrf.mxu1 }
 0x14f   : > { %506 = vrot.lane.b32.xlu0 %v495_v42, %s759_s26 }
 0x154   : > { %v714_v43 = vpop.f32.mrf.mxu0 }
 0x156   : > { %v389_v47 = vpop.f32.mrf.mxu0 }
 0x1bf   : > { %v509_v45 = vpop.permute.xlu1 %508 }
 0x1c0   : > { %v513_v46 = vsel %vm304_vm2, %v714_v43, %v509_v45 }
 0x1c1   : > { %v522_v48 = vadd.f32 %v677_v44, %v513_v46  ;;  %v507_v49 = vpop.permute.xlu0 %506 }
 0x1c2   : > { %v512_v50 = vsel %vm304_vm2, %v389_v47, %v507_v49 }
 0x1c3   : > { %v524_v51 = vmul.f32 %v522_v48, %v522_v48  ;;  %v521_v52 = vadd.f32 %v677_v44, %v512_v50 }
 0x1c5   : > { %v526_v53 = vmul.f32 %v524_v51, %v522_v48  ;;  %v523_v54 = vmul.f32 %v521_v52, %v521_v52 }
 0x1c7   : > { %v528_v55 = vmul.f32 0.044715, %v526_v53  ;;  %v525_v56 = vmul.f32 %v523_v54, %v521_v52 }
 0x1c9   : > { %v530_v57 = vadd.f32 %v528_v55, %v522_v48  ;;  %v527_v58 = vmul.f32 0.044715, %v525_v56 }
 0x1cb   : > { %v529_v59 = vadd.f32 %v527_v58, %v521_v52  ;;  %v532_v60 = vmul.f32 0.7978846, %v530_v57 }
 0x1cd   : > { %742 = vtanh.f32 %v532_v60  ;;  %v531_v61 = vmul.f32 0.7978846, %v529_v59 }
 0x1cf   : > { %744 = vtanh.f32 %v531_v61 }
 0x1da   : > { %v743_v62 = vpop.eup %742 }
 0x1db   : > { %v536_v63 = vadd.f32 1.0, %v743_v62 }
 0x1dc   : > { %v745_v0 = vpop.eup %744 }
 0x1dd   : > { %v538_v1 = vmul.f32 0.5, %v536_v63  ;;  %v535_v2 = vadd.f32 1.0, %v745_v0 }
 0x1df   : > { %v540_v4 = vmul.f32 %v538_v1, %v522_v48  ;;  %v537_v5 = vmul.f32 0.5, %v535_v2 }
 0x1e1   : > { %v542_v7 = vadd.f32 %v540_v4, %v273_v3  ;;  %v539_v8 = vmul.f32 %v537_v5, %v521_v52 }
 0x1e3   : > { %v546_v9 = vsel %vm307_vm3, %v542_v7, 0.0  ;;  %v541_v10 = vadd.f32 %v539_v8, %v272_v6 }
 0x1e4   : > { %547 = vadd.xlane.f32.xlu1 %v546_v9 }
 0x1e5   : > { %v543_v11 = vsel %vm307_vm3, %v541_v10, 0.0 }
 0x1e6   : > { %544 = vadd.xlane.f32.xlu0 %v543_v11 }
 0x26d   : > { %v548_v12 = vpop.xlane.xlu1 %547 }
 0x26e   : > { %v551_v13 = vmul.f32 0.03125, %v548_v12 }
 0x26f   : > { %v545_v14 = vpop.xlane.xlu0 %544 }
 0x270   : > { %v550_v15 = vmul.f32 0.03125, %v545_v14  ;;  %v553_v16 = vsub.f32 %v542_v7, %v551_v13 }
 0x272   : > { %v552_v17 = vsub.f32 %v541_v10, %v550_v15  ;;  %v555_v20 = vmul.f32 %v553_v16, %v553_v16 }
 0x274   : > { %v554_v18 = vmul.f32 %v552_v17, %v552_v17  ;;  %v559_v21 = vsel %vm307_vm3, %v555_v20, 0.0 }
 0x276   : > { %v556_v19 = vsel %vm307_vm3, %v554_v18, 0.0 }
 0x277   : > { %557 = vadd.xlane.f32.xlu0 %v556_v19 }
 0x27b   : > { %560 = vadd.xlane.f32.xlu0 %v559_v21 }
 0x300   : > { %v558_v22 = vpop.xlane.xlu0 %557 }
 0x301   : > { %v562_v23 = vmul.f32 0.03125, %v558_v22 }
 0x303   : > { %v564_v24 = vadd.f32 1e-05, %v562_v23 }
 0x304   : > { %v561_v25 = vpop.xlane.xlu0 %560 }
 0x305   : > { %746 = vrsqrt.f32 %v564_v24  ;;  %v563_v26 = vmul.f32 0.03125, %v561_v25 }
 0x307   : > { %v565_v27 = vadd.f32 1e-05, %v563_v26 }
 0x309   : > { %748 = vrsqrt.f32 %v565_v27 }
 0x312   : > { %v747_v28 = vpop.eup %746 }
 0x313   : > { %v568_v30 = vmul.f32 %v747_v28, %v552_v17 }
 0x315   : > { %v577_v32 = vmul.f32 %v678_v29, %v568_v30 }
 0x316   : > { %v749_v33 = vpop.eup %748 }
 0x317   : > { %v586_v34 = vadd.f32 %v679_v31, %v577_v32  ;;  %v569_v35 = vmul.f32 %v749_v33, %v553_v16 }
 0x319   : > { %588 = vst.msk [vmem:[%s271_s20] sm:$0xff] %vm307_vm3, %v586_v34  ;;  %v578_v36 = vmul.f32 %v678_v29, %v569_v35 }
 0x31b   : > { %v587_v37 = vadd.f32 %v679_v31, %v578_v36 }
 0x31d   : > { %589 = vst.msk [vmem:[%s271_s20 + $0x8] sm:$0xff] %vm307_vm3, %v587_v37 }
 0x31e PF: > { %s16_s21 = sadd.s32 1, %s756_s21  }
 0x31f   : > { %p13_p4 = scmp.ge.s32.totalorder %s16_s21, 4  }
 0x321   :  { %15 = sbr.rel (!%p13_p4) target bundleno = 1 (0x1), region = 78 }

// kernel: classifier_forward.9
= control target key start
LH: loop header
LB: loop body
LE: loop exit
PB: predicated region body
PF: predicated region fallthrough
CT: control target
= control target key end

     0   :  { %s2710_s0 = inlined_call_operand.vmem [shape: f32[3], index: 0, kind: input, shape index: {}]   ;;  %s2711_s1 = inlined_call_operand.vmem [shape: f32[2,16,32], index: 1, kind: input, shape index: {}]   ;;  %s2712_s2 = inlined_call_operand.vmem [shape: bf16[2,32,96], index: 2, kind: input, shape index: {}]   ;;  %s2713_s3 = inlined_call_operand.vmem [shape: f32[2,1,96], index: 3, kind: input, shape index: {}]   ;;  %s2714_s4 = inlined_call_operand.vmem [shape: bf16[2,32,32], index: 4, kind: input, shape index: {}]   ;;  %s2715_s5 = inlined_call_operand.vmem [shape: f32[2,1,32], index: 5, kind: input, shape index: {}]   ;;  %s2716_s6 = inlined_call_operand.vmem [shape: f32[2,1,32], index: 6, kind: input, shape index: {}]   ;;  %s2717_s7 = inlined_call_operand.vmem [shape: f32[2,1,32], index: 7, kind: input, shape index: {}]   ;;  %s2718_s8 = inlined_call_operand.vmem [shape: bf16[2,32,64], index: 8, kind: input, shape index: {}]   ;;  %s2719_s9 = inlined_call_operand.vmem [shape: f32[2,1,64], index: 9, kind: input, shape index: {}]   ;;  %s2720_s10 = inlined_call_operand.vmem [shape: bf16[2,64,32], index: 10, kind: input, shape index: {}]   ;;  %s2721_s11 = inlined_call_operand.vmem [shape: f32[2,1,32], index: 11, kind: input, shape index: {}]   ;;  %s2722_s12 = inlined_call_operand.vmem [shape: f32[2,1,32], index: 12, kind: input, shape index: {}]   ;;  %s2723_s13 = inlined_call_operand.vmem [shape: f32[2,1,32], index: 13, kind: input, shape index: {}]   ;;  %s2724_s14 = inlined_call_operand.vmem [shape: bf16[32,32], index: 14, kind: input, shape index: {}]   ;;  %s2725_s15 = inlined_call_operand.vmem [shape: f32[1,32], index: 15, kind: input, shape index: {}]   ;;  %s2726_s16 = inlined_call_operand.vmem [shape: bf16[32,2], index: 16, kind: input, shape index: {}]   ;;  %s2727_s17 = inlined_call_operand.vmem [shape: f32[1,2], index: 17, kind: input, shape index: {}]   ;;  %s2728_s18 = inlined_call_operand.hbm [shape: f32[2,1,2], index: 18, kind: output, shape index: {}]  }
   0x1   :  { %2746 = sst [smem:[#allocation23_spill]] %s2710_s0 }
   0x2   :  { %2747 = sst [smem:[#allocation24_spill]] %s2711_s1 }
   0x3   :  { %2748 = sst [smem:[#allocation25_spill]] %s2712_s2 }
   0x4   :  { %2749 = sst [smem:[#allocation26_spill]] %s2714_s4 }
   0x5   :  { %2750 = sst [smem:[#allocation27_spill]] %s2724_s14 }
   0x6   :  { %2751 = sst [smem:[#allocation28_spill]] %s2725_s15 }
   0x7   :  { %2752 = sst [smem:[#allocation29_spill]] %s2726_s16 }
   0x8   :  { %2753 = sst [smem:[#allocation30_spill]] %s2727_s17 }
   0x9   :  { %2754 = sst [smem:[#allocation31_spill]] %s2728_s18 }
   0xa   :  { %23 = vsyncpa [#allocation6], 0 }
   0xb   :  { %24 = vsyncpa [#allocation5], 0 }
   0xc   :  { %26 = vsyncpa [#allocation5 + $0x1], 0  ;;  %s2354_s27 = smov 0   ;;  %s2356_s28 = smov 0  }
   0xd   :  { %s2358_s29 = smov 0   ;;  %s2360_s30 = smov 0  }
   0xe   :  { %s2362_s0 = smov 0   ;;  %s2364_s19 = smov 0  }
   0xf   :  { %s2366_s1 = smov 0   ;;  %s2368_s20 = smov 0  }
  0x10 LB: > { %2755 = sst [smem:[#allocation10_spill]] %s2217_s27  ;;  %s1832_s21 = sadd.s32 4294967295, %s2245_s20   ;;  %s2245_s20 = sphi %s2368_s20, %s32_s20   ;;  %s2241_s1 = sphi %s2366_s1, %s2804_s1   ;;  %s2237_s19 = sphi %s2364_s19, %s2803_s19   ;;  %s2233_s0 = sphi %s2362_s0, %s2802_s0   ;;  %s2229_s30 = sphi %s2360_s30, %s2801_s30   ;;  %s2225_s29 = sphi %s2358_s29, %s2800_s29   ;;  %s2221_s28 = sphi %s2356_s28, %s2806_s28   ;;  %s2217_s27 = sphi %s2354_s27, %s2805_s27  }
  0x11   : > { %2756 = sst [smem:[#allocation11_spill]] %s2225_s29  ;;  %s1833_s22 = sadd.s32 4294967294, %s2245_s20  }
  0x12   : > { %2757 = sst [smem:[#allocation12_spill]] %s2229_s30  ;;  %s41_s2 = sadd.s32 1, %s2237_s19 }
  0x13   : > { %2758 = sst [smem:[#allocation13_spill]] %s2233_s0  ;;  %s44_s23 = sadd.s32 1, %s2241_s1 }
  0x14   : > { %2759 = sst [smem:[#allocation14_spill]] %s2237_s19  ;;  %p42_p0 = scmp.ge.s32.totalorder %s41_s2, 2 }
  0x15   : > { %2760 = sst [smem:[#allocation15_spill]] %s2241_s1  ;;  %s494_s24 = sadd.s32 1, %s2225_s29 }
  0x16   : > { %2761 = sst [smem:[#allocation16_spill]] %s2245_s20  ;;  %p504_p1 = scmp.ne.s32.totalorder %s2225_s29, %s2221_s28 }
  0x17   : > { %p505_p2 = scmp.eq.s32.totalorder %s1832_s21, 3  ;;  %s2808_s2 = smov (%p42_p0, %s41_s2), 0 }
  0x18   : > { %2762 = sst [smem:[#allocation17_spill]] %s2808_s2  ;;  %s2810_s23 = smov (!%p42_p0, %s44_s23), %s2241_s1 }
  0x19   : > { %p2404_p3 = por %p505_p2, %p504_p1  ;;  %p510_p4 = scmp.ne.s32.totalorder %s2221_s28, %s2217_s27 }
  0x1a   : > { %p46_p5 = scmp.ge.s32.totalorder %s2810_s23, 2  ;;  %p511_p6 = scmp.eq.s32.totalorder %s1833_s22, 3 }
  0x1b   : > { %s2763_s25 = scalar_select %p2404_p3, 1, 0 }
  0x1c   : > { %p1834_p7 = scmp.ge.s32.totalorder %s2245_s20, 1  ;;  %p518_p8 = scmp.lt.s32.totalorder %s2245_s20, 5 }
  0x1d   : > { %2764 = sst [smem:[#allocation18_spill]] %s2763_s25  ;;  %s2812_s23 = smov (%p46_p5, %s2810_s23), 0 }
  0x1e   : > { %2765 = sst [smem:[#allocation19_spill]] %s2812_s23  ;;  %p2414_p9 = por %p511_p6, %p510_p4 }
  0x1f   : > { %p2418_p10 = pnand %p1834_p7, %p518_p8  ;;  %s491_s19 = ssub.s32 %s2241_s1, %s2812_s23 }
  0x20   : > { %s2766_s26 = scalar_select %p2414_p9, 1, 0 }
  0x21   : > { %p492_p11 = scmp.eq.s32.totalorder %s491_s19, 0  ;;  %p2001_p12 = pneg %p2418_p10 }
  0x22   : > { %2767 = sst [smem:[#allocation20_spill]] %s2766_s26  ;;  %p2426_p13 = scmp.eq.s32.totalorder %s1832_s21, 0 }
  0x23   : > { %s2770_s18 = sld [smem:[#allocation23_spill]] }
  0x24   : > { %s2434_s17 = scalar_select %p492_p11, %s2225_s29, %s494_s24  }
  0x25   : > { %p2002_p0 = pnand %p2426_p13, %p2001_p12 }
  0x26   : > { %2771 = sst [smem:[#allocation21_spill]] %s2434_s17 }
  0x27   : > { %p2136_p2 = pneg %p2002_p0 }
  0x29   : > { %s531_s25 = sshll.u32 %s2770_s18, 4  ;;  %s532_s25 = int_to_ptr.vmem [resolvable:$true] %s531_s25 }
  0x2a   : > { %s2134_s26 = scalar_lea.vmem %s532_s25, 16  ;;  %p2142_p6 = scmp.lt.s32.totalorder %s532_s25, %s532_s25 }
  0x2b   : > { %p2135_p1 = scmp.ne.s32.totalorder %s532_s25, %s2134_s26  ;;  %p2143_p7 = scmp.lt.s32.totalorder %s2134_s26, %s2134_s26 }
  0x2d   : > { %p2137_p4 = pnand %p2136_p2, %p2135_p1  ;;  %p2144_p8 = por %p2143_p7, %p2142_p6 }
  0x2f   : > { %p2138_p5 = pneg %p2137_p4 }
  0x31   : > { %p2145_p9 = pnand %p2144_p8, %p2138_p5 }
  0x33   : > { %2148 = shalt.err (!%p2145_p9)
}
  0x34   : > { %s2247_s19 = smov [#allocation4]   ;;  %644 = sbr.rel (%p2418_p10) target bundleno = 2965 (0xb95), region = 92 }
  0x35   : > { %2004 = dma.vmem_to_smem (!%p2002_p0), %s532_s25, 16, %s2247_s19, [#allocation6]  }
  0x39   : > { %2208 = dma.done.wait (%p2426_p13), [#allocation6], 16  }
  0x3a   : > { %2210 = vsyncadd (%p2426_p13), [#allocation6], 4294967280 }
  0x3b   : > { %650 = sfence }
  0x3c   : > { %p742_p11 = scmp.lt.s32.totalorder %s2233_s0, 1  ;;  %p747_p9 = scmp.lt.s32.totalorder %s2229_s30, 1 }
  0x3d   : > { %s2772_s25 = sld [smem:[#allocation24_spill]]  ;;  %s2776_s15 = sand.u32 1, %s2221_s28  }
  0x3e   : > { %s743_s27 = scalar_select %p742_p11, %s2233_s0, 1 }
  0x3f   : > { %s2449_s20 = scalar_select %p747_p9, %s2229_s30, 1 }
  0x40   : > { %s1886_s21 = sshll.u32 %s743_s27, 4  ;;  %s2773_s23 = sld [smem:[#allocation25_spill]] }
  0x41   : > { %s1887_s22 = sshll.u32 %s2449_s20, 4  ;;  %s2775_s4 = sld [smem:[#allocation26_spill]] }
  0x42   : > { %s2484_s29 = scalar_lea.vmem %s2718_s8, %s1887_s22  ;;  %s784_s2 = scalar_lea.vmem %s2721_s11, %s2449_s20 }
  0x43   : > { %s746_s26 = scalar_lea.vmem %s2772_s25, %s1886_s21  ;;  %s790_s19 = scalar_lea.vmem %s2723_s13, %s2449_s20 }
  0x44   : > { %s2510_s16 = scalar_lea.vmem [#allocation7], %s2776_s15  ;;  %s2777_s0 = sld [smem:[#allocation12_spill]] }
  0x46   : > { %s2458_s1 = scalar_lea.vmem %s2773_s23, %s1887_s22 }
  0x47   : > { %2774 = sst [smem:[#allocation22_spill]] %s2458_s1  ;;  %s2467_s14 = scalar_lea.vmem %s2775_s4, %s1887_s22 }
  0x48   : > { %s1890_s4 = sshll.u32 %s2449_s20, 5  ;;  %s787_s1 = scalar_lea.vmem %s2722_s12, %s2449_s20 }
  0x49   : > { %s2498_s25 = scalar_lea.vmem %s2720_s10, %s1890_s4 }
  0x4a   : > { %p1849_p10 = scmp.ne.s32.totalorder %s2777_s0, 0 }
  0x4b   : > { %s801_s30 = sld [smem:[#allocation4]] (!%p1849_p10) }
  0x4c   : > { %795 = sbr.rel (%p1849_p10) target bundleno = 85 (0x55), region = 100 }
  0x51   : > { %v796_v0 = vld [vmem:[%s746_s26] sm:$0xff]  ;;  %vm798_vm0 = vcmask 261120   ;;  %v797_v1 = vld [vmem:[%s746_s26 + $0x8] sm:$0xff]  ;;  %v802_v2 = vstv %s801_s30 }
  0x52   : > { %799 = vst.msk [vmem:[#allocation2] sm:$0xff] %vm798_vm0, %v796_v0  ;;  %800 = vst.msk [vmem:[#allocation2 + $0x8] sm:$0xff] %vm798_vm0, %v797_v1  ;;  %v803_v3 = vmul.f32 %v802_v2, %v796_v0  ;;  %v804_v4 = vmul.f32 %v802_v2, %v797_v1 }
  0x54   : > { %805 = vst.msk [vmem:[#allocation3] sm:$0xff] %vm798_vm0, %v803_v3  ;;  %806 = vst.msk [vmem:[#allocation3 + $0x8] sm:$0xff] %vm798_vm0, %v804_v4 }
  0x55 PF: > { %s2778_s4 = sld [smem:[#allocation22_spill]]  ;;  %v2248_v6 = vmov 0.0   ;;  %vm2249_vm1 = vmmov 0   ;;  %vm833_vm2 = vcmask 261120   ;;  %s2779_s27 = scalar_lea.vmem %s2713_s3, %s2449_s20  ;;  %vm885_vm3 = vcmask 130048  }
  0x56   : > { %1919 = vmatprep.subr.bf16.mxu0 %v2248_v6  ;;  %1927 = vmatprep.subr.bf16.mxu1 %v2248_v6  ;;  %v1850_v11 = vld [vmem:[%s2779_s27] ss:$0 sm:$0xff]  ;;  %s2250_s21 = smov 96   ;;  %s2251_s24 = smov 112   ;;  %vm1376_vm4 = vcmask 523264  }
  0x57   : > { %1923 = vmatprep.mubr.msk.bf16.mxu0 %vm2249_vm1, %v2248_v6  ;;  %1929 = vmatprep.mubr.msk.bf16.mxu1 %vm2249_vm1, %v2248_v6  ;;  %s2252_s18 = smov 80   ;;  %s2253_s23 = smov 48  }
  0x58   : > { %s2254_s22 = smov 64   ;;  %s2255_s17 = smov 16  }
  0x59   : > { %v2519_v8 = vld [vmem:[#allocation2] sm:$0xff]  ;;  %v2521_v9 = vld [vmem:[#allocation2 + $0x8] sm:$0xff]  ;;  %s2780_s30 = scalar_lea.vmem %s2715_s5, %s2449_s20 }
  0x5a   : > { %v809_v10 = vpack.c.bf16 %v2521_v9, %v2519_v8 }
  0x5b   : > { %v2092_v5 = vld [vmem:[%s2778_s4 + $0x8] sm:$0xff]   ;;  %v2093_v7 = vld [vmem:[%s2778_s4] sm:$0xff]  }
  0x5c   : > { %1920 = vmatpush3.bf16.msra.mxu0 %v2092_v5 }
  0x5d   : > { %1921 = vmatprep.subr.bf16.mxu0 %v2248_v6 }
  0x60   : > { %1922 = vmatpush3.bf16.msra.mxu0 %v2093_v7 }
  0x61   : > { %1933 = vmatprep.subr.bf16.mxu0 %v2248_v6 }
  0x63   : > { %1924 = vmatmul.mubr.msk.bf16.vlgmr.msra.gmra.mxu0 %vm833_vm2, %v809_v10 }
  0x64   : > { %1935 = vmatprep.mubr.msk.bf16.mxu0 %vm2249_vm1, %v2248_v6 }
 0x123   : > { %v871_v12 = vpop.f32.mrf.mxu0 }
 0x124   : > { %v872_v14 = vadd.f32 %v1850_v11, %v871_v12 }
 0x125   : > { %v1925_v13 = vpop.f32.mrf.mxu0 }
 0x126   : > { %v878_v18 = vmul.f32 0.25, %v872_v14 }
 0x127   : > { %v874_v15 = vpop.f32.mrf.mxu0 }
 0x128   : > { %v875_v16 = vadd.f32 %v1850_v11, %v874_v15 }
 0x129   : > { %v1926_v17 = vpop.f32.mrf.mxu0 }
 0x12a   : > { %v879_v19 = vmul.f32 0.25, %v875_v16  ;;  %v2537_v20 = vpack.c.bf16 %v875_v16, %v872_v14  ;;  %v2094_v14 = vld [vmem:[%s2467_s14 + $0x8] sm:$0xff]   ;;  %v2095_v17 = vld [vmem:[%s2467_s14] sm:$0xff]  }
 0x12c   : > { %883 = vrot.lane.b32.xlu0 %v2537_v20, %s2250_s21  ;;  %v880_v21 = vpack.c.bf16 %v879_v19, %v878_v18  ;;  %s2782_s21 = scalar_lea.vmem %s2717_s7, %s2449_s20 }
 0x12e   : > { %1004 = vrot.lane.b32.xlu1 %v880_v21, %s2251_s24 }
 0x130   : > { %1006 = vrot.lane.b32.xlu0 %v2537_v20, %s2252_s18 }
 0x19e   : > { %v884_v22 = vpop.permute.xlu0 %883 }
 0x19f   : > { %v890_v23 = vsel %vm885_vm3, %v884_v22, 0 }
 0x1a0   : > { %1928 = vmatpush3.bf16.xpose.msra.mxu1 %v890_v23  ;;  %v1005_v26 = vpop.permute.xlu1 %1004 }
 0x1a1   : > { %1939 = vmatprep.subr.bf16.mxu1 %v2248_v6 }
 0x1a2   : > { %v1007_v24 = vpop.permute.xlu0 %1006 }
 0x1a3   : > { %v1012_v25 = vsel %vm885_vm3, %v1007_v24, 0 }
 0x1a7   : > { %1930 = vmatmul.mubr.msk.bf16.vlgmr.msra.gmra.mxu1 %vm885_vm3, %v880_v21 }
 0x1a8   : > { %1940 = vmatpush3.bf16.xpose.msra.mxu1 %v1012_v25  ;;  %1941 = vmatprep.mubr.msk.bf16.mxu1 %vm2249_vm1, %v2248_v6 }
 0x1a9   : > { %1951 = vmatprep.subr.bf16.mxu1 %v2248_v6 }
 0x1af   : > { %1942 = vmatmul.mubr.msk.bf16.vlgmr.msra.gmra.mxu1 %vm885_vm3, %v1005_v26 }
 0x1b0   : > { %1955 = vmatprep.mubr.msk.bf16.mxu1 %vm2249_vm1, %v2248_v6  ;;  %1952 = vmatpush3.bf16.msra.mxu1 %v2094_v14 }
 0x1b1   : > { %1953 = vmatprep.subr.bf16.mxu1 %v2248_v6 }
 0x1b4   : > { %1954 = vmatpush3.bf16.msra.mxu1 %v2095_v17 }
 0x1b5   : > { %1967 = vmatprep.subr.bf16.mxu1 %v2248_v6 }
 0x267   : > { %v926_v27 = vpop.f32.mrf.mxu1 }
 0x268   : > { %v933_v28 = vsel %vm885_vm3, %v926_v27, -inf }
 0x269   : > { %934 = vmax.xlane.f32.xlu1 %v933_v28  ;;  %v1931_v29 = vpop.f32.mrf.mxu1 }
 0x26b   : > { %v929_v30 = vpop.f32.mrf.mxu1 }
 0x26c   : > { %v936_v31 = vsel %vm885_vm3, %v929_v30, -inf }
 0x26d   : > { %937 = vmax.xlane.f32.xlu0 %v936_v31  ;;  %v1932_v32 = vpop.f32.mrf.mxu1  ;;  %v1858_v31 = vld [vmem:[%s2780_s30] ss:$0 sm:$0xff] }
 0x26f   : > { %v1048_v33 = vpop.f32.mrf.mxu1 }
 0x270   : > { %v1055_v34 = vsel %vm885_vm3, %v1048_v33, -inf }
 0x271   : > { %1056 = vmax.xlane.f32.xlu0 %v1055_v34  ;;  %v1943_v35 = vpop.f32.mrf.mxu1 }
 0x273   : > { %v1051_v36 = vpop.f32.mrf.mxu1 }
 0x274   : > { %v1058_v37 = vsel %vm885_vm3, %v1051_v36, -inf }
 0x275   : > { %1059 = vmax.xlane.f32.xlu1 %v1058_v37  ;;  %v1944_v38 = vpop.f32.mrf.mxu1 }
 0x2f2   : > { %v935_v39 = vpop.xlane.xlu1 %934 }
 0x2f3   : > { %v939_v40 = vsub.f32 %v926_v27, %v935_v39 }
 0x2f5   : > { %v941_v41 = vmul.f32 1.442695, %v939_v40 }
 0x2f6   : > { %v938_v42 = vpop.xlane.xlu0 %937 }
 0x2f7   : > { %2102 = vpow2.f32 %v941_v41  ;;  %v940_v43 = vsub.f32 %v929_v30, %v938_v42 }
 0x2f9   : > { %v943_v44 = vmul.f32 1.442695, %v940_v43 }
 0x2fa   : > { %v1057_v45 = vpop.xlane.xlu0 %1056 }
 0x2fb   : > { %2104 = vpow2.f32 %v943_v44  ;;  %v1061_v46 = vsub.f32 %v1048_v33, %v1057_v45 }
 0x2fd   : > { %v1063_v47 = vmul.f32 1.442695, %v1061_v46 }
 0x2fe   : > { %v1060_v48 = vpop.xlane.xlu1 %1059 }
 0x2ff   : > { %2106 = vpow2.f32 %v1063_v47  ;;  %v1062_v49 = vsub.f32 %v1051_v36, %v1060_v48 }
 0x301   : > { %v1065_v50 = vmul.f32 1.442695, %v1062_v49 }
 0x303   : > { %2108 = vpow2.f32 %v1065_v50 }
 0x304   : > { %v2103_v51 = vpop.eup %2102 }
 0x305   : > { %v945_v52 = vsel %vm885_vm3, %v2103_v51, 0.0 }
 0x306   : > { %946 = vadd.xlane.f32.xlu0 %v945_v52 }
 0x308   : > { %v2105_v53 = vpop.eup %2104 }
 0x309   : > { %v948_v54 = vsel %vm885_vm3, %v2105_v53, 0.0 }
 0x30a   : > { %949 = vadd.xlane.f32.xlu1 %v948_v54 }
 0x30c   : > { %v2107_v55 = vpop.eup %2106 }
 0x30d   : > { %v1067_v56 = vsel %vm885_vm3, %v2107_v55, 0.0 }
 0x30e   : > { %1068 = vadd.xlane.f32.xlu0 %v1067_v56 }
 0x310   : > { %v2109_v57 = vpop.eup %2108 }
 0x311   : > { %v1070_v58 = vsel %vm885_vm3, %v2109_v57, 0.0 }
 0x312   : > { %1071 = vadd.xlane.f32.xlu1 %v1070_v58 }
 0x323   : > { %1078 = vrot.lane.b32.xlu1 %v2537_v20, %s2253_s23  ;;  %s2783_s23 = scalar_lea.vmem %s2719_s9, %s2449_s20 }
 0x324   : > { %956 = vrot.lane.b32.xlu0 %v2537_v20, %s2254_s22 }
 0x38f   : > { %v947_v59 = vpop.xlane.xlu0 %946 }
 0x390   : > { %2110 = vrcp.f32 %v947_v59 }
 0x393   : > { %v950_v60 = vpop.xlane.xlu1 %949 }
 0x394   : > { %2112 = vrcp.f32 %v950_v60 }
 0x397   : > { %v1069_v61 = vpop.xlane.xlu0 %1068 }
 0x398   : > { %2114 = vrcp.f32 %v1069_v61 }
 0x39b   : > { %v957_v62 = vpop.permute.xlu0 %956  ;;  %v1072_v63 = vpop.xlane.xlu1 %1071 }
 0x39c   : > { %2116 = vrcp.f32 %v1072_v63  ;;  %1934 = vmatpush3.bf16.msra.mxu0 %v957_v62 }
 0x39d   : > { %1945 = vmatprep.subr.bf16.mxu0 %v2248_v6  ;;  %v2111_v0 = vpop.eup %2110 }
 0x39e   : > { %v952_v2 = vmul.f32 %v2111_v0, %v2103_v51  ;;  %v2097_v51 = vld [vmem:[%s2484_s29] sm:$0xff]  }
 0x39f   : > { %v1079_v5 = vpop.permute.xlu1 %1078  ;;  %v1863_v0 = vld [vmem:[%s2782_s21] ss:$0 sm:$0xff] }
 0x3a1   : > { %v2113_v1 = vpop.eup %2112 }
 0x3a2   : > { %v954_v3 = vmul.f32 %v2113_v1, %v2105_v53 }
 0x3a4   : > { %v955_v4 = vpack.c.bf16 %v954_v3, %v952_v2 }
 0x3a5   : > { %v2115_v7 = vpop.eup %2114 }
 0x3a6   : > { %1936 = vmatmul.mubr.msk.bf16.vlgmr.msra.gmra.mxu0 %vm885_vm3, %v955_v4  ;;  %v1074_v11 = vmul.f32 %v2115_v7, %v2107_v55  ;;  %v2099_v7 = vld [vmem:[%s2498_s25 + $0x10] sm:$0xff]  }
 0x3a7   : > { %1946 = vmatpush3.bf16.msra.mxu0 %v1079_v5  ;;  %1947 = vmatprep.mubr.msk.bf16.mxu0 %vm2249_vm1, %v2248_v6  ;;  %v2098_v5 = vld [vmem:[%s2498_s25 + $0x18] sm:$0xff]  }
 0x3a8   : > { %1959 = vmatprep.subr.bf16.mxu0 %v2248_v6 }
 0x3a9   : > { %v2117_v10 = vpop.eup %2116 }
 0x3aa   : > { %v1076_v12 = vmul.f32 %v2117_v10, %v2109_v57  ;;  %v2100_v10 = vld [vmem:[%s2498_s25 + $0x8] sm:$0xff]  }
 0x3ac   : > { %v1077_v13 = vpack.c.bf16 %v1076_v12, %v1074_v11  ;;  %v2101_v11 = vld [vmem:[%s2498_s25] sm:$0xff]  }
 0x3ad   : > { %v1864_v12 = vld [vmem:[%s2783_s23] ss:$0 sm:$0xff] }
 0x3ae   : > { %1948 = vmatmul.mubr.msk.bf16.vlgmr.msra.gmra.mxu0 %vm885_vm3, %v1077_v13 }
 0x3af   : > { %1963 = vmatprep.mubr.msk.bf16.mxu0 %vm2249_vm1, %v2248_v6 }
 0x466   : > { %v996_v15 = vpop.f32.mrf.mxu0 }
 0x468   : > { %v1937_v16 = vpop.f32.mrf.mxu0 }
 0x46a   : > { %v999_v18 = vpop.f32.mrf.mxu0 }
 0x46c   : > { %v1938_v19 = vpop.f32.mrf.mxu0 }
 0x46e   : > { %v1118_v20 = vpop.f32.mrf.mxu0 }
 0x470   : > { %v1949_v21 = vpop.f32.mrf.mxu0 }
 0x472   : > { %v1121_v22 = vpop.f32.mrf.mxu0 }
 0x473   : > { %v2087_v23 = vpack.i.bf16 %v1121_v22, %v1118_v20 }
 0x474   : > { %v1950_v24 = vpop.f32.mrf.mxu0 }
 0x475   : > { %2088 = vrot.lane.b32.xlu1 %v2087_v23, %s2255_s17 }
 0x4e7   : > { %v2089_v25 = vpop.permute.xlu1 %2088 }
 0x4e8   : > { %v2091_v26 = vunpack.i.h.bf16 %v2089_v25  ;;  %v2090_v27 = vunpack.i.l.bf16 %v2089_v25 }
 0x4ea   : > { %v1134_v28 = vsel %vm885_vm3, %v999_v18, %v2091_v26  ;;  %v1133_v29 = vsel %vm885_vm3, %v996_v15, %v2090_v27 }
 0x4eb   : > { %v1135_v30 = vpack.c.bf16 %v1134_v28, %v1133_v29 }
 0x4ed   : > { %1956 = vmatmul.mubr.msk.bf16.vlgmr.msra.gmra.mxu1 %vm833_vm2, %v1135_v30 }
 0x4ee   : > { %1975 = vmatprep.mubr.msk.bf16.mxu1 %vm2249_vm1, %v2248_v6  ;;  %1968 = vmatpush3.bf16.msra.mxu1 %v2098_v5 }
 0x4ef   : > { %1969 = vmatprep.subr.bf16.mxu1 %v2248_v6 }
 0x4f2   : > { %1970 = vmatpush3.bf16.msra.mxu1 %v2099_v7 }
 0x4f3   : > { %1971 = vmatprep.subr.bf16.mxu1 %v2248_v6 }
 0x4f6   : > { %1972 = vmatpush3.bf16.msra.mxu1 %v2100_v10  ;;  %v1469_v10 = vld [vmem:[#allocation3] sm:$0xff] }
 0x4f7   : > { %1973 = vmatprep.subr.bf16.mxu1 %v2248_v6 }
 0x4fa   : > { %1974 = vmatpush3.bf16.msra.mxu1 %v2101_v11 }
 0x5ad   : > { %v1196_v32 = vpop.f32.mrf.mxu1 }
 0x5ae   : > { %v1197_v33 = vadd.f32 %v1858_v31, %v1196_v32 }
 0x5af   : > { %v1957_v34 = vpop.f32.mrf.mxu1 }
 0x5b0   : > { %v1203_v35 = vadd.f32 %v1197_v33, %v2519_v8 }
 0x5b1   : > { %v1199_v36 = vpop.f32.mrf.mxu1 }
 0x5b2   : > { %v1200_v37 = vadd.f32 %v1858_v31, %v1199_v36  ;;  %v1207_v38 = vsel %vm833_vm2, %v1203_v35, 0.0 }
 0x5b3   : > { %1208 = vadd.xlane.f32.xlu0 %v1207_v38  ;;  %v1958_v39 = vpop.f32.mrf.mxu1 }
 0x5b4   : > { %v1204_v40 = vadd.f32 %v1200_v37, %v2521_v9  ;;  %v2096_v9 = vld [vmem:[%s2484_s29 + $0x8] sm:$0xff]   ;;  %s2781_s29 = scalar_lea.vmem %s2716_s6, %s2449_s20  ;;  %v1868_v37 = vld [vmem:[%s784_s2] ss:$0 sm:$0xff]  ;;  %s2784_s2 = sld [smem:[#allocation12_spill]] }
 0x5b5   : > { %1960 = vmatpush3.bf16.msra.mxu0 %v2096_v9  ;;  %v1862_v60 = vld [vmem:[%s2781_s29] ss:$0 sm:$0xff] }
 0x5b6   : > { %v1210_v41 = vsel %vm833_vm2, %v1204_v40, 0.0  ;;  %1961 = vmatprep.subr.bf16.mxu0 %v2248_v6 }
 0x5b7   : > { %1211 = vadd.xlane.f32.xlu1 %v1210_v41 }
 0x5b9   : > { %1962 = vmatpush3.bf16.msra.mxu0 %v2097_v51 }
 0x5ba   : > { %s1471_s17 = sadd.s32 1, %s2784_s2  ;;  %p1876_p12 = scmp.ne.s32.totalorder %s2784_s2, 1 }
 0x5bb   : > { %s1472_s14 = sld [smem:[#allocation4 + %s1471_s17]] }
 0x5bc   : > { %s2787_s18 = sld [smem:[#allocation29_spill]] (!%p1876_p12) }
 0x5bd   : > { %s2788_s17 = sld [smem:[#allocation28_spill]] (!%p1876_p12) }
 0x5be   : > { %s2789_s30 = sld [smem:[#allocation30_spill]] (!%p1876_p12) }
 0x63c   : > { %v1209_v42 = vpop.xlane.xlu0 %1208 }
 0x63d   : > { %v1214_v43 = vmul.f32 0.03125, %v1209_v42 }
 0x63f   : > { %v1216_v44 = vsub.f32 %v1203_v35, %v1214_v43 }
 0x640   : > { %v1212_v45 = vpop.xlane.xlu1 %1211 }
 0x641   : > { %v1215_v46 = vmul.f32 0.03125, %v1212_v45  ;;  %v1218_v47 = vmul.f32 %v1216_v44, %v1216_v44 }
 0x643   : > { %v1217_v8 = vsub.f32 %v1204_v40, %v1215_v46  ;;  %v1220_v48 = vsel %vm833_vm2, %v1218_v47, 0.0 }
 0x644   : > { %1221 = vadd.xlane.f32.xlu0 %v1220_v48 }
 0x645   : > { %v1219_v49 = vmul.f32 %v1217_v8, %v1217_v8 }
 0x647   : > { %v1223_v50 = vsel %vm833_vm2, %v1219_v49, 0.0 }
 0x648   : > { %1224 = vadd.xlane.f32.xlu0 %v1223_v50 }
 0x6cd   : > { %v1222_v52 = vpop.xlane.xlu0 %1221 }
 0x6ce   : > { %v1226_v53 = vmul.f32 0.03125, %v1222_v52 }
 0x6d0   : > { %v1228_v54 = vadd.f32 1e-05, %v1226_v53 }
 0x6d1   : > { %v1225_v55 = vpop.xlane.xlu0 %1224 }
 0x6d2   : > { %2118 = vrsqrt.f32 %v1228_v54  ;;  %v1227_v56 = vmul.f32 0.03125, %v1225_v55 }
 0x6d4   : > { %v1229_v57 = vadd.f32 1e-05, %v1227_v56 }
 0x6d6   : > { %2120 = vrsqrt.f32 %v1229_v57 }
 0x6df   : > { %v2119_v58 = vpop.eup %2118 }
 0x6e0   : > { %v1232_v59 = vmul.f32 %v2119_v58, %v1216_v44 }
 0x6e2   : > { %v1240_v63 = vmul.f32 %v1862_v60, %v1232_v59 }
 0x6e3   : > { %v2121_v61 = vpop.eup %2120 }
 0x6e4   : > { %v1233_v62 = vmul.f32 %v2121_v61, %v1217_v8  ;;  %v1248_v2 = vadd.f32 %v1863_v0, %v1240_v63  ;;  %v1874_v63 = vld [vmem:[%s787_s1] ss:$0 sm:$0xff]  ;;  %s2785_s1 = sld [smem:[#allocation27_spill]] (!%p1876_p12) }
 0x6e6   : > { %v1241_v1 = vmul.f32 %v1862_v60, %v1233_v62 }
 0x6e8   : > { %v1249_v3 = vadd.f32 %v1863_v0, %v1241_v1  ;;  %v1875_v1 = vld [vmem:[%s790_s19] ss:$0 sm:$0xff] }
 0x6ea   : > { %v1250_v4 = vpack.c.bf16 %v1249_v3, %v1248_v2  ;;  %s2786_s26 = smov (!%p1876_p12), %s2785_s1 }
 0x6ec   : > { %1964 = vmatmul.mubr.msk.bf16.vlgmr.msra.gmra.mxu0 %vm833_vm2, %v1250_v4  ;;  %v1473_v4 = vstv %s1472_s14 }
 0x7ac   : > { %v1311_v13 = vpop.f32.mrf.mxu0 }
 0x7ad   : > { %v1312_v14 = vadd.f32 %v1864_v12, %v1311_v13 }
 0x7ae   : > { %v1965_v15 = vpop.f32.mrf.mxu0 }
 0x7af   : > { %v1318_v16 = vmul.f32 %v1312_v14, %v1312_v14  ;;  %v1470_v15 = vld [vmem:[#allocation3 + $0x8] sm:$0xff] }
 0x7b0   : > { %v1314_v17 = vpop.f32.mrf.mxu0 }
 0x7b1   : > { %v1320_v18 = vmul.f32 %v1318_v16, %v1312_v14  ;;  %v1315_v19 = vadd.f32 %v1864_v12, %v1314_v17 }
 0x7b2   : > { %v1966_v20 = vpop.f32.mrf.mxu0 }
 0x7b3   : > { %v1322_v21 = vmul.f32 0.044715, %v1320_v18  ;;  %v1319_v22 = vmul.f32 %v1315_v19, %v1315_v19 }
 0x7b5   : > { %v1324_v23 = vadd.f32 %v1322_v21, %v1312_v14  ;;  %v1321_v24 = vmul.f32 %v1319_v22, %v1315_v19 }
 0x7b7   : > { %v1326_v6 = vmul.f32 0.7978846, %v1324_v23  ;;  %v1323_v25 = vmul.f32 0.044715, %v1321_v24 }
 0x7b9   : > { %2122 = vtanh.f32 %v1326_v6  ;;  %v1325_v26 = vadd.f32 %v1323_v25, %v1315_v19 }
 0x7bb   : > { %v1327_v27 = vmul.f32 0.7978846, %v1325_v26 }
 0x7bd   : > { %2124 = vtanh.f32 %v1327_v27 }
 0x7c6   : > { %v2123_v28 = vpop.eup %2122 }
 0x7c7   : > { %v1330_v29 = vadd.f32 1.0, %v2123_v28 }
 0x7c9   : > { %v1332_v31 = vmul.f32 0.5, %v1330_v29 }
 0x7ca   : > { %v2125_v30 = vpop.eup %2124 }
 0x7cb   : > { %v1331_v32 = vadd.f32 1.0, %v2125_v30  ;;  %v1334_v34 = vmul.f32 %v1332_v31, %v1312_v14 }
 0x7cd   : > { %v1333_v33 = vmul.f32 0.5, %v1331_v32 }
 0x7cf   : > { %v1335_v35 = vmul.f32 %v1333_v33, %v1315_v19 }
 0x7d1   : > { %v1336_v36 = vpack.c.bf16 %v1335_v35, %v1334_v34 }
 0x7d3   : > { %1976 = vmatmul.mubr.msk.bf16.vlgmr.msra.gmra.mxu1 %vm1376_vm4, %v1336_v36 }
 0x893   : > { %v1414_v38 = vpop.f32.mrf.mxu1 }
 0x894   : > { %v1415_v39 = vadd.f32 %v1868_v37, %v1414_v38 }
 0x895   : > { %v1977_v40 = vpop.f32.mrf.mxu1 }
 0x896   : > { %v1421_v41 = vadd.f32 %v1415_v39, %v1248_v2 }
 0x897   : > { %v1417_v42 = vpop.f32.mrf.mxu1 }
 0x898   : > { %v1418_v43 = vadd.f32 %v1868_v37, %v1417_v42  ;;  %v1425_v44 = vsel %vm833_vm2, %v1421_v41, 0.0 }
 0x899   : > { %1426 = vadd.xlane.f32.xlu1 %v1425_v44  ;;  %v1978_v45 = vpop.f32.mrf.mxu1 }
 0x89a   : > { %v1422_v46 = vadd.f32 %v1418_v43, %v1249_v3 }
 0x89c   : > { %v1428_v47 = vsel %vm833_vm2, %v1422_v46, 0.0 }
 0x89d   : > { %1429 = vadd.xlane.f32.xlu0 %v1428_v47 }
 0x922   : > { %v1427_v8 = vpop.xlane.xlu1 %1426 }
 0x923   : > { %v1431_v48 = vmul.f32 0.03125, %v1427_v8 }
 0x925   : > { %v1433_v49 = vsub.f32 %v1421_v41, %v1431_v48 }
 0x926   : > { %v1430_v50 = vpop.xlane.xlu0 %1429 }
 0x927   : > { %v1432_v9 = vmul.f32 0.03125, %v1430_v50  ;;  %v1435_v51 = vmul.f32 %v1433_v49, %v1433_v49 }
 0x929   : > { %v1434_v52 = vsub.f32 %v1422_v46, %v1432_v9  ;;  %v1437_v53 = vsel %vm833_vm2, %v1435_v51, 0.0 }
 0x92a   : > { %1438 = vadd.xlane.f32.xlu1 %v1437_v53 }
 0x92b   : > { %v1436_v54 = vmul.f32 %v1434_v52, %v1434_v52 }
 0x92d   : > { %v1440_v55 = vsel %vm833_vm2, %v1436_v54, 0.0 }
 0x92e   : > { %1441 = vadd.xlane.f32.xlu0 %v1440_v55 }
 0x9b3   : > { %v1439_v56 = vpop.xlane.xlu1 %1438 }
 0x9b4   : > { %v1443_v57 = vmul.f32 0.03125, %v1439_v56 }
 0x9b6   : > { %v1445_v58 = vadd.f32 1e-05, %v1443_v57 }
 0x9b7   : > { %v1442_v59 = vpop.xlane.xlu0 %1441 }
 0x9b8   : > { %2126 = vrsqrt.f32 %v1445_v58  ;;  %v1444_v60 = vmul.f32 0.03125, %v1442_v59 }
 0x9ba   : > { %v1446_v61 = vadd.f32 1e-05, %v1444_v60 }
 0x9bc   : > { %2128 = vrsqrt.f32 %v1446_v61 }
 0x9c5   : > { %v2127_v62 = vpop.eup %2126 }
 0x9c6   : > { %v1449_v0 = vmul.f32 %v2127_v62, %v1433_v49 }
 0x9c8   : > { %v1457_v2 = vmul.f32 %v1874_v63, %v1449_v0 }
 0x9c9   : > { %v2129_v3 = vpop.eup %2128 }
 0x9ca   : > { %v1465_v5 = vadd.f32 %v1875_v1, %v1457_v2  ;;  %v1450_v7 = vmul.f32 %v2129_v3, %v1434_v52 }
 0x9cc   : > { %1467 = vst.msk [vmem:[#allocation2] sm:$0xff] %vm833_vm2, %v1465_v5  ;;  %v1474_v11 = vmul.f32 %v1473_v4, %v1465_v5  ;;  %v1458_v12 = vmul.f32 %v1874_v63, %v1450_v7 }
 0x9ce   : > { %v1476_v13 = vadd.f32 %v1474_v11, %v1469_v10  ;;  %v1466_v14 = vadd.f32 %v1875_v1, %v1458_v12 }
 0x9d0   : > { %1478 = vst.msk [vmem:[#allocation3] sm:$0xff] %vm833_vm2, %v1476_v13  ;;  %1468 = vst.msk [vmem:[#allocation2 + $0x8] sm:$0xff] %vm833_vm2, %v1466_v14  ;;  %v1475_v16 = vmul.f32 %v1473_v4, %v1466_v14  ;;  %1483 = sbr.rel (%p1876_p12) target bundleno = 2939 (0xb7b), region = 104 }
 0x9d2   : > { %v1477_v17 = vadd.f32 %v1475_v16, %v1470_v15 }
 0x9d4   : > { %1479 = vst.msk [vmem:[#allocation3 + $0x8] sm:$0xff] %vm833_vm2, %v1477_v17 }
 0x9d5   : > { %v2130_v18 = vld [vmem:[%s2785_s1 + $0x8] sm:$0xff]   ;;  %v2256_v19 = vmov 0.0   ;;  %v2131_v20 = vld [vmem:[%s2786_s26] sm:$0xff]   ;;  %vm2257_vm5 = vmmov 0   ;;  %vm1619_vm6 = vcmask 8192  }
 0x9d6   : > { %1979 = vmatprep.subr.bf16.mxu0 %v2256_v19  ;;  %1987 = vmatprep.subr.bf16.mxu1 %v2256_v19  ;;  %v2132_v6 = vld [vmem:[%s2787_s18 + $0x8] sm:$0xff]   ;;  %v2133_v34 = vld [vmem:[%s2787_s18] sm:$0xff]  }
 0x9d7   : > { %1980 = vmatpush3.bf16.msra.mxu0 %v2130_v18  ;;  %1983 = vmatprep.mubr.msk.bf16.mxu0 %vm2257_vm5, %v2256_v19  ;;  %v1484_v21 = vld [vmem:[#allocation3] sm:$0xff]  ;;  %v1502_v35 = vld [vmem:[%s2788_s17] sm:$0x1] }
 0x9d8   : > { %1981 = vmatprep.subr.bf16.mxu0 %v2256_v19  ;;  %v1486_v23 = vsel %vm833_vm2, %v1484_v21, 0.0  ;;  %1991 = vmatprep.mubr.msk.bf16.mxu1 %vm2257_vm5, %v2256_v19  ;;  %v1563_v42 = vld [vmem:[%s2789_s30] sm:$0x1] }
 0x9d9   : > { %1988 = vmatpush3.bf16.msra.mxu1 %v2132_v6 }
 0x9da   : > { %1989 = vmatprep.subr.bf16.mxu1 %v2256_v19 }
 0x9db   : > { %v1485_v22 = vld [vmem:[#allocation3 + $0x8] sm:$0xff]  ;;  %1982 = vmatpush3.bf16.msra.mxu0 %v2131_v20 }
 0x9dc   : > { %v1487_v24 = vsel %vm833_vm2, %v1485_v22, 0.0 }
 0x9dd   : > { %v1488_v25 = vadd.f32 %v1487_v24, %v1486_v23  ;;  %1990 = vmatpush3.bf16.msra.mxu1 %v2133_v34 }
 0x9df   : > { %v1489_v26 = vrot.slane %v1488_v25, 4 }
 0x9e1   : > { %v1490_v27 = vadd.f32 %v1489_v26, %v1488_v25 }
 0x9e3   : > { %v1491_v28 = vrot.slane %v1490_v27, 2 }
 0x9e5   : > { %v1492_v29 = vadd.f32 %v1491_v28, %v1490_v27 }
 0x9e7   : > { %v1493_v30 = vrot.slane %v1492_v29, 1 }
 0x9e9   : > { %v1494_v31 = vadd.f32 %v1493_v30, %v1492_v29 }
 0x9eb   : > { %v1496_v32 = vmul.f32 0.0625, %v1494_v31 }
 0x9ed   : > { %v1497_v33 = vpack.c.bf16 %v1496_v32, %v1496_v32 }
 0x9ef   : > { %1984 = vmatmul.mubr.msk.bf16.vlgmr.msra.gmra.mxu0 %vm833_vm2, %v1497_v33 }
 0xaaf   : > { %v1552_v36 = vpop.f32.mrf.mxu0 }
 0xab0   : > { %v1553_v37 = vadd.f32 %v1552_v36, %v1502_v35 }
 0xab1   : > { %v1985_v38 = vpop.f32.mrf.mxu0 }
 0xab2   : > { %v1558_v39 = vpack.c.bf16 %v1553_v37, %v1553_v37 }
 0xab3   : > { %v1555_v40 = vpop.f32.mrf.mxu0 }
 0xab4   : > { %1992 = vmatmul.mubr.msk.bf16.vlgmr.msra.gmra.mxu1 %vm833_vm2, %v1558_v39 }
 0xab5   : > { %v1986_v41 = vpop.f32.mrf.mxu0 }
 0xb74   : > { %v1613_v43 = vpop.f32.mrf.mxu1 }
 0xb75   : > { %v1614_v44 = vadd.f32 %v1613_v43, %v1563_v42 }
 0xb76   : > { %v1993_v45 = vpop.f32.mrf.mxu1 }
 0xb77   : > { %1620 = vst.msk [vmem:[%s2510_s16] sm:$0x1] %vm1619_vm6, %v1614_v44 }
 0xb78   : > { %v1616_v46 = vpop.f32.mrf.mxu1 }
 0xb7a   : > { %v1994_v47 = vpop.f32.mrf.mxu1 }
 0xb7b PF: > { %s2790_s4 = sld [smem:[#allocation13_spill]]  ;;  %s1634_s24 = sshll.u32 %s2510_s16, 4  ;;  %s1635_s24 = int_to_ptr.vmem [resolvable:$true] %s1634_s24 }
 0xb7c   : > { %s2792_s29 = sld [smem:[#allocation31_spill]]  ;;  %s2794_s23 = sand.u32 1, %s2221_s28  }
 0xb7d   : > { %s1622_s25 = scalar_lea.sflag [#allocation5], %s2794_s23  ;;  %s2149_s22 = scalar_lea.vmem %s1635_s24, 16 }
 0xb7e   : > { %p2150_p13 = scmp.ne.s32.totalorder %s1635_s24, %s2149_s22  ;;  %s2258_s2 = smov [#allocation7]  }
 0xb7f   : > { %s2153_s17 = sshll.u32 %s2258_s2, 4  ;;  %s2154_s17 = int_to_ptr.vmem [resolvable:$false] %s2153_s17 }
 0xb80   : > { %p2151_p0 = pnand %p2150_p13, %p2404_p3  ;;  %s2155_s14 = scalar_lea.vmem %s2154_s17, 32 }
 0xb81   : > { %s1883_s20 = sshll.u32 %s2790_s4, 4  ;;  %p2156_p2 = scmp.lt.s32.totalorder %s1635_s24, %s2154_s17 }
 0xb82   : > { %s2793_s21 = smov %s2792_s29  ;;  %s1632_s27 = scalar_lea.hbm %s2792_s29, %s1883_s20 }
 0xb83   : > { %p2152_p1 = pneg %p2151_p0  ;;  %p2157_p4 = scmp.lt.s32.totalorder %s2155_s14, %s2149_s22 }
 0xb85   : > { %p2158_p5 = por %p2157_p4, %p2156_p2 }
 0xb87   : > { %p2159_p6 = pnand %p2158_p5, %p2152_p1 }
 0xb89   : > { %2162 = shalt.err (!%p2159_p6)
}
 0xb8a   : > { %s2163_s15 = scalar_lea.hbm %s1632_s27, 16  ;;  %s2167_s4 = scalar_lea.hbm %s2793_s21, 32 }
 0xb8b   : > { %p2164_p7 = scmp.ne.s32.totalorder %s1632_s27, %s2163_s15  ;;  %p2168_p9 = scmp.lt.s32.totalorder %s1632_s27, %s2793_s21 }
 0xb8c   : > { %p2169_p10 = scmp.lt.s32.totalorder %s2167_s4, %s2163_s15 }
 0xb8d   : > { %p2165_p8 = pnand %p2164_p7, %p2404_p3 }
 0xb8e   : > { %p2170_p12 = por %p2169_p10, %p2168_p9 }
 0xb8f   : > { %p2166_p11 = pneg %p2165_p8 }
 0xb91   : > { %p2171_p13 = pnand %p2170_p12, %p2166_p11 }
 0xb93   : > { %2174 = shalt.err (!%p2171_p13)
}
 0xb94   : > { %1999 = dma.vmem_to_hbm [thread:$0]  (%p2404_p3), %s1635_s24, 16, %s1632_s27, %s1622_s25  }
 0xb95 PF: > { %s2795_s1 = sld [smem:[#allocation16_spill]] }
 0xb96   : > { %s2796_s29 = sld [smem:[#allocation10_spill]] }
 0xb97   : > { %s2797_s23 = sld [smem:[#allocation20_spill]] }
 0xb9b   : > { %p2011_p0 = scmp.ge.s32.totalorder %s2795_s1, 2 }
 0xb9c   : > { %s1646_s22 = sand.u32 1, %s2796_s29  }
 0xb9d   : > { %p2798_p1 = scmp.ne.s32.totalorder %s2797_s23, 0  ;;  %s1647_s2 = scalar_lea.sflag [#allocation5], %s1646_s22 }
 0xb9f   : > { %p2006_p2 = pnand %p2011_p0, %p2798_p1 }
 0xba1   : > { %p2007_p4 = pneg %p2006_p2 }
 0xba3   : > { %2212 = dma.done.wait (%p2007_p4), %s1647_s2, 16  }
 0xba4   : > { %2214 = vsyncadd (%p2007_p4), %s1647_s2, 4294967280  ;;  %s32_s20 = sadd.s32 1, %s2795_s1   ;;  %s2799_s17 = sld [smem:[#allocation11_spill]] }
 0xba5   : > { %p29_p5 = scmp.ge.s32.totalorder %s32_s20, 6   ;;  %s2800_s29 = sld [smem:[#allocation21_spill]] }
 0xba6   : > { %s2801_s30 = sld [smem:[#allocation14_spill]]  ;;  %s2805_s27 = smov %s2221_s28 }
 0xba7   : > { %s2802_s0 = sld [smem:[#allocation15_spill]]  ;;  %31 = sbr.rel (!%p29_p5) target bundleno = 16 (0x10), region = 176 }
 0xba8   : > { %s2803_s19 = sld [smem:[#allocation17_spill]] }
 0xba9   : > { %s2804_s1 = sld [smem:[#allocation19_spill]] }
 0xbaa   : > { %s2806_s28 = smov %s2799_s17 }
 0xbac   :  { %1651 = vsyncpa [#allocation5], 1 }
 0xbad   :  { %1653 = vsyncpa [#allocation5 + $0x1], 1 }
 0xbae   :  { %1654 = vsyncpa [#allocation6], 1 }
 0xbaf   :  { %1656 = vsyncpa [#allocation6 + $0x1], 1 }

</bundles_post_ra>
